<compile_context>
chip_gen: v7x
topology: tpu7x:2x2x1
jax: 0.10.0
libtpu: 0.0.40
codegen_flags: <defaults>
</compile_context>

<pallas_src>
import functools

import numpy as np
import jax
import jax.numpy as jnp
from jax import lax
from jax.experimental import pallas as pl
from jax.experimental.pallas import tpu as pltpu

EPS = 1e-5
C_PAD = 128        # lane-dense channel padding used throughout the conv stack
H0, W0 = 12, 82    # reshape_dim of the module


# ----------------------------------------------------------------------------
# Pallas kernel: 3x3 SAME conv (BN folded into weights/bias) + ReLU.
# One image per grid step; 9 shifted matmuls accumulated in f32 per output row.
# ----------------------------------------------------------------------------
def _conv3x3_kernel(x_ref, w_ref, b_ref, o_ref, *, H, W):
    """x_ref: (1, H+2, W+2, C) bf16  (spatially zero-padded, channel-padded)
       w_ref: (9, C, Cout)     bf16  (tap-major, BN scale folded in)
       b_ref: (1, Cout)        f32   (conv bias + BN shift folded)
       o_ref: (1, H, W, Cout)  bf16
    """
    cout = w_ref.shape[2]
    bias = b_ref[...]                                      # (1, Cout) f32

    @pl.loop(0, H)
    def _(h):
        acc = jnp.zeros((W, cout), jnp.float32)
        for kh in range(3):                                # 9 shifted MXU matmuls
            for kw in range(3):
                patch = x_ref[0, h + kh, pl.ds(kw, W), :]  # (W, C) bf16
                acc = acc + jnp.dot(patch, w_ref[kh * 3 + kw],
                                    preferred_element_type=jnp.float32)
        y = jnp.maximum(acc + bias, 0.0)                   # bias + ReLU epilogue
        o_ref[0, h, :, :] = y.astype(o_ref.dtype)


def conv3x3_bn_relu(x_pad, w9, bias):
    """x_pad: (B, H+2, W+2, C) bf16; w9: (9, C, Cout) bf16; bias: (1, Cout) f32."""
    B, Hp, Wp, C = x_pad.shape
    H, W = Hp - 2, Wp - 2
    Cout = w9.shape[2]
    flops = 2 * B * H * W * 9 * C * Cout
    bytes_acc = 2 * (x_pad.size + w9.size + B * H * W * Cout) + 4 * bias.size
    return pl.pallas_call(
        functools.partial(_conv3x3_kernel, H=H, W=W),
        out_shape=jax.ShapeDtypeStruct((B, H, W, Cout), jnp.bfloat16),
        grid=(B,),
        in_specs=[
            pl.BlockSpec((1, Hp, Wp, C), lambda b: (b, 0, 0, 0)),
            pl.BlockSpec((9, C, Cout), lambda b: (0, 0, 0)),
            pl.BlockSpec((1, Cout), lambda b: (0, 0)),
        ],
        out_specs=pl.BlockSpec((1, H, W, Cout), lambda b: (b, 0, 0, 0)),
        compiler_params=pltpu.CompilerParams(
            dimension_semantics=("parallel",)),
        cost_estimate=pl.CostEstimate(flops=flops, transcendentals=0,
                                      bytes_accessed=bytes_acc),
    )(x_pad, w9, bias)


# ----------------------------------------------------------------------------
# Pallas kernel: fused fc1->fc2->fc3->fc4 stack, weights resident in VMEM.
# fc4 is zero-padded to 128 output lanes so the store is lane-dense.
# ----------------------------------------------------------------------------
def _fc_stack_kernel(x_ref, w1_ref, b1_ref, w2_ref, b2_ref, w3_ref, b3_ref,
                     w4_ref, b4_ref, o_ref):
    h = jnp.dot(x_ref[...], w1_ref[...], preferred_element_type=jnp.float32)
    h = jnp.maximum(h + b1_ref[...], 0.0).astype(jnp.bfloat16)
    h = jnp.dot(h, w2_ref[...], preferred_element_type=jnp.float32)
    h = jnp.maximum(h + b2_ref[...], 0.0).astype(jnp.bfloat16)
    h = jnp.dot(h, w3_ref[...], preferred_element_type=jnp.float32)
    h = jnp.maximum(h + b3_ref[...], 0.0).astype(jnp.bfloat16)
    h = jnp.dot(h, w4_ref[...], preferred_element_type=jnp.float32)
    o_ref[...] = (h + b4_ref[...]).astype(o_ref.dtype)


def fc_stack(feat, prep):
    """feat: (B, 2048) bf16 -> (B, 128) f32 padded logits."""
    B, K = feat.shape
    w1, b1 = prep["fc_w1"], prep["fc_b1"]
    w2, b2 = prep["fc_w2"], prep["fc_b2"]
    w3, b3 = prep["fc_w3"], prep["fc_b3"]
    w4, b4 = prep["fc_w4"], prep["fc_b4"]
    Nout = w4.shape[1]
    TM = B if B <= 256 else 256                   # M-tiling for large batches
    grid_m = pl.cdiv(B, TM)
    flops = 2 * B * (K * w1.shape[1] + w1.shape[1] * w2.shape[1]
                     + w2.shape[1] * w3.shape[1] + w3.shape[1] * Nout)
    bytes_acc = (2 * (feat.size + w1.size + w2.size + w3.size + w4.size)
                 + 4 * (b1.size + b2.size + b3.size + b4.size)
                 + 4 * B * Nout)
    full = lambda i: (0, 0)
    return pl.pallas_call(
        _fc_stack_kernel,
        out_shape=jax.ShapeDtypeStruct((B, Nout), jnp.float32),
        grid=(grid_m,),
        in_specs=[
            pl.BlockSpec((TM, K), lambda i: (i, 0)),
            pl.BlockSpec(w1.shape, full), pl.BlockSpec(b1.shape, full),
            pl.BlockSpec(w2.shape, full), pl.BlockSpec(b2.shape, full),
            pl.BlockSpec(w3.shape, full), pl.BlockSpec(b3.shape, full),
            pl.BlockSpec(w4.shape, full), pl.BlockSpec(b4.shape, full),
        ],
        out_specs=pl.BlockSpec((TM, Nout), lambda i: (i, 0)),
        compiler_params=pltpu.CompilerParams(
            dimension_semantics=("parallel",)),
        cost_estimate=pl.CostEstimate(flops=flops, transcendentals=0,
                                      bytes_accessed=bytes_acc),
    )(feat, w1, b1, w2, b2, w3, b3, w4, b4)


# ----------------------------------------------------------------------------
# Small JAX glue (adaptive pool, PyTorch semantics)
# ----------------------------------------------------------------------------
def _adaptive_bounds(inp, out):
    return [(int(np.floor(i * inp / out)), int(np.ceil((i + 1) * inp / out)))
            for i in range(out)]


def adaptive_avg_pool_4x4(x_nhwc):
    hb = _adaptive_bounds(x_nhwc.shape[1], 4)
    wb = _adaptive_bounds(x_nhwc.shape[2], 4)
    rows = []
    for (h0, h1) in hb:
        cols = [jnp.mean(x_nhwc[:, h0:h1, w0:w1, :], axis=(1, 2))
                for (w0, w1) in wb]
        rows.append(jnp.stack(cols, axis=1))
    return jnp.stack(rows, axis=1)  # (B, 4, 4, C)


# ----------------------------------------------------------------------------
# One-time parameter preparation: fold BN, reorder / pad / bf16-cast weights.
# ----------------------------------------------------------------------------
def prepare_params(p):
    def bn_fold(bn):
        gamma, beta, mean, var = bn
        s = gamma / jnp.sqrt(var + EPS)
        return s, beta - mean * s

    prep = {}

    # conv1 (plain-JAX VPU path, Cin=1): BN scale folded into the 9 taps.
    s1, t1 = bn_fold(p["bn1"])
    w1c, b1c = p["conv1"]
    prep["conv1_w"] = (w1c[:, 0] * s1[:, None, None]).astype(jnp.float32)  # (32,3,3)
    prep["conv1_b"] = (b1c * s1 + t1).astype(jnp.float32)                  # (32,)

    # conv2 / conv3 -> tap-major (9, Cin, Cout) bf16 with BN scale folded and
    # channels zero-padded to 128 lanes.
    def conv_prep(wc, bc, bn, cin_pad, cout_pad):
        s, t = bn_fold(bn)
        cout, cin = wc.shape[0], wc.shape[1]
        w = wc * s[:, None, None, None]                     # fold BN scale
        w9 = jnp.transpose(w, (2, 3, 1, 0)).reshape(9, cin, cout)
        w9 = jnp.pad(w9, ((0, 0), (0, cin_pad - cin), (0, cout_pad - cout)))
        bias = jnp.pad(bc * s + t, (0, cout_pad - cout))
        return w9.astype(jnp.bfloat16), bias.reshape(1, -1).astype(jnp.float32)

    prep["conv2_w"], prep["conv2_b"] = conv_prep(*p["conv2"], p["bn2"], C_PAD, C_PAD)
    prep["conv3_w"], prep["conv3_b"] = conv_prep(*p["conv3"], p["bn3"], C_PAD, C_PAD)

    # fc1: transpose to (in, out) and permute rows from PyTorch's NCHW flatten
    # order (c*16 + h*4 + w) to the NHWC flatten order the conv stack emits.
    w1, b1 = p["fc1"]
    w1t = w1.T.reshape(C_PAD, 4, 4, -1).transpose(1, 2, 0, 3).reshape(4 * 4 * C_PAD, -1)
    prep["fc_w1"] = w1t.astype(jnp.bfloat16)
    prep["fc_b1"] = b1.reshape(1, -1).astype(jnp.float32)

    for name in ("fc2", "fc3"):
        w, b = p[name]
        prep[f"fc_w{name[-1]}"] = w.T.astype(jnp.bfloat16)
        prep[f"fc_b{name[-1]}"] = b.reshape(1, -1).astype(jnp.float32)

    w4, b4 = p["fc4"]
    nc = w4.shape[0]
    prep["fc_w4"] = jnp.pad(w4.T, ((0, 0), (0, C_PAD - nc))).astype(jnp.bfloat16)
    prep["fc_b4"] = jnp.pad(b4, (0, C_PAD - nc)).reshape(1, -1).astype(jnp.float32)
    return prep


# ----------------------------------------------------------------------------
# Full forward
# ----------------------------------------------------------------------------
def deep_eigenspace_cnn_forward(x, prep, *, num_classes=2):
    """x: (B, 984) float32 -> logits (B, num_classes)."""
    B = x.shape[0]
    assert x.shape[1] == H0 * W0
    img = x.reshape(B, H0, W0).astype(jnp.float32)

    # conv1 + BN + ReLU: Cin=1, K=9 -> 9 shifted VPU multiply-adds in plain JAX
    # (an MXU matmul here wastes >90% of the contraction depth).
    xp = jnp.pad(img, ((0, 0), (1, 1), (1, 1)))
    wk = prep["conv1_w"]                                    # (32, 3, 3)
    acc = jnp.zeros((B, H0, W0, 32), jnp.float32)
    for kh in range(3):
        for kw in range(3):
            acc = acc + xp[:, kh:kh + H0, kw:kw + W0, None] * wk[:, kh, kw]
    h = jnp.maximum(acc + prep["conv1_b"], 0.0)             # (B,12,82,32)

    # channel-pad to 128 lanes + SAME spatial pad, bf16 for the MXU.
    h = jnp.pad(h, ((0, 0), (1, 1), (1, 1), (0, C_PAD - 32))).astype(jnp.bfloat16)
    h = conv3x3_bn_relu(h, prep["conv2_w"], prep["conv2_b"])   # (B,12,82,128)

    # 2x2 max pool (zero-padded channels stay zero), then pad for conv3.
    h = h.reshape(B, H0 // 2, 2, W0 // 2, 2, C_PAD).max(axis=(2, 4))  # (B,6,41,128)
    h = jnp.pad(h, ((0, 0), (1, 1), (1, 1), (0, 0)))
    h = conv3x3_bn_relu(h, prep["conv3_w"], prep["conv3_b"])   # (B,6,41,128)

    # AdaptiveAvgPool2d((4,4)), NHWC.
    h = adaptive_avg_pool_4x4(h.astype(jnp.float32))           # (B,4,4,128)

    # NHWC flatten; PyTorch's NCHW-flatten permutation is baked into fc_w1.
    feat = h.reshape(B, 4 * 4 * C_PAD).astype(jnp.bfloat16)
    logits = fc_stack(feat, prep)                              # (B,128) f32 (padded)
    return logits[:, :num_classes]


# ----------------------------------------------------------------------------
# Pure-JAX reference (for correctness check only)
# ----------------------------------------------------------------------------
def reference_forward(x, p):
    B = x.shape[0]
    h = x.reshape(B, 1, H0, W0)  # NCHW

    def cbr(h, w, b, g, bt, m, v):
        y = lax.conv_general_dilated(h, w, (1, 1), "SAME",
                                     dimension_numbers=("NCHW", "OIHW", "NCHW"))
        y = y + b[None, :, None, None]
        s = g / jnp.sqrt(v + EPS)
        y = y * s[None, :, None, None] + (bt - m * s)[None, :, None, None]
        return jnp.maximum(y, 0.0)

    h = cbr(h, *p["conv1"], *p["bn1"])
    h = cbr(h, *p["conv2"], *p["bn2"])
    Bc, C, H, W = h.shape
    h = h.reshape(Bc, C, H // 2, 2, W // 2, 2).max(axis=(3, 5))
    h = cbr(h, *p["conv3"], *p["bn3"])
    hb = _adaptive_bounds(h.shape[2], 4)
    wb = _adaptive_bounds(h.shape[3], 4)
    rows = []
    for (h0, h1) in hb:
        cols = [jnp.mean(h[:, :, h0:h1, w0:w1], axis=(2, 3)) for (w0, w1) in wb]
        rows.append(jnp.stack(cols, axis=2))
    h = jnp.stack(rows, axis=2).reshape(B, -1)  # (B, 128*4*4) NCHW flatten
    w1, b1 = p["fc1"]; h = jnp.maximum(h @ w1.T + b1, 0.0)
    w2, b2 = p["fc2"]; h = jnp.maximum(h @ w2.T + b2, 0.0)
    w3, b3 = p["fc3"]; h = jnp.maximum(h @ w3.T + b3, 0.0)
    w4, b4 = p["fc4"]; h = h @ w4.T + b4
    return h


# ----------------------------------------------------------------------------
# Deterministic parameter initialization (matches the nn.Module shapes)
# ----------------------------------------------------------------------------
def init_params(key, num_classes=2):
    def nxt():
        nonlocal key
        key, sub = jax.random.split(key)
        return sub

    def conv(cout, cin):
        w = 0.1 * jax.random.normal(nxt(), (cout, cin, 3, 3), jnp.float32)
        b = 0.05 * jax.random.normal(nxt(), (cout,), jnp.float32)
        return (w, b)

    def bn(c):
        gamma = 0.5 + jax.random.uniform(nxt(), (c,), jnp.float32)
        beta = 0.1 * jax.random.normal(nxt(), (c,), jnp.float32)
        mean = 0.1 * jax.random.normal(nxt(), (c,), jnp.float32)
        var = 0.5 + jax.random.uniform(nxt(), (c,), jnp.float32)
        return (gamma, beta, mean, var)

    def fc(out_f, in_f):
        w = (1.0 / np.sqrt(in_f)) * jax.random.normal(nxt(), (out_f, in_f), jnp.float32)
        b = 0.05 * jax.random.normal(nxt(), (out_f,), jnp.float32)
        return (w, b)

    return {
        "conv1": conv(32, 1),   "bn1": bn(32),
        "conv2": conv(64, 32),  "bn2": bn(64),
        "conv3": conv(128, 64), "bn3": bn(128),
        "fc1": fc(512, 128 * 4 * 4),
        "fc2": fc(256, 512),
        "fc3": fc(128, 256),
        "fc4": fc(num_classes, 128),
    }


if __name__ == "__main__":
    key = jax.random.PRNGKey(0)
    key, xk = jax.random.split(key)
    batch, num_classes = 2, 2
    x = jax.random.normal(xk, (batch, 984), jnp.float32)
    params = init_params(key, num_classes=num_classes)

    prep = prepare_params(params)                   # one-time weight prep
    fwd = jax.jit(functools.partial(deep_eigenspace_cnn_forward,
                                    num_classes=num_classes))
    out = jax.block_until_ready(fwd(x, prep))
    assert out.shape == (batch, num_classes), out.shape

    ref = jax.block_until_ready(reference_forward(x, params))
    np.testing.assert_allclose(np.asarray(out), np.asarray(ref),
                               rtol=5e-2, atol=5e-2)

    print("KERNEL_OK")
</pallas_src>

<mosaic_0001>
module attributes {stable_mosaic.version = 11 : i64} {
  func.func @_conv3x3_kernel(%arg0: i32, %arg1: memref<1x14x84x128xbf16, #tpu.memory_space<vmem>>, %arg2: memref<9x128x128xbf16, #tpu.memory_space<vmem>>, %arg3: memref<1x128xf32, #tpu.memory_space<vmem>>, %arg4: memref<1x12x82x128xbf16, #tpu.memory_space<vmem>>) attributes {dimension_semantics = [#tpu.dimension_semantics<parallel>], iteration_bounds = array<i64: 2>, scalar_prefetch = 0 : i64, scratch_operands = 0 : i64, tpu.core_type = #tpu.core_type<tc>, window_params = [{transform_indices = @transform_0, window_bounds = array<i64: 1, 14, 84, 128>}, {pipeline_mode = #tpu.pipeline_mode<synchronous>, transform_indices = @transform_1, window_bounds = array<i64: 9, 128, 128>}, {pipeline_mode = #tpu.pipeline_mode<synchronous>, transform_indices = @transform_2, window_bounds = array<i64: 1, 128>}, {transform_indices = @transform_3, window_bounds = array<i64: 1, 12, 82, 128>}]} {
    %c0 = arith.constant 0 : index
    %c0_0 = arith.constant 0 : index
    %0 = vector.load %arg3[%c0, %c0_0] : memref<1x128xf32, #tpu.memory_space<vmem>>, vector<1x128xf32>
    %c0_i32 = arith.constant 0 : i32
    %c12_i32 = arith.constant 12 : i32
    %1 = arith.addi %c0_i32, %c12_i32 : i32
    %c1_i32 = arith.constant 1 : i32
    scf.for %arg5 = %c0_i32 to %1 step %c1_i32  : i32 {
      %c1_i32_2 = arith.constant 1 : i32
      %2 = arith.muli %arg5, %c1_i32_2 : i32
      %c0_i32_3 = arith.constant 0 : i32
      %3 = arith.addi %c0_i32_3, %2 : i32
      %cst = arith.constant 0.000000e+00 : f32
      %4 = vector.broadcast %cst : f32 to vector<82x128xf32>
      %c0_i32_4 = arith.constant 0 : i32
      %5 = arith.addi %3, %c0_i32_4 : i32
      %c0_5 = arith.constant 0 : index
      %6 = arith.index_cast %5 : i32 to index
      %c0_6 = arith.constant 0 : index
      %c0_7 = arith.constant 0 : index
      %7 = vector.load %arg1[%c0_5, %6, %c0_6, %c0_7] : memref<1x14x84x128xbf16, #tpu.memory_space<vmem>>, vector<1x1x82x128xbf16>
      %8 = vector.shape_cast %7 : vector<1x1x82x128xbf16> to vector<82x128xbf16>
      %c0_8 = arith.constant 0 : index
      %c0_9 = arith.constant 0 : index
      %c0_10 = arith.constant 0 : index
      %9 = vector.load %arg2[%c0_8, %c0_9, %c0_10] : memref<9x128x128xbf16, #tpu.memory_space<vmem>>, vector<1x128x128xbf16>
      %10 = vector.shape_cast %9 : vector<1x128x128xbf16> to vector<128x128xbf16>
      %cst_11 = arith.constant dense<0.000000e+00> : vector<82x128xf32>
      %11 = tpu.matmul %8, %10, %cst_11 {dimension_numbers = #tpu.dot_dimension_numbers<[1], [0], [0], [1], [0, 0, 1, 1], [], []>} : vector<82x128xbf16>, vector<128x128xbf16>, vector<82x128xf32> -> vector<82x128xf32>
      %12 = arith.addf %4, %11 : vector<82x128xf32>
      %c0_i32_12 = arith.constant 0 : i32
      %13 = arith.addi %3, %c0_i32_12 : i32
      %c0_13 = arith.constant 0 : index
      %14 = arith.index_cast %13 : i32 to index
      %c1 = arith.constant 1 : index
      %c0_14 = arith.constant 0 : index
      %15 = vector.load %arg1[%c0_13, %14, %c1, %c0_14] : memref<1x14x84x128xbf16, #tpu.memory_space<vmem>>, vector<1x1x82x128xbf16>
      %16 = vector.shape_cast %15 : vector<1x1x82x128xbf16> to vector<82x128xbf16>
      %c1_15 = arith.constant 1 : index
      %c0_16 = arith.constant 0 : index
      %c0_17 = arith.constant 0 : index
      %17 = vector.load %arg2[%c1_15, %c0_16, %c0_17] : memref<9x128x128xbf16, #tpu.memory_space<vmem>>, vector<1x128x128xbf16>
      %18 = vector.shape_cast %17 : vector<1x128x128xbf16> to vector<128x128xbf16>
      %cst_18 = arith.constant dense<0.000000e+00> : vector<82x128xf32>
      %19 = tpu.matmul %16, %18, %cst_18 {dimension_numbers = #tpu.dot_dimension_numbers<[1], [0], [0], [1], [0, 0, 1, 1], [], []>} : vector<82x128xbf16>, vector<128x128xbf16>, vector<82x128xf32> -> vector<82x128xf32>
      %20 = arith.addf %12, %19 : vector<82x128xf32>
      %c0_i32_19 = arith.constant 0 : i32
      %21 = arith.addi %3, %c0_i32_19 : i32
      %c0_20 = arith.constant 0 : index
      %22 = arith.index_cast %21 : i32 to index
      %c2 = arith.constant 2 : index
      %c0_21 = arith.constant 0 : index
      %23 = vector.load %arg1[%c0_20, %22, %c2, %c0_21] : memref<1x14x84x128xbf16, #tpu.memory_space<vmem>>, vector<1x1x82x128xbf16>
      %24 = vector.shape_cast %23 : vector<1x1x82x128xbf16> to vector<82x128xbf16>
      %c2_22 = arith.constant 2 : index
      %c0_23 = arith.constant 0 : index
      %c0_24 = arith.constant 0 : index
      %25 = vector.load %arg2[%c2_22, %c0_23, %c0_24] : memref<9x128x128xbf16, #tpu.memory_space<vmem>>, vector<1x128x128xbf16>
      %26 = vector.shape_cast %25 : vector<1x128x128xbf16> to vector<128x128xbf16>
      %cst_25 = arith.constant dense<0.000000e+00> : vector<82x128xf32>
      %27 = tpu.matmul %24, %26, %cst_25 {dimension_numbers = #tpu.dot_dimension_numbers<[1], [0], [0], [1], [0, 0, 1, 1], [], []>} : vector<82x128xbf16>, vector<128x128xbf16>, vector<82x128xf32> -> vector<82x128xf32>
      %28 = arith.addf %20, %27 : vector<82x128xf32>
      %c1_i32_26 = arith.constant 1 : i32
      %29 = arith.addi %3, %c1_i32_26 : i32
      %c0_27 = arith.constant 0 : index
      %30 = arith.index_cast %29 : i32 to index
      %c0_28 = arith.constant 0 : index
      %c0_29 = arith.constant 0 : index
      %31 = vector.load %arg1[%c0_27, %30, %c0_28, %c0_29] : memref<1x14x84x128xbf16, #tpu.memory_space<vmem>>, vector<1x1x82x128xbf16>
      %32 = vector.shape_cast %31 : vector<1x1x82x128xbf16> to vector<82x128xbf16>
      %c3 = arith.constant 3 : index
      %c0_30 = arith.constant 0 : index
      %c0_31 = arith.constant 0 : index
      %33 = vector.load %arg2[%c3, %c0_30, %c0_31] : memref<9x128x128xbf16, #tpu.memory_space<vmem>>, vector<1x128x128xbf16>
      %34 = vector.shape_cast %33 : vector<1x128x128xbf16> to vector<128x128xbf16>
      %cst_32 = arith.constant dense<0.000000e+00> : vector<82x128xf32>
      %35 = tpu.matmul %32, %34, %cst_32 {dimension_numbers = #tpu.dot_dimension_numbers<[1], [0], [0], [1], [0, 0, 1, 1], [], []>} : vector<82x128xbf16>, vector<128x128xbf16>, vector<82x128xf32> -> vector<82x128xf32>
      %36 = arith.addf %28, %35 : vector<82x128xf32>
      %c1_i32_33 = arith.constant 1 : i32
      %37 = arith.addi %3, %c1_i32_33 : i32
      %c0_34 = arith.constant 0 : index
      %38 = arith.index_cast %37 : i32 to index
      %c1_35 = arith.constant 1 : index
      %c0_36 = arith.constant 0 : index
      %39 = vector.load %arg1[%c0_34, %38, %c1_35, %c0_36] : memref<1x14x84x128xbf16, #tpu.memory_space<vmem>>, vector<1x1x82x128xbf16>
      %40 = vector.shape_cast %39 : vector<1x1x82x128xbf16> to vector<82x128xbf16>
      %c4 = arith.constant 4 : index
      %c0_37 = arith.constant 0 : index
      %c0_38 = arith.constant 0 : index
      %41 = vector.load %arg2[%c4, %c0_37, %c0_38] : memref<9x128x128xbf16, #tpu.memory_space<vmem>>, vector<1x128x128xbf16>
      %42 = vector.shape_cast %41 : vector<1x128x128xbf16> to vector<128x128xbf16>
      %cst_39 = arith.constant dense<0.000000e+00> : vector<82x128xf32>
      %43 = tpu.matmul %40, %42, %cst_39 {dimension_numbers = #tpu.dot_dimension_numbers<[1], [0], [0], [1], [0, 0, 1, 1], [], []>} : vector<82x128xbf16>, vector<128x128xbf16>, vector<82x128xf32> -> vector<82x128xf32>
      %44 = arith.addf %36, %43 : vector<82x128xf32>
      %c1_i32_40 = arith.constant 1 : i32
      %45 = arith.addi %3, %c1_i32_40 : i32
      %c0_41 = arith.constant 0 : index
      %46 = arith.index_cast %45 : i32 to index
      %c2_42 = arith.constant 2 : index
      %c0_43 = arith.constant 0 : index
      %47 = vector.load %arg1[%c0_41, %46, %c2_42, %c0_43] : memref<1x14x84x128xbf16, #tpu.memory_space<vmem>>, vector<1x1x82x128xbf16>
      %48 = vector.shape_cast %47 : vector<1x1x82x128xbf16> to vector<82x128xbf16>
      %c5 = arith.constant 5 : index
      %c0_44 = arith.constant 0 : index
      %c0_45 = arith.constant 0 : index
      %49 = vector.load %arg2[%c5, %c0_44, %c0_45] : memref<9x128x128xbf16, #tpu.memory_space<vmem>>, vector<1x128x128xbf16>
      %50 = vector.shape_cast %49 : vector<1x128x128xbf16> to vector<128x128xbf16>
      %cst_46 = arith.constant dense<0.000000e+00> : vector<82x128xf32>
      %51 = tpu.matmul %48, %50, %cst_46 {dimension_numbers = #tpu.dot_dimension_numbers<[1], [0], [0], [1], [0, 0, 1, 1], [], []>} : vector<82x128xbf16>, vector<128x128xbf16>, vector<82x128xf32> -> vector<82x128xf32>
      %52 = arith.addf %44, %51 : vector<82x128xf32>
      %c2_i32 = arith.constant 2 : i32
      %53 = arith.addi %3, %c2_i32 : i32
      %c0_47 = arith.constant 0 : index
      %54 = arith.index_cast %53 : i32 to index
      %c0_48 = arith.constant 0 : index
      %c0_49 = arith.constant 0 : index
      %55 = vector.load %arg1[%c0_47, %54, %c0_48, %c0_49] : memref<1x14x84x128xbf16, #tpu.memory_space<vmem>>, vector<1x1x82x128xbf16>
      %56 = vector.shape_cast %55 : vector<1x1x82x128xbf16> to vector<82x128xbf16>
      %c6 = arith.constant 6 : index
      %c0_50 = arith.constant 0 : index
      %c0_51 = arith.constant 0 : index
      %57 = vector.load %arg2[%c6, %c0_50, %c0_51] : memref<9x128x128xbf16, #tpu.memory_space<vmem>>, vector<1x128x128xbf16>
      %58 = vector.shape_cast %57 : vector<1x128x128xbf16> to vector<128x128xbf16>
      %cst_52 = arith.constant dense<0.000000e+00> : vector<82x128xf32>
      %59 = tpu.matmul %56, %58, %cst_52 {dimension_numbers = #tpu.dot_dimension_numbers<[1], [0], [0], [1], [0, 0, 1, 1], [], []>} : vector<82x128xbf16>, vector<128x128xbf16>, vector<82x128xf32> -> vector<82x128xf32>
      %60 = arith.addf %52, %59 : vector<82x128xf32>
      %c2_i32_53 = arith.constant 2 : i32
      %61 = arith.addi %3, %c2_i32_53 : i32
      %c0_54 = arith.constant 0 : index
      %62 = arith.index_cast %61 : i32 to index
      %c1_55 = arith.constant 1 : index
      %c0_56 = arith.constant 0 : index
      %63 = vector.load %arg1[%c0_54, %62, %c1_55, %c0_56] : memref<1x14x84x128xbf16, #tpu.memory_space<vmem>>, vector<1x1x82x128xbf16>
      %64 = vector.shape_cast %63 : vector<1x1x82x128xbf16> to vector<82x128xbf16>
      %c7 = arith.constant 7 : index
      %c0_57 = arith.constant 0 : index
      %c0_58 = arith.constant 0 : index
      %65 = vector.load %arg2[%c7, %c0_57, %c0_58] : memref<9x128x128xbf16, #tpu.memory_space<vmem>>, vector<1x128x128xbf16>
      %66 = vector.shape_cast %65 : vector<1x128x128xbf16> to vector<128x128xbf16>
      %cst_59 = arith.constant dense<0.000000e+00> : vector<82x128xf32>
      %67 = tpu.matmul %64, %66, %cst_59 {dimension_numbers = #tpu.dot_dimension_numbers<[1], [0], [0], [1], [0, 0, 1, 1], [], []>} : vector<82x128xbf16>, vector<128x128xbf16>, vector<82x128xf32> -> vector<82x128xf32>
      %68 = arith.addf %60, %67 : vector<82x128xf32>
      %c2_i32_60 = arith.constant 2 : i32
      %69 = arith.addi %3, %c2_i32_60 : i32
      %c0_61 = arith.constant 0 : index
      %70 = arith.index_cast %69 : i32 to index
      %c2_62 = arith.constant 2 : index
      %c0_63 = arith.constant 0 : index
      %71 = vector.load %arg1[%c0_61, %70, %c2_62, %c0_63] : memref<1x14x84x128xbf16, #tpu.memory_space<vmem>>, vector<1x1x82x128xbf16>
      %72 = vector.shape_cast %71 : vector<1x1x82x128xbf16> to vector<82x128xbf16>
      %c8 = arith.constant 8 : index
      %c0_64 = arith.constant 0 : index
      %c0_65 = arith.constant 0 : index
      %73 = vector.load %arg2[%c8, %c0_64, %c0_65] : memref<9x128x128xbf16, #tpu.memory_space<vmem>>, vector<1x128x128xbf16>
      %74 = vector.shape_cast %73 : vector<1x128x128xbf16> to vector<128x128xbf16>
      %cst_66 = arith.constant dense<0.000000e+00> : vector<82x128xf32>
      %75 = tpu.matmul %72, %74, %cst_66 {dimension_numbers = #tpu.dot_dimension_numbers<[1], [0], [0], [1], [0, 0, 1, 1], [], []>} : vector<82x128xbf16>, vector<128x128xbf16>, vector<82x128xf32> -> vector<82x128xf32>
      %76 = arith.addf %68, %75 : vector<82x128xf32>
      %77 = vector.broadcast %0 : vector<1x128xf32> to vector<82x128xf32>
      %78 = arith.addf %76, %77 : vector<82x128xf32>
      %cst_67 = arith.constant 0.000000e+00 : f32
      %79 = vector.broadcast %cst_67 : f32 to vector<82x128xf32>
      %80 = arith.maximumf %78, %79 : vector<82x128xf32>
      %81 = arith.truncf %80 : vector<82x128xf32> to vector<82x128xbf16>
      %c0_68 = arith.constant 0 : index
      %82 = arith.index_cast %3 : i32 to index
      %c0_69 = arith.constant 0 : index
      %c0_70 = arith.constant 0 : index
      %83 = vector.load %arg4[%c0_68, %82, %c0_69, %c0_70] : memref<1x12x82x128xbf16, #tpu.memory_space<vmem>>, vector<1x1x82x128xbf16>
      %84 = vector.shape_cast %83 : vector<1x1x82x128xbf16> to vector<82x128xbf16>
      %85 = vector.shape_cast %81 : vector<82x128xbf16> to vector<1x1x82x128xbf16>
      tpu.vector_store %arg4[%c0_68, %82, %c0_69, %c0_70], %85 {strides = array<i32>} : memref<1x12x82x128xbf16, #tpu.memory_space<vmem>>, vector<1x1x82x128xbf16>,
    }
    %c12_i32_1 = arith.constant 12 : i32
    return
  }
  func.func @transform_0(%arg0: i32) -> (i32, i32, i32, i32) {
    %c0_i32 = arith.constant 0 : i32
    %c0_i32_0 = arith.constant 0 : i32
    %c0_i32_1 = arith.constant 0 : i32
    %c0_i32_2 = arith.constant 0 : i32
    return %arg0, %c0_i32, %c0_i32_0, %c0_i32_1 : i32, i32, i32, i32
  }
  func.func @transform_1(%arg0: i32) -> (i32, i32, i32) {
    %c0_i32 = arith.constant 0 : i32
    %c0_i32_0 = arith.constant 0 : i32
    %c0_i32_1 = arith.constant 0 : i32
    %c0_i32_2 = arith.constant 0 : i32
    return %c0_i32, %c0_i32_0, %c0_i32_1 : i32, i32, i32
  }
  func.func @transform_2(%arg0: i32) -> (i32, i32) {
    %c0_i32 = arith.constant 0 : i32
    %c0_i32_0 = arith.constant 0 : i32
    %c0_i32_1 = arith.constant 0 : i32
    return %c0_i32, %c0_i32_0 : i32, i32
  }
  func.func @transform_3(%arg0: i32) -> (i32, i32, i32, i32) {
    %c0_i32 = arith.constant 0 : i32
    %c0_i32_0 = arith.constant 0 : i32
    %c0_i32_1 = arith.constant 0 : i32
    %c0_i32_2 = arith.constant 0 : i32
    return %arg0, %c0_i32, %c0_i32_0, %c0_i32_1 : i32, i32, i32, i32
  }
}

module attributes {stable_mosaic.version = 11 : i64} {
  func.func @_conv3x3_kernel(%arg0: i32, %arg1: memref<1x8x43x128xbf16, #tpu.memory_space<vmem>>, %arg2: memref<9x128x128xbf16, #tpu.memory_space<vmem>>, %arg3: memref<1x128xf32, #tpu.memory_space<vmem>>, %arg4: memref<1x6x41x128xbf16, #tpu.memory_space<vmem>>) attributes {dimension_semantics = [#tpu.dimension_semantics<parallel>], iteration_bounds = array<i64: 2>, scalar_prefetch = 0 : i64, scratch_operands = 0 : i64, tpu.core_type = #tpu.core_type<tc>, window_params = [{transform_indices = @transform_0, window_bounds = array<i64: 1, 8, 43, 128>}, {pipeline_mode = #tpu.pipeline_mode<synchronous>, transform_indices = @transform_1, window_bounds = array<i64: 9, 128, 128>}, {pipeline_mode = #tpu.pipeline_mode<synchronous>, transform_indices = @transform_2, window_bounds = array<i64: 1, 128>}, {transform_indices = @transform_3, window_bounds = array<i64: 1, 6, 41, 128>}]} {
    %c0 = arith.constant 0 : index
    %c0_0 = arith.constant 0 : index
    %0 = vector.load %arg3[%c0, %c0_0] : memref<1x128xf32, #tpu.memory_space<vmem>>, vector<1x128xf32>
    %c0_i32 = arith.constant 0 : i32
    %c6_i32 = arith.constant 6 : i32
    %1 = arith.addi %c0_i32, %c6_i32 : i32
    %c1_i32 = arith.constant 1 : i32
    scf.for %arg5 = %c0_i32 to %1 step %c1_i32  : i32 {
      %c1_i32_2 = arith.constant 1 : i32
      %2 = arith.muli %arg5, %c1_i32_2 : i32
      %c0_i32_3 = arith.constant 0 : i32
      %3 = arith.addi %c0_i32_3, %2 : i32
      %cst = arith.constant 0.000000e+00 : f32
      %4 = vector.broadcast %cst : f32 to vector<41x128xf32>
      %c0_i32_4 = arith.constant 0 : i32
      %5 = arith.addi %3, %c0_i32_4 : i32
      %c0_5 = arith.constant 0 : index
      %6 = arith.index_cast %5 : i32 to index
      %c0_6 = arith.constant 0 : index
      %c0_7 = arith.constant 0 : index
      %7 = vector.load %arg1[%c0_5, %6, %c0_6, %c0_7] : memref<1x8x43x128xbf16, #tpu.memory_space<vmem>>, vector<1x1x41x128xbf16>
      %8 = vector.shape_cast %7 : vector<1x1x41x128xbf16> to vector<41x128xbf16>
      %c0_8 = arith.constant 0 : index
      %c0_9 = arith.constant 0 : index
      %c0_10 = arith.constant 0 : index
      %9 = vector.load %arg2[%c0_8, %c0_9, %c0_10] : memref<9x128x128xbf16, #tpu.memory_space<vmem>>, vector<1x128x128xbf16>
      %10 = vector.shape_cast %9 : vector<1x128x128xbf16> to vector<128x128xbf16>
      %cst_11 = arith.constant dense<0.000000e+00> : vector<41x128xf32>
      %11 = tpu.matmul %8, %10, %cst_11 {dimension_numbers = #tpu.dot_dimension_numbers<[1], [0], [0], [1], [0, 0, 1, 1], [], []>} : vector<41x128xbf16>, vector<128x128xbf16>, vector<41x128xf32> -> vector<41x128xf32>
      %12 = arith.addf %4, %11 : vector<41x128xf32>
      %c0_i32_12 = arith.constant 0 : i32
      %13 = arith.addi %3, %c0_i32_12 : i32
      %c0_13 = arith.constant 0 : index
      %14 = arith.index_cast %13 : i32 to index
      %c1 = arith.constant 1 : index
      %c0_14 = arith.constant 0 : index
      %15 = vector.load %arg1[%c0_13, %14, %c1, %c0_14] : memref<1x8x43x128xbf16, #tpu.memory_space<vmem>>, vector<1x1x41x128xbf16>
      %16 = vector.shape_cast %15 : vector<1x1x41x128xbf16> to vector<41x128xbf16>
      %c1_15 = arith.constant 1 : index
      %c0_16 = arith.constant 0 : index
      %c0_17 = arith.constant 0 : index
      %17 = vector.load %arg2[%c1_15, %c0_16, %c0_17] : memref<9x128x128xbf16, #tpu.memory_space<vmem>>, vector<1x128x128xbf16>
      %18 = vector.shape_cast %17 : vector<1x128x128xbf16> to vector<128x128xbf16>
      %cst_18 = arith.constant dense<0.000000e+00> : vector<41x128xf32>
      %19 = tpu.matmul %16, %18, %cst_18 {dimension_numbers = #tpu.dot_dimension_numbers<[1], [0], [0], [1], [0, 0, 1, 1], [], []>} : vector<41x128xbf16>, vector<128x128xbf16>, vector<41x128xf32> -> vector<41x128xf32>
      %20 = arith.addf %12, %19 : vector<41x128xf32>
      %c0_i32_19 = arith.constant 0 : i32
      %21 = arith.addi %3, %c0_i32_19 : i32
      %c0_20 = arith.constant 0 : index
      %22 = arith.index_cast %21 : i32 to index
      %c2 = arith.constant 2 : index
      %c0_21 = arith.constant 0 : index
      %23 = vector.load %arg1[%c0_20, %22, %c2, %c0_21] : memref<1x8x43x128xbf16, #tpu.memory_space<vmem>>, vector<1x1x41x128xbf16>
      %24 = vector.shape_cast %23 : vector<1x1x41x128xbf16> to vector<41x128xbf16>
      %c2_22 = arith.constant 2 : index
      %c0_23 = arith.constant 0 : index
      %c0_24 = arith.constant 0 : index
      %25 = vector.load %arg2[%c2_22, %c0_23, %c0_24] : memref<9x128x128xbf16, #tpu.memory_space<vmem>>, vector<1x128x128xbf16>
      %26 = vector.shape_cast %25 : vector<1x128x128xbf16> to vector<128x128xbf16>
      %cst_25 = arith.constant dense<0.000000e+00> : vector<41x128xf32>
      %27 = tpu.matmul %24, %26, %cst_25 {dimension_numbers = #tpu.dot_dimension_numbers<[1], [0], [0], [1], [0, 0, 1, 1], [], []>} : vector<41x128xbf16>, vector<128x128xbf16>, vector<41x128xf32> -> vector<41x128xf32>
      %28 = arith.addf %20, %27 : vector<41x128xf32>
      %c1_i32_26 = arith.constant 1 : i32
      %29 = arith.addi %3, %c1_i32_26 : i32
      %c0_27 = arith.constant 0 : index
      %30 = arith.index_cast %29 : i32 to index
      %c0_28 = arith.constant 0 : index
      %c0_29 = arith.constant 0 : index
      %31 = vector.load %arg1[%c0_27, %30, %c0_28, %c0_29] : memref<1x8x43x128xbf16, #tpu.memory_space<vmem>>, vector<1x1x41x128xbf16>
      %32 = vector.shape_cast %31 : vector<1x1x41x128xbf16> to vector<41x128xbf16>
      %c3 = arith.constant 3 : index
      %c0_30 = arith.constant 0 : index
      %c0_31 = arith.constant 0 : index
      %33 = vector.load %arg2[%c3, %c0_30, %c0_31] : memref<9x128x128xbf16, #tpu.memory_space<vmem>>, vector<1x128x128xbf16>
      %34 = vector.shape_cast %33 : vector<1x128x128xbf16> to vector<128x128xbf16>
      %cst_32 = arith.constant dense<0.000000e+00> : vector<41x128xf32>
      %35 = tpu.matmul %32, %34, %cst_32 {dimension_numbers = #tpu.dot_dimension_numbers<[1], [0], [0], [1], [0, 0, 1, 1], [], []>} : vector<41x128xbf16>, vector<128x128xbf16>, vector<41x128xf32> -> vector<41x128xf32>
      %36 = arith.addf %28, %35 : vector<41x128xf32>
      %c1_i32_33 = arith.constant 1 : i32
      %37 = arith.addi %3, %c1_i32_33 : i32
      %c0_34 = arith.constant 0 : index
      %38 = arith.index_cast %37 : i32 to index
      %c1_35 = arith.constant 1 : index
      %c0_36 = arith.constant 0 : index
      %39 = vector.load %arg1[%c0_34, %38, %c1_35, %c0_36] : memref<1x8x43x128xbf16, #tpu.memory_space<vmem>>, vector<1x1x41x128xbf16>
      %40 = vector.shape_cast %39 : vector<1x1x41x128xbf16> to vector<41x128xbf16>
      %c4 = arith.constant 4 : index
      %c0_37 = arith.constant 0 : index
      %c0_38 = arith.constant 0 : index
      %41 = vector.load %arg2[%c4, %c0_37, %c0_38] : memref<9x128x128xbf16, #tpu.memory_space<vmem>>, vector<1x128x128xbf16>
      %42 = vector.shape_cast %41 : vector<1x128x128xbf16> to vector<128x128xbf16>
      %cst_39 = arith.constant dense<0.000000e+00> : vector<41x128xf32>
      %43 = tpu.matmul %40, %42, %cst_39 {dimension_numbers = #tpu.dot_dimension_numbers<[1], [0], [0], [1], [0, 0, 1, 1], [], []>} : vector<41x128xbf16>, vector<128x128xbf16>, vector<41x128xf32> -> vector<41x128xf32>
      %44 = arith.addf %36, %43 : vector<41x128xf32>
      %c1_i32_40 = arith.constant 1 : i32
      %45 = arith.addi %3, %c1_i32_40 : i32
      %c0_41 = arith.constant 0 : index
      %46 = arith.index_cast %45 : i32 to index
      %c2_42 = arith.constant 2 : index
      %c0_43 = arith.constant 0 : index
      %47 = vector.load %arg1[%c0_41, %46, %c2_42, %c0_43] : memref<1x8x43x128xbf16, #tpu.memory_space<vmem>>, vector<1x1x41x128xbf16>
      %48 = vector.shape_cast %47 : vector<1x1x41x128xbf16> to vector<41x128xbf16>
      %c5 = arith.constant 5 : index
      %c0_44 = arith.constant 0 : index
      %c0_45 = arith.constant 0 : index
      %49 = vector.load %arg2[%c5, %c0_44, %c0_45] : memref<9x128x128xbf16, #tpu.memory_space<vmem>>, vector<1x128x128xbf16>
      %50 = vector.shape_cast %49 : vector<1x128x128xbf16> to vector<128x128xbf16>
      %cst_46 = arith.constant dense<0.000000e+00> : vector<41x128xf32>
      %51 = tpu.matmul %48, %50, %cst_46 {dimension_numbers = #tpu.dot_dimension_numbers<[1], [0], [0], [1], [0, 0, 1, 1], [], []>} : vector<41x128xbf16>, vector<128x128xbf16>, vector<41x128xf32> -> vector<41x128xf32>
      %52 = arith.addf %44, %51 : vector<41x128xf32>
      %c2_i32 = arith.constant 2 : i32
      %53 = arith.addi %3, %c2_i32 : i32
      %c0_47 = arith.constant 0 : index
      %54 = arith.index_cast %53 : i32 to index
      %c0_48 = arith.constant 0 : index
      %c0_49 = arith.constant 0 : index
      %55 = vector.load %arg1[%c0_47, %54, %c0_48, %c0_49] : memref<1x8x43x128xbf16, #tpu.memory_space<vmem>>, vector<1x1x41x128xbf16>
      %56 = vector.shape_cast %55 : vector<1x1x41x128xbf16> to vector<41x128xbf16>
      %c6 = arith.constant 6 : index
      %c0_50 = arith.constant 0 : index
      %c0_51 = arith.constant 0 : index
      %57 = vector.load %arg2[%c6, %c0_50, %c0_51] : memref<9x128x128xbf16, #tpu.memory_space<vmem>>, vector<1x128x128xbf16>
      %58 = vector.shape_cast %57 : vector<1x128x128xbf16> to vector<128x128xbf16>
      %cst_52 = arith.constant dense<0.000000e+00> : vector<41x128xf32>
      %59 = tpu.matmul %56, %58, %cst_52 {dimension_numbers = #tpu.dot_dimension_numbers<[1], [0], [0], [1], [0, 0, 1, 1], [], []>} : vector<41x128xbf16>, vector<128x128xbf16>, vector<41x128xf32> -> vector<41x128xf32>
      %60 = arith.addf %52, %59 : vector<41x128xf32>
      %c2_i32_53 = arith.constant 2 : i32
      %61 = arith.addi %3, %c2_i32_53 : i32
      %c0_54 = arith.constant 0 : index
      %62 = arith.index_cast %61 : i32 to index
      %c1_55 = arith.constant 1 : index
      %c0_56 = arith.constant 0 : index
      %63 = vector.load %arg1[%c0_54, %62, %c1_55, %c0_56] : memref<1x8x43x128xbf16, #tpu.memory_space<vmem>>, vector<1x1x41x128xbf16>
      %64 = vector.shape_cast %63 : vector<1x1x41x128xbf16> to vector<41x128xbf16>
      %c7 = arith.constant 7 : index
      %c0_57 = arith.constant 0 : index
      %c0_58 = arith.constant 0 : index
      %65 = vector.load %arg2[%c7, %c0_57, %c0_58] : memref<9x128x128xbf16, #tpu.memory_space<vmem>>, vector<1x128x128xbf16>
      %66 = vector.shape_cast %65 : vector<1x128x128xbf16> to vector<128x128xbf16>
      %cst_59 = arith.constant dense<0.000000e+00> : vector<41x128xf32>
      %67 = tpu.matmul %64, %66, %cst_59 {dimension_numbers = #tpu.dot_dimension_numbers<[1], [0], [0], [1], [0, 0, 1, 1], [], []>} : vector<41x128xbf16>, vector<128x128xbf16>, vector<41x128xf32> -> vector<41x128xf32>
      %68 = arith.addf %60, %67 : vector<41x128xf32>
      %c2_i32_60 = arith.constant 2 : i32
      %69 = arith.addi %3, %c2_i32_60 : i32
      %c0_61 = arith.constant 0 : index
      %70 = arith.index_cast %69 : i32 to index
      %c2_62 = arith.constant 2 : index
      %c0_63 = arith.constant 0 : index
      %71 = vector.load %arg1[%c0_61, %70, %c2_62, %c0_63] : memref<1x8x43x128xbf16, #tpu.memory_space<vmem>>, vector<1x1x41x128xbf16>
      %72 = vector.shape_cast %71 : vector<1x1x41x128xbf16> to vector<41x128xbf16>
      %c8 = arith.constant 8 : index
      %c0_64 = arith.constant 0 : index
      %c0_65 = arith.constant 0 : index
      %73 = vector.load %arg2[%c8, %c0_64, %c0_65] : memref<9x128x128xbf16, #tpu.memory_space<vmem>>, vector<1x128x128xbf16>
      %74 = vector.shape_cast %73 : vector<1x128x128xbf16> to vector<128x128xbf16>
      %cst_66 = arith.constant dense<0.000000e+00> : vector<41x128xf32>
      %75 = tpu.matmul %72, %74, %cst_66 {dimension_numbers = #tpu.dot_dimension_numbers<[1], [0], [0], [1], [0, 0, 1, 1], [], []>} : vector<41x128xbf16>, vector<128x128xbf16>, vector<41x128xf32> -> vector<41x128xf32>
      %76 = arith.addf %68, %75 : vector<41x128xf32>
      %77 = vector.broadcast %0 : vector<1x128xf32> to vector<41x128xf32>
      %78 = arith.addf %76, %77 : vector<41x128xf32>
      %cst_67 = arith.constant 0.000000e+00 : f32
      %79 = vector.broadcast %cst_67 : f32 to vector<41x128xf32>
      %80 = arith.maximumf %78, %79 : vector<41x128xf32>
      %81 = arith.truncf %80 : vector<41x128xf32> to vector<41x128xbf16>
      %c0_68 = arith.constant 0 : index
      %82 = arith.index_cast %3 : i32 to index
      %c0_69 = arith.constant 0 : index
      %c0_70 = arith.constant 0 : index
      %83 = vector.load %arg4[%c0_68, %82, %c0_69, %c0_70] : memref<1x6x41x128xbf16, #tpu.memory_space<vmem>>, vector<1x1x41x128xbf16>
      %84 = vector.shape_cast %83 : vector<1x1x41x128xbf16> to vector<41x128xbf16>
      %85 = vector.shape_cast %81 : vector<41x128xbf16> to vector<1x1x41x128xbf16>
      tpu.vector_store %arg4[%c0_68, %82, %c0_69, %c0_70], %85 {strides = array<i32>} : memref<1x6x41x128xbf16, #tpu.memory_space<vmem>>, vector<1x1x41x128xbf16>,
    }
    %c6_i32_1 = arith.constant 6 : i32
    return
  }
  func.func @transform_0(%arg0: i32) -> (i32, i32, i32, i32) {
    %c0_i32 = arith.constant 0 : i32
    %c0_i32_0 = arith.constant 0 : i32
    %c0_i32_1 = arith.constant 0 : i32
    %c0_i32_2 = arith.constant 0 : i32
    return %arg0, %c0_i32, %c0_i32_0, %c0_i32_1 : i32, i32, i32, i32
  }
  func.func @transform_1(%arg0: i32) -> (i32, i32, i32) {
    %c0_i32 = arith.constant 0 : i32
    %c0_i32_0 = arith.constant 0 : i32
    %c0_i32_1 = arith.constant 0 : i32
    %c0_i32_2 = arith.constant 0 : i32
    return %c0_i32, %c0_i32_0, %c0_i32_1 : i32, i32, i32
  }
  func.func @transform_2(%arg0: i32) -> (i32, i32) {
    %c0_i32 = arith.constant 0 : i32
    %c0_i32_0 = arith.constant 0 : i32
    %c0_i32_1 = arith.constant 0 : i32
    return %c0_i32, %c0_i32_0 : i32, i32
  }
  func.func @transform_3(%arg0: i32) -> (i32, i32, i32, i32) {
    %c0_i32 = arith.constant 0 : i32
    %c0_i32_0 = arith.constant 0 : i32
    %c0_i32_1 = arith.constant 0 : i32
    %c0_i32_2 = arith.constant 0 : i32
    return %arg0, %c0_i32, %c0_i32_0, %c0_i32_1 : i32, i32, i32, i32
  }
}

module attributes {stable_mosaic.version = 11 : i64} {
  func.func @_fc_stack_kernel(%arg0: i32, %arg1: memref<2x2048xbf16, #tpu.memory_space<vmem>>, %arg2: memref<2048x512xbf16, #tpu.memory_space<vmem>>, %arg3: memref<1x512xf32, #tpu.memory_space<vmem>>, %arg4: memref<512x256xbf16, #tpu.memory_space<vmem>>, %arg5: memref<1x256xf32, #tpu.memory_space<vmem>>, %arg6: memref<256x128xbf16, #tpu.memory_space<vmem>>, %arg7: memref<1x128xf32, #tpu.memory_space<vmem>>, %arg8: memref<128x128xbf16, #tpu.memory_space<vmem>>, %arg9: memref<1x128xf32, #tpu.memory_space<vmem>>, %arg10: memref<2x128xf32, #tpu.memory_space<vmem>>) attributes {dimension_semantics = [#tpu.dimension_semantics<parallel>], iteration_bounds = array<i64: 1>, scalar_prefetch = 0 : i64, scratch_operands = 0 : i64, tpu.core_type = #tpu.core_type<tc>, window_params = [{transform_indices = @transform_0, window_bounds = array<i64: 2, 2048>}, {pipeline_mode = #tpu.pipeline_mode<synchronous>, transform_indices = @transform_1, window_bounds = array<i64: 2048, 512>}, {pipeline_mode = #tpu.pipeline_mode<synchronous>, transform_indices = @transform_2, window_bounds = array<i64: 1, 512>}, {pipeline_mode = #tpu.pipeline_mode<synchronous>, transform_indices = @transform_3, window_bounds = array<i64: 512, 256>}, {pipeline_mode = #tpu.pipeline_mode<synchronous>, transform_indices = @transform_4, window_bounds = array<i64: 1, 256>}, {pipeline_mode = #tpu.pipeline_mode<synchronous>, transform_indices = @transform_5, window_bounds = array<i64: 256, 128>}, {pipeline_mode = #tpu.pipeline_mode<synchronous>, transform_indices = @transform_6, window_bounds = array<i64: 1, 128>}, {pipeline_mode = #tpu.pipeline_mode<synchronous>, transform_indices = @transform_7, window_bounds = array<i64: 128, 128>}, {pipeline_mode = #tpu.pipeline_mode<synchronous>, transform_indices = @transform_8, window_bounds = array<i64: 1, 128>}, {transform_indices = @transform_9, window_bounds = array<i64: 2, 128>}]} {
    %c0 = arith.constant 0 : index
    %c0_0 = arith.constant 0 : index
    %0 = vector.load %arg1[%c0, %c0_0] : memref<2x2048xbf16, #tpu.memory_space<vmem>>, vector<2x2048xbf16>
    %c0_1 = arith.constant 0 : index
    %c0_2 = arith.constant 0 : index
    %1 = vector.load %arg2[%c0_1, %c0_2] : memref<2048x512xbf16, #tpu.memory_space<vmem>>, vector<2048x512xbf16>
    %cst = arith.constant dense<0.000000e+00> : vector<2x512xf32>
    %2 = tpu.matmul %0, %1, %cst {dimension_numbers = #tpu.dot_dimension_numbers<[1], [0], [0], [1], [0, 0, 1, 1], [], []>} : vector<2x2048xbf16>, vector<2048x512xbf16>, vector<2x512xf32> -> vector<2x512xf32>
    %c0_3 = arith.constant 0 : index
    %c0_4 = arith.constant 0 : index
    %3 = vector.load %arg3[%c0_3, %c0_4] : memref<1x512xf32, #tpu.memory_space<vmem>>, vector<1x512xf32>
    %4 = vector.broadcast %3 : vector<1x512xf32> to vector<2x512xf32>
    %5 = arith.addf %2, %4 : vector<2x512xf32>
    %cst_5 = arith.constant 0.000000e+00 : f32
    %6 = vector.broadcast %cst_5 : f32 to vector<2x512xf32>
    %7 = arith.maximumf %5, %6 : vector<2x512xf32>
    %8 = arith.truncf %7 : vector<2x512xf32> to vector<2x512xbf16>
    %c0_6 = arith.constant 0 : index
    %c0_7 = arith.constant 0 : index
    %9 = vector.load %arg4[%c0_6, %c0_7] : memref<512x256xbf16, #tpu.memory_space<vmem>>, vector<512x256xbf16>
    %cst_8 = arith.constant dense<0.000000e+00> : vector<2x256xf32>
    %10 = tpu.matmul %8, %9, %cst_8 {dimension_numbers = #tpu.dot_dimension_numbers<[1], [0], [0], [1], [0, 0, 1, 1], [], []>} : vector<2x512xbf16>, vector<512x256xbf16>, vector<2x256xf32> -> vector<2x256xf32>
    %c0_9 = arith.constant 0 : index
    %c0_10 = arith.constant 0 : index
    %11 = vector.load %arg5[%c0_9, %c0_10] : memref<1x256xf32, #tpu.memory_space<vmem>>, vector<1x256xf32>
    %12 = vector.broadcast %11 : vector<1x256xf32> to vector<2x256xf32>
    %13 = arith.addf %10, %12 : vector<2x256xf32>
    %cst_11 = arith.constant 0.000000e+00 : f32
    %14 = vector.broadcast %cst_11 : f32 to vector<2x256xf32>
    %15 = arith.maximumf %13, %14 : vector<2x256xf32>
    %16 = arith.truncf %15 : vector<2x256xf32> to vector<2x256xbf16>
    %c0_12 = arith.constant 0 : index
    %c0_13 = arith.constant 0 : index
    %17 = vector.load %arg6[%c0_12, %c0_13] : memref<256x128xbf16, #tpu.memory_space<vmem>>, vector<256x128xbf16>
    %cst_14 = arith.constant dense<0.000000e+00> : vector<2x128xf32>
    %18 = tpu.matmul %16, %17, %cst_14 {dimension_numbers = #tpu.dot_dimension_numbers<[1], [0], [0], [1], [0, 0, 1, 1], [], []>} : vector<2x256xbf16>, vector<256x128xbf16>, vector<2x128xf32> -> vector<2x128xf32>
    %c0_15 = arith.constant 0 : index
    %c0_16 = arith.constant 0 : index
    %19 = vector.load %arg7[%c0_15, %c0_16] : memref<1x128xf32, #tpu.memory_space<vmem>>, vector<1x128xf32>
    %20 = vector.broadcast %19 : vector<1x128xf32> to vector<2x128xf32>
    %21 = arith.addf %18, %20 : vector<2x128xf32>
    %cst_17 = arith.constant 0.000000e+00 : f32
    %22 = vector.broadcast %cst_17 : f32 to vector<2x128xf32>
    %23 = arith.maximumf %21, %22 : vector<2x128xf32>
    %24 = arith.truncf %23 : vector<2x128xf32> to vector<2x128xbf16>
    %c0_18 = arith.constant 0 : index
    %c0_19 = arith.constant 0 : index
    %25 = vector.load %arg8[%c0_18, %c0_19] : memref<128x128xbf16, #tpu.memory_space<vmem>>, vector<128x128xbf16>
    %cst_20 = arith.constant dense<0.000000e+00> : vector<2x128xf32>
    %26 = tpu.matmul %24, %25, %cst_20 {dimension_numbers = #tpu.dot_dimension_numbers<[1], [0], [0], [1], [0, 0, 1, 1], [], []>} : vector<2x128xbf16>, vector<128x128xbf16>, vector<2x128xf32> -> vector<2x128xf32>
    %c0_21 = arith.constant 0 : index
    %c0_22 = arith.constant 0 : index
    %27 = vector.load %arg9[%c0_21, %c0_22] : memref<1x128xf32, #tpu.memory_space<vmem>>, vector<1x128xf32>
    %28 = vector.broadcast %27 : vector<1x128xf32> to vector<2x128xf32>
    %29 = arith.addf %26, %28 : vector<2x128xf32>
    %c0_23 = arith.constant 0 : index
    %c0_24 = arith.constant 0 : index
    %30 = vector.load %arg10[%c0_23, %c0_24] : memref<2x128xf32, #tpu.memory_space<vmem>>, vector<2x128xf32>
    tpu.vector_store %arg10[%c0_23, %c0_24], %29 {strides = array<i32>} : memref<2x128xf32, #tpu.memory_space<vmem>>, vector<2x128xf32>,
    return
  }
  func.func @transform_0(%arg0: i32) -> (i32, i32) {
    %c0_i32 = arith.constant 0 : i32
    %c0_i32_0 = arith.constant 0 : i32
    return %arg0, %c0_i32 : i32, i32
  }
  func.func @transform_1(%arg0: i32) -> (i32, i32) {
    %c0_i32 = arith.constant 0 : i32
    %c0_i32_0 = arith.constant 0 : i32
    %c0_i32_1 = arith.constant 0 : i32
    return %c0_i32, %c0_i32_0 : i32, i32
  }
  func.func @transform_2(%arg0: i32) -> (i32, i32) {
    %c0_i32 = arith.constant 0 : i32
    %c0_i32_0 = arith.constant 0 : i32
    %c0_i32_1 = arith.constant 0 : i32
    return %c0_i32, %c0_i32_0 : i32, i32
  }
  func.func @transform_3(%arg0: i32) -> (i32, i32) {
    %c0_i32 = arith.constant 0 : i32
    %c0_i32_0 = arith.constant 0 : i32
    %c0_i32_1 = arith.constant 0 : i32
    return %c0_i32, %c0_i32_0 : i32, i32
  }
  func.func @transform_4(%arg0: i32) -> (i32, i32) {
    %c0_i32 = arith.constant 0 : i32
    %c0_i32_0 = arith.constant 0 : i32
    %c0_i32_1 = arith.constant 0 : i32
    return %c0_i32, %c0_i32_0 : i32, i32
  }
  func.func @transform_5(%arg0: i32) -> (i32, i32) {
    %c0_i32 = arith.constant 0 : i32
    %c0_i32_0 = arith.constant 0 : i32
    %c0_i32_1 = arith.constant 0 : i32
    return %c0_i32, %c0_i32_0 : i32, i32
  }
  func.func @transform_6(%arg0: i32) -> (i32, i32) {
    %c0_i32 = arith.constant 0 : i32
    %c0_i32_0 = arith.constant 0 : i32
    %c0_i32_1 = arith.constant 0 : i32
    return %c0_i32, %c0_i32_0 : i32, i32
  }
  func.func @transform_7(%arg0: i32) -> (i32, i32) {
    %c0_i32 = arith.constant 0 : i32
    %c0_i32_0 = arith.constant 0 : i32
    %c0_i32_1 = arith.constant 0 : i32
    return %c0_i32, %c0_i32_0 : i32, i32
  }
  func.func @transform_8(%arg0: i32) -> (i32, i32) {
    %c0_i32 = arith.constant 0 : i32
    %c0_i32_0 = arith.constant 0 : i32
    %c0_i32_1 = arith.constant 0 : i32
    return %c0_i32, %c0_i32_0 : i32, i32
  }
  func.func @transform_9(%arg0: i32) -> (i32, i32) {
    %c0_i32 = arith.constant 0 : i32
    %c0_i32_0 = arith.constant 0 : i32
    return %arg0, %c0_i32 : i32, i32
  }
}

</mosaic_0001>

<bundles_post_ra>
// kernel: deep_eigenspace_cnn_forward.3
= control target key start
LH: loop header
LB: loop body
LE: loop exit
PB: predicated region body
PF: predicated region fallthrough
CT: control target
= control target key end

     0   :  { %s3021_s12 = smov 0   ;;  %s3479_s0 = inlined_call_operand.vmem [shape: bf16[2,14,84,128], index: 0, kind: input, shape index: {}]   ;;  %s3480_s1 = inlined_call_operand.vmem [shape: bf16[9,128,128], index: 1, kind: input, shape index: {}]   ;;  %s3481_s2 = inlined_call_operand.vmem [shape: f32[1,128], index: 2, kind: input, shape index: {}]   ;;  %s3482_s3 = inlined_call_operand.vmem [shape: bf16[2,12,82,128], index: 3, kind: output, shape index: {}]  }
   0x1 LB: > { %s2098_s13 = sadd.s32 4294967295, %s2995_s12   ;;  %p2102_p0 = scmp.ge.s32.totalorder %s2995_s12, 1  ;;  %s2995_s12 = sphi %s3021_s12, %s13_s12  }
   0x2   : > { %p137_p1 = scmp.lt.s32.totalorder %s2995_s12, 3 }
   0x4   : > { %p138_p2 = pnand %p2102_p0, %p137_p1 }
   0x5   : > { %p161_p3 = scmp.lt.s32.totalorder (!%p138_p2), %s2098_s13, 1  ;;  %v3032_v0 = vld [vmem:[%s3481_s2] ss:$0 sm:$0xff] (!%p138_p2)  ;;  %s3044_s24 = smov (!%p138_p2), 0  }
   0x6   : > { %141 = sbr.rel (%p138_p2) target bundleno = 411 (0x19b), region = 32 }
   0xd   : > { %s3484_s13 = smov (!%p161_p3, %s2098_s13), 1 }
   0xe   : > { %s2871_s16 = smul.u32 616, %s3484_s13 }
   0xf   : > { %s2872_s17 = smul.u32 528, %s3484_s13 }
  0x10   : > { %s3037_s20 = scalar_lea.vmem %s3479_s0, %s2871_s16 }
  0x11   : > { %s3042_s23 = scalar_lea.vmem %s3482_s3, %s2872_s17 }
  0x12 LB: >> { %v2889_v1 = vld [vmem:[%s3480_s1 + $0x40] sm:$0xff]   ;;  %v2891_v3 = vld [vmem:[%s3480_s1 + $0x48] sm:$0xff]   ;;  %v2893_v5 = vld [vmem:[%s3480_s1 + $0x50] sm:$0xff]   ;;  %s2371_s15 = smul.u32 44, %s2999_s24  ;;  %vm255_vm0 = vsmask.f32 7424  ;;  %s2999_s24 = sphi %s3044_s24, %s178_s24  }
  0x13   : >> { %v2890_v2 = vld [vmem:[%s3480_s1 + $0x100] sm:$0xff]   ;;  %2539 = vmatprep.subr.bf16.mxu1 %v2889_v1  ;;  %v2892_v4 = vld [vmem:[%s3480_s1 + $0x108] sm:$0xff]   ;;  %v2894_v6 = vld [vmem:[%s3480_s1 + $0x110] sm:$0xff]   ;;  %vm595_vm1 = vcmask 1046528   ;;  %s178_s24 = sadd.s32 1, %s2999_s24  }
  0x14   : >> { %2651 = vmatprep.subr.bf16.mxu0 %v2890_v2  ;;  %2540 = vmatpush3.bf16.msra.mxu1 %v2889_v1  ;;  %v2895_v7 = vld [vmem:[%s3480_s1 + $0x58] sm:$0xff]   ;;  %v2897_v9 = vld [vmem:[%s3480_s1 + $0x60] sm:$0xff]   ;;  %s3083_s21 = scalar_lea.vmem %s3037_s20, %s2371_s15  ;;  %v2899_v11 = vld [vmem:[%s3480_s1 + $0x68] sm:$0xff]   ;;  %s2016_s17 = scalar_lea.vmem %s3042_s23, %s2371_s15 }
  0x15   : >> { %2652 = vmatpush3.bf16.msra.mxu0 %v2890_v2  ;;  %2541 = vmatprep.subr.bf16.mxu1 %v2891_v3  ;;  %v2896_v8 = vld [vmem:[%s3480_s1 + $0x118] sm:$0xff]   ;;  %v2898_v10 = vld [vmem:[%s3480_s1 + $0x120] sm:$0xff]   ;;  %v2900_v14 = vld [vmem:[%s3480_s1 + $0x128] sm:$0xff]   ;;  %p175_p4 = scmp.ge.s32.totalorder %s178_s24, 12  }
  0x16   : >> { %2653 = vmatprep.subr.bf16.mxu0 %v2892_v4  ;;  %v182_v12 = vld [vmem:[%s3083_s21] sm:$0xf]  ;;  %v3090_v13 = vld [vmem:[%s3083_s21 + $0x4] sm:$0xf]  ;;  %v3099_v16 = vld [vmem:[%s3083_s21 + $0x8] sm:$0xff]  }
  0x17   : >> { %v3096_v15 = vcombine.low %v182_v12, %v3090_v13  ;;  %v2901_v17 = vld [vmem:[%s3480_s1 + $0x70] sm:$0xff]   ;;  %v2170_v18 = vld [vmem:[%s3083_s21 + $0x2c] sm:$0xf]  ;;  %v264_v21 = vshll.u32 %v3099_v16, 16  ;;  %v2903_v29 = vld [vmem:[%s3480_s1 + $0x78] sm:$0xff]   ;;  %v268_v35 = vshrl.u32 %v3099_v16, 16 }
  0x18   : >> { %2542 = vmatpush3.bf16.msra.mxu1 %v2891_v3  ;;  %v3109_v22 = vld [vmem:[%s3083_s21 + $0x30] sm:$0xf]  ;;  %v3112_v23 = vld [vmem:[%s3083_s21 + $0x34] sm:$0xff]   ;;  %v3131_v36 = vld [vmem:[%s3083_s21 + $0x3c] sm:$0xff]  }
  0x19   : >> { %2654 = vmatpush3.bf16.msra.mxu0 %v2892_v4  ;;  %2543 = vmatprep.subr.bf16.mxu1 %v2893_v5  ;;  %v257_v19 = vshrl.u32 %v3096_v15, 16  ;;  %v259_v20 = vshll.u32 %v3096_v15, 16  ;;  %v3115_v24 = vcombine.low %v2170_v18, %v3109_v22  ;;  %v2902_v25 = vld [vmem:[%s3480_s1 + $0x130] sm:$0xff]   ;;  %v266_v27 = vrot.slane %v264_v21, 1  ;;  %v2904_v39 = vld [vmem:[%s3480_s1 + $0x138] sm:$0xff]   ;;  %v2907_v44 = vld [vmem:[%s3480_s1] sm:$0xff]  }
  0x1a   : >> { %2655 = vmatprep.subr.bf16.mxu0 %v2894_v6  ;;  %v986_v28 = vshll.u32 %v3112_v23, 16  ;;  %v3127_v34 = vld [vmem:[%s3083_s21 + $0x10] sm:$0xff]   ;;  %v990_v38 = vshrl.u32 %v3112_v23, 16  ;;  %v994_v42 = vshll.u32 %v3131_v36, 16  ;;  %v2910_v50 = vld [vmem:[%s3480_s1 + $0x140] sm:$0xff]   ;;  %v2913_v52 = vld [vmem:[%s3480_s1 + $0x8] sm:$0xff]  }
  0x1b   : >> { %v261_v26 = vrot.slane %v259_v20, 1  ;;  %v979_v30 = vshrl.u32 %v3115_v24, 16  ;;  %v981_v31 = vshll.u32 %v3115_v24, 16  ;;  %v272_v41 = vshll.u32 %v3127_v34, 16  ;;  %v3153_v54 = vld [vmem:[%s3083_s21 + $0x18] sm:$0xff]   ;;  %v3158_v57 = vld [vmem:[%s3083_s21 + $0x20] sm:$0xff]  }
  0x1c   : >> { %2544 = vmatpush3.bf16.msra.mxu1 %v2893_v5  ;;  %v988_v33 = vrot.slane %v986_v28, 1  ;;  %v270_v45 = vor.u32 %v268_v35, %v266_v27  ;;  %v996_v47 = vrot.slane %v994_v42, 1  ;;  %v276_v51 = vshrl.u32 %v3127_v34, 16  ;;  %v2914_v58 = vld [vmem:[%s3480_s1 + $0x148] sm:$0xff]   ;;  %v2915_v63 = vld [vmem:[%s3480_s1 + $0x10] sm:$0xff]  }
  0x1d   : >> { %2656 = vmatpush3.bf16.msra.mxu0 %v2894_v6  ;;  %2545 = vmatprep.subr.bf16.mxu1 %v2895_v7  ;;  %v262_v32 = vor.u32 %v261_v26, %v257_v19  ;;  %v983_v37 = vrot.slane %v981_v31, 1  ;;  %v274_v46 = vrot.slane %v272_v41, 1  ;;  %v998_v55 = vshrl.u32 %v3131_v36, 16  ;;  %v3166_v62 = vld [vmem:[%s3083_s21 + $0x44] sm:$0xff]   ;;  %v2916_v2 = vld [vmem:[%s3480_s1 + $0x150] sm:$0xff]   ;;  %v2918_v26 = vld [vmem:[%s3480_s1 + $0x158] sm:$0xff]  }
  0x1e   : >> { %2657 = vmatprep.subr.bf16.mxu0 %v2896_v8  ;;  %v992_v49 = vor.u32 %v990_v38, %v988_v33  ;;  %v280_v60 = vshll.u32 %v3153_v54, 16  ;;  %v284_v61 = vshrl.u32 %v3153_v54, 16  ;;  %v288_v1 = vshll.u32 %v3158_v57, 16  ;;  %v3188_v20 = vld [vmem:[%s3083_s21 + $0x28] ss:$0 sps:$4 sm:$0x33]  }
  0x1f   : >> { %v267_v40 = vsel %vm255_vm0, %v262_v32, %v266_v27  ;;  %v984_v43 = vor.u32 %v983_v37, %v979_v30  ;;  %v275_v53 = vsel %vm255_vm0, %v270_v45, %v274_v46  ;;  %v278_v59 = vor.u32 %v276_v51, %v274_v46  ;;  %v3199_v32 = vld [vmem:[%s3083_s21 + $0x54] ss:$0 sps:$4 sm:$0x33]  }
  0x20   : >> { %2546 = vmatpush3.bf16.msra.mxu1 %v2895_v7  ;;  %2555 = vmatprep.mubr.bf16.mxu1 %v267_v40  ;;  %v997_v56 = vsel %vm255_vm0, %v992_v49, %v996_v47  ;;  %v282_v3 = vrot.slane %v280_v60, 1  ;;  %v1000_v4 = vor.u32 %v998_v55, %v996_v47  ;;  %v1002_v5 = vshll.u32 %v3166_v62, 16  ;;  %v3177_v7 = vld [vmem:[%s3083_s21 + $0x4c] sm:$0xff]   ;;  %v2923_v40 = vld [vmem:[%s3480_s1 + $0x160] sm:$0xff]  }
  0x21   : >> { %2658 = vmatpush3.bf16.msra.mxu0 %v2896_v8  ;;  %2547 = vmatprep.subr.bf16.mxu1 %v2897_v9  ;;  %v989_v48 = vsel %vm255_vm0, %v984_v43, %v988_v33  ;;  %v290_v6 = vrot.slane %v288_v1, 1  ;;  %v1010_v12 = vshll.u32 %v3177_v7, 16  ;;  %v296_v27 = vshll.u32 %v3188_v20, 16  ;;  %v2921_v33 = vld [vmem:[%s3480_s1 + $0x20] sm:$0xff]   ;;  %v2925_v47 = vld [vmem:[%s3480_s1 + $0x28] sm:$0xff]  }
  0x22   : >> { %2659 = vmatprep.subr.bf16.mxu0 %v2898_v10  ;;  %2667 = vmatprep.mubr.bf16.mxu0 %v989_v48  ;;  %v283_v8 = vsel %vm255_vm0, %v278_v59, %v282_v3  ;;  %v1014_v28 = vshrl.u32 %v3177_v7, 16  ;;  %v300_v31 = vshrl.u32 %v3188_v20, 16  ;;  %v1018_v38 = vshll.u32 %v3199_v32, 16 }
  0x23   : >> { %v1012_v21 = vrot.slane %v1010_v12, 1  ;;  %v298_v35 = vrot.slane %v296_v27, 1  ;;  %v1192_v46 = vrot.slane %v3112_v23, 1  ;;  %v601_v55 = vrot.slane %v3153_v54, 1  ;;  %v2939_v12 = vld [vmem:[%s3480_s1 + $0x190] sm:$0xff]  }
  0x24   : >> { %2548 = vmatpush3.bf16.msra.mxu1 %v2897_v9  ;;  %v286_v9 = vor.u32 %v284_v61, %v282_v3  ;;  %v1020_v43 = vrot.slane %v1018_v38, 1  ;;  %v2931_v61 = vld [vmem:[%s3480_s1 + $0x38] sm:$0xff]   ;;  %v1194_v3 = vrot.slane %v3131_v36, 1  ;;  %v2948_v38 = vld [vmem:[%s3480_s1 + $0x1b0] sm:$0xff]  }
  0x25   : >> { %2660 = vmatpush3.bf16.msra.mxu0 %v2898_v10  ;;  %2549 = vmatprep.subr.bf16.mxu1 %v2899_v11  ;;  %v1004_v10 = vrot.slane %v1002_v5, 1  ;;  %v1016_v37 = vor.u32 %v1014_v28, %v1012_v21  ;;  %v302_v42 = vor.u32 %v300_v31, %v298_v35  ;;  %v1196_v5 = vrot.slane %v3166_v62, 1  ;;  %v3299_v31 = vld [vmem:[%s3083_s21 + $0x5c] sm:$0xf] }
  0x26   : >> { %2661 = vmatprep.subr.bf16.mxu0 %v2900_v14  ;;  %v597_v28 = vrot.slane %v3099_v16, 1 }
  0x27   : >> { %v1005_v18 = vsel %vm255_vm0, %v1000_v4, %v1004_v10  ;;  %v1021_v48 = vsel %vm255_vm0, %v1016_v37, %v1020_v43  ;;  %v2935_v4 = vld [vmem:[%s3480_s1 + $0x180] sm:$0xff]   ;;  %v2947_v37 = vld [vmem:[%s3480_s1 + $0xb0] sm:$0xff]  }
  0x28   : >> { %2550 = vmatpush3.bf16.msra.mxu1 %v2899_v11  ;;  %v1006_v11 = vshrl.u32 %v3166_v62, 16 }
  0x29   : >> { %2662 = vmatpush3.bf16.msra.mxu0 %v2900_v14  ;;  %2551 = vmatprep.subr.bf16.mxu1 %v2901_v17  ;;  %v2917_v14 = vld [vmem:[%s3480_s1 + $0x18] sm:$0xff]  }
  0x2a   : >> { %2663 = vmatprep.subr.bf16.mxu0 %v2902_v25  ;;  %v1008_v19 = vor.u32 %v1006_v11, %v1004_v10  ;;  %v2938_v10 = vld [vmem:[%s3480_s1 + $0x90] sm:$0xff]   ;;  %v1197_v11 = vsel %vm595_vm1, %v1194_v3, %v1196_v5 }
  0x2c   : >> { %2552 = vmatpush3.bf16.msra.mxu1 %v2901_v17  ;;  %v291_v17 = vsel %vm255_vm0, %v286_v9, %v290_v6  ;;  %v2937_v9 = vld [vmem:[%s3480_s1 + $0x188] sm:$0xff]  }
  0x2d   : >> { %2664 = vmatpush3.bf16.msra.mxu0 %v2902_v25  ;;  %2553 = vmatprep.subr.bf16.mxu1 %v2903_v29  ;;  %v292_v25 = vshrl.u32 %v3158_v57, 16 }
  0x2e   : >> { %2665 = vmatprep.subr.bf16.mxu0 %v2904_v39 }
  0x2f   : >> { %v294_v30 = vor.u32 %v292_v25, %v290_v6  ;;  %v1195_v6 = vsel %vm595_vm1, %v1192_v46, %v1194_v3  ;;  %v2941_v25 = vld [vmem:[%s3480_s1 + $0x198] sm:$0xff]  }
  0x30   : >> { %2554 = vmatpush3.bf16.msra.mxu1 %v2903_v29  ;;  %v1013_v29 = vsel %vm255_vm0, %v1008_v19, %v1012_v21  ;;  %v2940_v19 = vld [vmem:[%s3480_s1 + $0x98] sm:$0xff]  }
  0x31   : >> { %2666 = vmatpush3.bf16.msra.mxu0 %v2904_v39  ;;  %2567 = vmatprep.subr.bf16.mxu1 %v2907_v44  ;;  %v1022_v39 = vshrl.u32 %v3199_v32, 16  ;;  %v299_v41 = vsel %vm255_vm0, %v294_v30, %v298_v35 }
  0x32   : >> { %2679 = vmatprep.subr.bf16.mxu0 %v2910_v50 }
  0x33   : >> { %2556 = vmatmul.mubr.bf16.vlgmr.msra.gmra.mrb[0].mxu1 %v275_v53  ;;  %v1024_v49 = vor.u32 %v1022_v39, %v1020_v43  ;;  %v599_v53 = vrot.slane %v3127_v34, 1  ;;  %v2949_v39 = vld [vmem:[%s3480_s1 + $0xb8] sm:$0xff]  }
  0x34   : >> { %2568 = vmatpush3.bf16.msra.mxu1 %v2907_v44  ;;  %2668 = vmatmul.mubr.bf16.vlgmr.msra.gmra.mrb[0].mxu0 %v997_v56  ;;  %v2237_v44 = vld [vmem:[%s3083_s21 + $0x2c] sm:$0xe]  ;;  %v2930_v56 = vld [vmem:[%s3480_s1 + $0x170] sm:$0xff]  }
  0x35   : >> { %2680 = vmatpush3.bf16.msra.mxu0 %v2910_v50  ;;  %2569 = vmatprep.subr.bf16.mxu1 %v2913_v52  ;;  %v2254_v45 = vcombine.low %v2237_v44, %v3109_v22  ;;  %v2926_v50 = vld [vmem:[%s3480_s1 + $0x168] sm:$0xff]   ;;  %v2928_v22 = vld [vmem:[%s3480_s1 + $0x30] sm:$0xff]   ;;  %v3234_v59 = vsel %vm595_vm1, %v599_v53, %v601_v55  ;;  %v600_v43 = vsel %vm595_vm1, %v597_v28, %v599_v53  ;;  %v3334_v44 = vld [vmem:[%s3083_s21 + $0x60] sm:$0xff]  }
  0x36   : >> { %2681 = vmatprep.subr.bf16.mxu0 %v2914_v58  ;;  %2559 = vmatprep.mubr.bf16.mxu1 %v283_v8  ;;  %v2936_v8 = vld [vmem:[%s3480_s1 + $0x88] sm:$0xff]  }
  0x37   : >> { %2671 = vmatprep.mubr.bf16.mxu0 %v1005_v18  ;;  %v1191_v51 = vrot.slane %v2254_v45, 1  ;;  %v1200_v18 = vrot.slane %v3199_v32, 1  ;;  %v2957_v45 = vld [vmem:[%s3480_s1 + $0xc8] sm:$0xff]  }
  0x38   : >> { %2570 = vmatpush3.bf16.msra.mxu1 %v2913_v52 }
  0x39   : >> { %2682 = vmatpush3.bf16.msra.mxu0 %v2914_v58  ;;  %2571 = vmatprep.subr.bf16.mxu1 %v2915_v63  ;;  %v1193_v52 = vsel %vm595_vm1, %v1191_v51, %v1192_v46  ;;  %v603_v58 = vrot.slane %v3158_v57, 1  ;;  %v2958_v46 = vld [vmem:[%s3480_s1 + $0x1c8] sm:$0xff]   ;;  %v2962_v51 = vld [vmem:[%s3480_s1 + $0x1d8] sm:$0xff]  }
  0x3a   : >> { %2683 = vmatprep.subr.bf16.mxu0 %v2916_v2 }
  0x3b   : >> { %2560 = vmatmul.mubr.bf16.gmra.mrb[4].mxu1 %v291_v17  ;;  %v3237_v60 = vsel %vm595_vm1, %v601_v55, %v603_v58  ;;  %v1198_v17 = vrot.slane %v3177_v7, 1 }
  0x3c   : >> { %2572 = vmatpush3.bf16.msra.mxu1 %v2915_v63  ;;  %2672 = vmatmul.mubr.bf16.gmra.mrb[4].mxu0 %v1013_v29  ;;  %v2932_v63 = vld [vmem:[%s3480_s1 + $0x178] sm:$0xff]   ;;  %v2943_v29 = vld [vmem:[%s3480_s1 + $0xa0] sm:$0xff]  }
  0x3d   : >> { %2684 = vmatpush3.bf16.msra.mxu0 %v2916_v2  ;;  %2573 = vmatprep.subr.bf16.mxu1 %v2917_v14  ;;  %v2933_v2 = vld [vmem:[%s3480_s1 + $0x80] sm:$0xff]   ;;  %v1201_v27 = vsel %vm595_vm1, %v1198_v17, %v1200_v18 }
  0x3e   : >> { %2685 = vmatprep.subr.bf16.mxu0 %v2918_v26  ;;  %2563 = vmatprep.mubr.bf16.mxu1 %v299_v41  ;;  %v2952_v41 = vld [vmem:[%s3480_s1 + $0xc0] sm:$0xff]  }
  0x3f   : >> { %2675 = vmatprep.mubr.bf16.mxu0 %v1021_v48  ;;  %v2960_v48 = vld [vmem:[%s3480_s1 + $0x1d0] sm:$0xff]  }
  0x40   : >> { %2574 = vmatpush3.bf16.msra.mxu1 %v2917_v14  ;;  %v574_v14 = vld [vmem:[%s3083_s21] sm:$0xe] }
  0x41   : >> { %2686 = vmatpush3.bf16.msra.mxu0 %v2918_v26  ;;  %2575 = vmatprep.subr.bf16.mxu1 %v2921_v33  ;;  %v2161_v21 = vcombine.low %v574_v14, %v3090_v13  ;;  %v1199_v26 = vsel %vm595_vm1, %v1196_v5, %v1198_v17  ;;  %v2942_v13 = vld [vmem:[%s3083_s21 + $0x28] ss:$0 sps:$4 sm:$0x11]   ;;  %v2972_v5 = vld [vmem:[%s3480_s1 + $0x1f0] sm:$0xff]  }
  0x42   : >> { %2687 = vmatprep.subr.bf16.mxu0 %v2923_v40 }
  0x43   : >> { %2564 = vmatmul.mubr.bf16.gmra.mrb[8].mxu1 %v302_v42  ;;  %v596_v30 = vrot.slane %v2161_v21, 1  ;;  %v2955_v42 = vld [vmem:[%s3480_s1 + $0x1c0] sm:$0xff]   ;;  %v2976_v21 = vld [vmem:[%s3480_s1 + $0x208] sm:$0xff]  }
  0x44   : >> { %2576 = vmatpush3.bf16.msra.mxu1 %v2921_v33  ;;  %2676 = vmatmul.mubr.bf16.gmra.mrb[8].mxu0 %v1024_v49  ;;  %v2946_v33 = vld [vmem:[%s3480_s1 + $0x1a8] sm:$0xff]  }
  0x45   : >> { %2688 = vmatpush3.bf16.msra.mxu0 %v2923_v40  ;;  %2577 = vmatprep.subr.bf16.mxu1 %v2925_v47  ;;  %v598_v32 = vsel %vm595_vm1, %v596_v30, %v597_v28  ;;  %v2950_v40 = vld [vmem:[%s3480_s1 + $0x1b8] sm:$0xff]  }
  0x46   : >> { %2689 = vmatprep.subr.bf16.mxu0 %v2926_v50  ;;  %2583 = vmatprep.mubr.bf16.mxu1 %v3096_v15  ;;  %v605_v15 = vrot.slane %v3188_v20, 1  ;;  %v1585_v20 = vshrl.u32 %v3334_v44, 16 }
  0x47   : >> { %2695 = vmatprep.mubr.bf16.mxu0 %v1193_v52  ;;  %v3366_v52 = vld [vmem:[%s3083_s21 + $0x78] sm:$0xff]  }
  0x48   : >> { %2578 = vmatpush3.bf16.msra.mxu1 %v2925_v47  ;;  %v3249_v1 = vsel %vm595_vm1, %v603_v58, %v605_v15  ;;  %v3343_v47 = vld [vmem:[%s3083_s21 + $0x68] sm:$0xff]   ;;  %v2964_v58 = vld [vmem:[%s3480_s1 + $0xe0] sm:$0xff]   ;;  %v1609_v28 = vshrl.u32 %v3366_v52, 16 }
  0x49   : >> { %2690 = vmatpush3.bf16.msra.mxu0 %v2926_v50  ;;  %2579 = vmatprep.subr.bf16.mxu1 %v2928_v22  ;;  %v2961_v50 = vld [vmem:[%s3480_s1 + $0xd8] sm:$0xff]  }
  0x4a   : >> { %2691 = vmatprep.subr.bf16.mxu0 %v2930_v56 }
  0x4c   : >> { %2580 = vmatpush3.bf16.msra.mxu1 %v2928_v22  ;;  %v3362_v22 = vld [vmem:[%s3083_s21 + $0x70] sm:$0xff]  }
  0x4d   : >> { %2692 = vmatpush3.bf16.msra.mxu0 %v2930_v56  ;;  %2581 = vmatprep.subr.bf16.mxu1 %v2931_v61  ;;  %v1581_v56 = vshll.u32 %v3334_v44, 16 }
  0x4e   : >> { %2693 = vmatprep.subr.bf16.mxu0 %v2932_v63 }
  0x50   : >> { %2582 = vmatpush3.bf16.msra.mxu1 %v2931_v61  ;;  %v1583_v61 = vrot.slane %v1581_v56, 1 }
  0x51   : >> { %2694 = vmatpush3.bf16.msra.mxu0 %v2932_v63  ;;  %2595 = vmatprep.subr.bf16.mxu1 %v2933_v2  ;;  %v2967_v63 = vld [vmem:[%s3480_s1 + $0xe8] sm:$0xff]  }
  0x52   : >> { %2707 = vmatprep.subr.bf16.mxu0 %v2935_v4 }
  0x53   : >> { %2584 = vmatmul.mubr.bf16.vlgmr.msra.gmra.mrb[0].mxu1 %v3099_v16  ;;  %v2945_v16 = vld [vmem:[%s3480_s1 + $0xa8] sm:$0xff]  }
  0x54   : >> { %2596 = vmatpush3.bf16.msra.mxu1 %v2933_v2  ;;  %2696 = vmatmul.mubr.bf16.vlgmr.msra.gmra.mrb[0].mxu0 %v1195_v6  ;;  %v2971_v2 = vld [vmem:[%s3083_s21 + $0x80] ss:$0 sps:$4 sm:$0x11]   ;;  %v2974_v6 = vld [vmem:[%s3480_s1 + $0x1f8] sm:$0xff]  }
  0x55   : >> { %2708 = vmatpush3.bf16.msra.mxu0 %v2935_v4  ;;  %2597 = vmatprep.subr.bf16.mxu1 %v2936_v8  ;;  %v2970_v4 = vld [vmem:[%s3480_s1 + $0xf0] sm:$0xff]  }
  0x56   : >> { %2709 = vmatprep.subr.bf16.mxu0 %v2937_v9  ;;  %2587 = vmatprep.mubr.bf16.mxu1 %v3127_v34  ;;  %v2959_v34 = vld [vmem:[%s3480_s1 + $0xd0] sm:$0xff]  }
  0x57   : >> { %2699 = vmatprep.mubr.bf16.mxu0 %v1197_v11 }
  0x58   : >> { %2598 = vmatpush3.bf16.msra.mxu1 %v2936_v8  ;;  %v1593_v8 = vshrl.u32 %v3343_v47, 16 }
  0x59   : >> { %2710 = vmatpush3.bf16.msra.mxu0 %v2937_v9  ;;  %2599 = vmatprep.subr.bf16.mxu1 %v2938_v10  ;;  %v1597_v9 = vshll.u32 %v3362_v22, 16 }
  0x5a   : >> { %2711 = vmatprep.subr.bf16.mxu0 %v2939_v12 }
  0x5b   : >> { %2588 = vmatmul.mubr.bf16.gmra.mrb[4].mxu1 %v3153_v54  ;;  %v2944_v54 = vld [vmem:[%s3480_s1 + $0x1a0] sm:$0xff]   ;;  %v1599_v17 = vrot.slane %v1597_v9, 1 }
  0x5c   : >> { %2600 = vmatpush3.bf16.msra.mxu1 %v2938_v10  ;;  %2591 = vmatprep.mubr.bf16.mxu1 %v3158_v57  ;;  %v2263_v57 = vld [vmem:[%s3083_s21 + $0x58] sm:$0xf]  ;;  %v1587_v10 = vor.u32 %v1585_v20, %v1583_v61 }
  0x5d   : >> { %2712 = vmatpush3.bf16.msra.mxu0 %v2939_v12  ;;  %2601 = vmatprep.subr.bf16.mxu1 %v2940_v19  ;;  %v3309_v35 = vcombine.low %v2263_v57, %v3299_v31  ;;  %v2975_v12 = vld [vmem:[%s3480_s1 + $0x200] sm:$0xff]  }
  0x5e   : >> { %2713 = vmatprep.subr.bf16.mxu0 %v2941_v25  ;;  %2700 = vmatmul.mubr.bf16.gmra.mrb[4].mxu0 %v1199_v26  ;;  %v1605_v26 = vshll.u32 %v3366_v52, 16 }
  0x5f   : >> { %2703 = vmatprep.mubr.bf16.mxu0 %v1201_v27  ;;  %v1576_v49 = vshll.u32 %v3309_v35, 16  ;;  %v1574_v53 = vshrl.u32 %v3309_v35, 16 }
  0x60   : >> { %2602 = vmatpush3.bf16.msra.mxu1 %v2940_v19  ;;  %v1607_v30 = vrot.slane %v1605_v26, 1 }
  0x61   : >> { %2714 = vmatpush3.bf16.msra.mxu0 %v2941_v25  ;;  %2603 = vmatprep.subr.bf16.mxu1 %v2943_v29  ;;  %v1578_v55 = vrot.slane %v1576_v49, 1  ;;  %v1601_v25 = vshrl.u32 %v3362_v22, 16 }
  0x62   : >> { %2715 = vmatprep.subr.bf16.mxu0 %v2944_v54  ;;  %v1611_v57 = vor.u32 %v1609_v28, %v1607_v30 }
  0x63   : >> { %2592 = vmatmul.mubr.bf16.gmra.mrb[12].mxu1 %v2942_v13 }
  0x64   : >> { %2604 = vmatpush3.bf16.msra.mxu1 %v2943_v29  ;;  %2611 = vmatprep.mubr.bf16.mxu1 %v598_v32  ;;  %v1603_v29 = vor.u32 %v1601_v25, %v1599_v17 }
  0x65   : >> { %2716 = vmatpush3.bf16.msra.mxu0 %v2944_v54  ;;  %2605 = vmatprep.subr.bf16.mxu1 %v2945_v16  ;;  %v2977_v54 = vld [vmem:[%s3480_s1 + $0x210] sm:$0xff]  }
  0x66   : >> { %2717 = vmatprep.subr.bf16.mxu0 %v2946_v33  ;;  %2704 = vmatmul.mubr.bf16.gmra.mrb[12].mxu0 %v1200_v18  ;;  %v3410_v18 = vld [vmem:[%s3083_s21 + $0x80] ss:$0 sps:$4 sm:$0x33]   ;;  %v1608_v32 = vsel %vm255_vm0, %v1603_v29, %v1607_v30 }
  0x67   : >> { %2723 = vmatprep.mubr.bf16.mxu0 %v3309_v35  ;;  %v1613_v13 = vshll.u32 %v3410_v18, 16 }
  0x68   : >> { %2606 = vmatpush3.bf16.msra.mxu1 %v2945_v16 }
  0x69   : >> { %2718 = vmatpush3.bf16.msra.mxu0 %v2946_v33  ;;  %2607 = vmatprep.subr.bf16.mxu1 %v2947_v37  ;;  %v1615_v16 = vrot.slane %v1613_v13, 1  ;;  %v2978_v33 = vld [vmem:[%s3480_s1 + $0x218] sm:$0xff]  }
  0x6a   : >> { %2719 = vmatprep.subr.bf16.mxu0 %v2948_v38 }
  0x6c   : >> { %2608 = vmatpush3.bf16.msra.mxu1 %v2947_v37  ;;  %v1617_v37 = vshrl.u32 %v3410_v18, 16 }
  0x6d   : >> { %2720 = vmatpush3.bf16.msra.mxu0 %v2948_v38  ;;  %2609 = vmatprep.subr.bf16.mxu1 %v2949_v39  ;;  %v2980_v38 = vld [vmem:[%s3480_s1 + $0x220] sm:$0xff]  }
  0x6e   : >> { %2721 = vmatprep.subr.bf16.mxu0 %v2950_v40 }
  0x70   : >> { %2610 = vmatpush3.bf16.msra.mxu1 %v2949_v39  ;;  %v2979_v39 = vld [vmem:[%s3083_s21 + $0x54] ss:$0 sps:$4 sm:$0x11]  }
  0x71   : >> { %2722 = vmatpush3.bf16.msra.mxu0 %v2950_v40  ;;  %2623 = vmatprep.subr.bf16.mxu1 %v2952_v41  ;;  %v1619_v40 = vor.u32 %v1617_v37, %v1615_v16 }
  0x72   : >> { %2735 = vmatprep.subr.bf16.mxu0 %v2955_v42 }
  0x73   : >> { %2612 = vmatmul.mubr.bf16.vlgmr.msra.gmra.mrb[0].mxu1 %v600_v43  ;;  %v2981_v43 = vld [vmem:[%s3480_s1 + $0x228] sm:$0xff]  }
  0x74   : >> { %2624 = vmatpush3.bf16.msra.mxu1 %v2952_v41  ;;  %2724 = vmatmul.mubr.bf16.vlgmr.msra.gmra.mrb[0].mxu0 %v3334_v44  ;;  %v1789_v41 = vrot.slane %v3343_v47, 1 }
  0x75   : >> { %2736 = vmatpush3.bf16.msra.mxu0 %v2955_v42  ;;  %2625 = vmatprep.subr.bf16.mxu1 %v2957_v45  ;;  %v1791_v42 = vrot.slane %v3362_v22, 1 }
  0x76   : >> { %2737 = vmatprep.subr.bf16.mxu0 %v2958_v46  ;;  %2615 = vmatprep.mubr.bf16.mxu1 %v3234_v59  ;;  %v2966_v59 = vld [vmem:[%s3480_s1 + $0x1e0] sm:$0xff]  }
  0x77   : >> { %2727 = vmatprep.mubr.bf16.mxu0 %v3343_v47 }
  0x78   : >> { %2626 = vmatpush3.bf16.msra.mxu1 %v2957_v45  ;;  %v2983_v45 = vld [vmem:[%s3480_s1 + $0x230] sm:$0xff]  }
  0x79   : >> { %2738 = vmatpush3.bf16.msra.mxu0 %v2958_v46  ;;  %2627 = vmatprep.subr.bf16.mxu1 %v2959_v34  ;;  %v2984_v46 = vld [vmem:[%s3480_s1 + $0x238] sm:$0xff]  }
  0x7a   : >> { %2739 = vmatprep.subr.bf16.mxu0 %v2960_v48 }
  0x7b   : >> { %2616 = vmatmul.mubr.bf16.gmra.mrb[4].mxu1 %v3237_v60  ;;  %v1579_v60 = vor.u32 %v1578_v55, %v1574_v53 }
  0x7c   : >> { %2628 = vmatpush3.bf16.msra.mxu1 %v2959_v34  ;;  %2619 = vmatprep.mubr.bf16.mxu1 %v3249_v1  ;;  %v2968_v1 = vld [vmem:[%s3480_s1 + $0x1e8] sm:$0xff]   ;;  %v1795_v34 = vrot.slane %v3410_v18, 1 }
  0x7d   : >> { %2740 = vmatpush3.bf16.msra.mxu0 %v2960_v48  ;;  %2629 = vmatprep.subr.bf16.mxu1 %v2961_v50  ;;  %v1584_v3 = vsel %vm255_vm0, %v1579_v60, %v1583_v61 }
  0x7e   : >> { %2741 = vmatprep.subr.bf16.mxu0 %v2962_v51  ;;  %2728 = vmatmul.mubr.bf16.gmra.mrb[4].mxu0 %v3362_v22 }
  0x7f   : >> { %2731 = vmatprep.mubr.bf16.mxu0 %v3366_v52 }
  0x80   : >> { %2630 = vmatpush3.bf16.msra.mxu1 %v2961_v50 }
  0x81   : >> { %2742 = vmatpush3.bf16.msra.mxu0 %v2962_v51  ;;  %2631 = vmatprep.subr.bf16.mxu1 %v2964_v58 }
  0x82   : >> { %2743 = vmatprep.subr.bf16.mxu0 %v2966_v59 }
  0x83   : >> { %2620 = vmatmul.mubr.bf16.gmra.mrb[16].mxu1 %v605_v15  ;;  %v1589_v15 = vshll.u32 %v3343_v47, 16  ;;  %v1793_v47 = vrot.slane %v3366_v52, 1 }
  0x84   : >> { %2632 = vmatpush3.bf16.msra.mxu1 %v2964_v58  ;;  %2639 = vmatprep.mubr.bf16.mxu1 %v3115_v24  ;;  %v2973_v24 = vld [vmem:[%s3480_s1 + $0xf8] sm:$0xff]  }
  0x85   : >> { %2744 = vmatpush3.bf16.msra.mxu0 %v2966_v59  ;;  %2633 = vmatprep.subr.bf16.mxu1 %v2967_v63  ;;  %v1591_v11 = vrot.slane %v1589_v15, 1  ;;  %v1794_v48 = vsel %vm595_vm1, %v1791_v42, %v1793_v47  ;;  %v1796_v50 = vsel %vm595_vm1, %v1793_v47, %v1795_v34 }
  0x86   : >> { %2745 = vmatprep.subr.bf16.mxu0 %v2968_v1  ;;  %2732 = vmatmul.mubr.bf16.gmra.mrb[16].mxu0 %v2971_v2 }
  0x87   : >> { %2751 = vmatprep.mubr.bf16.mxu0 %v1584_v3  ;;  %v1595_v14 = vor.u32 %v1593_v8, %v1591_v11  ;;  %v1592_v19 = vsel %vm255_vm0, %v1587_v10, %v1591_v11 }
  0x88   : >> { %2634 = vmatpush3.bf16.msra.mxu1 %v2967_v63 }
  0x89   : >> { %2746 = vmatpush3.bf16.msra.mxu0 %v2968_v1  ;;  %2635 = vmatprep.subr.bf16.mxu1 %v2970_v4  ;;  %v1600_v27 = vsel %vm255_vm0, %v1595_v14, %v1599_v17 }
  0x8a   : >> { %2747 = vmatprep.subr.bf16.mxu0 %v2972_v5 }
  0x8c   : >> { %2636 = vmatpush3.bf16.msra.mxu1 %v2970_v4 }
  0x8d   : >> { %2748 = vmatpush3.bf16.msra.mxu0 %v2972_v5  ;;  %2637 = vmatprep.subr.bf16.mxu1 %v2973_v24 }
  0x8e   : >> { %2749 = vmatprep.subr.bf16.mxu0 %v2974_v6 }
  0x90   : >> { %2638 = vmatpush3.bf16.msra.mxu1 %v2973_v24 }
  0x91   : >> { %2750 = vmatpush3.bf16.msra.mxu0 %v2974_v6  ;;  %2791 = vmatprep.subr.bf16.mxu1 %v2975_v12 }
  0x92   : >> { %2763 = vmatprep.subr.bf16.mxu0 %v2975_v12 }
  0x93   : >> { %2640 = vmatmul.mubr.bf16.vlgmr.msra.gmra.mrb[0].mxu1 %v3112_v23  ;;  %v2330_v23 = vld [vmem:[%s3083_s21 + $0x58] sm:$0xe] }
  0x94   : >> { %2752 = vmatmul.mubr.bf16.vlgmr.msra.gmra.mrb[0].mxu0 %v1592_v19  ;;  %2799 = vmatpush3.bf16.msra.mxu1 %v2975_v12  ;;  %v2347_v35 = vcombine.low %v2330_v23, %v3299_v31 }
  0x95   : >> { %2764 = vmatpush3.bf16.msra.mxu0 %v2975_v12  ;;  %2792 = vmatprep.subr.bf16.mxu1 %v2976_v21 }
  0x96   : >> { %2765 = vmatprep.subr.bf16.mxu0 %v2976_v21  ;;  %2643 = vmatprep.mubr.bf16.mxu1 %v3131_v36  ;;  %v1616_v36 = vsel %vm255_vm0, %v1611_v57, %v1615_v16  ;;  %v1786_v31 = vrot.slane %v2347_v35, 1 }
  0x97   : >> { %2755 = vmatprep.mubr.bf16.mxu0 %v1600_v27 }
  0x98   : >> { %2800 = vmatpush3.bf16.msra.mxu1 %v2976_v21 }
  0x99   : >> { %2766 = vmatpush3.bf16.msra.mxu0 %v2976_v21  ;;  %2793 = vmatprep.subr.bf16.mxu1 %v2977_v54 }
  0x9a   : >> { %2767 = vmatprep.subr.bf16.mxu0 %v2977_v54 }
  0x9b   : >> { %2644 = vmatmul.mubr.bf16.gmra.mrb[4].mxu1 %v3166_v62  ;;  %v1787_v62 = vrot.slane %v3334_v44, 1  ;;  %v1792_v44 = vsel %vm595_vm1, %v1789_v41, %v1791_v42 }
  0x9c   : >> { %2756 = vmatmul.mubr.bf16.gmra.mrb[4].mxu0 %v1608_v32  ;;  %2801 = vmatpush3.bf16.msra.mxu1 %v2977_v54 }
  0x9d   : >> { %2768 = vmatpush3.bf16.msra.mxu0 %v2977_v54  ;;  %2794 = vmatprep.subr.bf16.mxu1 %v2978_v33  ;;  %v1790_v49 = vsel %vm595_vm1, %v1787_v62, %v1789_v41 }
  0x9e   : >> { %2769 = vmatprep.subr.bf16.mxu0 %v2978_v33  ;;  %2647 = vmatprep.mubr.bf16.mxu1 %v3177_v7  ;;  %v1788_v7 = vsel %vm595_vm1, %v1786_v31, %v1787_v62 }
  0x9f   : >> { %2759 = vmatprep.mubr.bf16.mxu0 %v1616_v36 }
  0xa0   : >> { %2802 = vmatpush3.bf16.msra.mxu1 %v2978_v33 }
  0xa1   : >> { %2770 = vmatpush3.bf16.msra.mxu0 %v2978_v33  ;;  %2795 = vmatprep.subr.bf16.mxu1 %v2980_v38 }
  0xa2   : >> { %2771 = vmatprep.subr.bf16.mxu0 %v2980_v38 }
  0xa3   : >> { %2648 = vmatmul.mubr.bf16.gmra.mrb[20].mxu1 %v2979_v39 }
  0xa4   : >> { %2803 = vmatpush3.bf16.msra.mxu1 %v2980_v38  ;;  %2760 = vmatmul.mubr.bf16.gmra.mrb[20].mxu0 %v1619_v40 }
  0xa5   : >> { %2772 = vmatpush3.bf16.msra.mxu0 %v2980_v38  ;;  %2796 = vmatprep.subr.bf16.mxu1 %v2981_v43 }
  0xa6   : >> { %2773 = vmatprep.subr.bf16.mxu0 %v2981_v43  ;;  %2779 = vmatprep.mubr.bf16.mxu0 %v1788_v7 }
  0xa7   : >> { %2783 = vmatprep.mubr.bf16.mxu1 %v1792_v44 }
  0xa8   : >> { %2804 = vmatpush3.bf16.msra.mxu1 %v2981_v43 }
  0xa9   : >> { %2774 = vmatpush3.bf16.msra.mxu0 %v2981_v43  ;;  %2797 = vmatprep.subr.bf16.mxu1 %v2983_v45 }
  0xaa   : >> { %2775 = vmatprep.subr.bf16.mxu0 %v2983_v45 }
  0xac   : >> { %2805 = vmatpush3.bf16.msra.mxu1 %v2983_v45 }
  0xad   : >> { %2776 = vmatpush3.bf16.msra.mxu0 %v2983_v45  ;;  %2798 = vmatprep.subr.bf16.mxu1 %v2984_v46 }
  0xae   : >> { %2777 = vmatprep.subr.bf16.mxu0 %v2984_v46 }
  0xb0   : >> { %2806 = vmatpush3.bf16.msra.mxu1 %v2984_v46 }
  0xb1   : >> { %2778 = vmatpush3.bf16.msra.mxu0 %v2984_v46 }
  0xb3   : >> { %2784 = vmatmul.mubr.bf16.vlgmr.msra.gmra.mrb[24].mxu1 %v1794_v48 }
  0xb4   : >> { %2780 = vmatmul.mubr.bf16.vlgmr.msra.gmra.mrb[0].mxu0 %v1790_v49  ;;  %2787 = vmatprep.mubr.bf16.mxu1 %v1796_v50 }
  0xbb   : >> { %2788 = vmatmul.mubr.bf16.gmra.mrb[28].mxu1 %v1795_v34 }
 0x116   : >> { %v2565_v51 = vpop.f32.mrb[8].mxu1 }
 0x117   : >> { %v423_v22 = vpop.f32.mrb[9].mxu1  ;;  %v2677_v52 = vpop.f32.mrb[8].mxu0 }
 0x118   : >> { %v2566_v53 = vpop.f32.mrb[10].mxu1  ;;  %v1145_v55 = vpop.f32.mrb[9].mxu0 }
 0x119   : >> { %v426_v56 = vpop.f32.mrb[11].mxu1  ;;  %v2678_v58 = vpop.f32.mrb[10].mxu0 }
 0x11a   : >> { %v1148_v59 = vpop.f32.mrb[11].mxu0 }
 0x136   : >> { %v2593_v60 = vpop.f32.mrb[12].mxu1 }
 0x137   : >> { %v569_v61 = vadd.f32 %v2593_v60, %v2565_v51  ;;  %v560_v63 = vpop.f32.mrb[13].mxu1 }
 0x138   : >> { %v561_v1 = vadd.f32 %v560_v63, %v423_v22  ;;  %v2594_v2 = vpop.f32.mrb[14].mxu1 }
 0x139   : >> { %v563_v3 = vpop.f32.mrb[15].mxu1  ;;  %v2705_v4 = vpop.f32.mrb[12].mxu0 }
 0x13a   : >> { %v564_v5 = vadd.f32 %v563_v3, %v426_v56  ;;  %v1322_v24 = vpop.f32.mrb[13].mxu0 }
 0x13b   : >> { %v2706_v20 = vpop.f32.mrb[14].mxu0 }
 0x13c   : >> { %v1325_v15 = vpop.f32.mrb[15].mxu0 }
 0x156   : >> { %v2621_v6 = vpop.f32.mrb[16].mxu1 }
 0x157   : >> { %v751_v8 = vadd.f32 %v2621_v6, %v569_v61  ;;  %v727_v9 = vpop.f32.mrb[17].mxu1 }
 0x158   : >> { %v749_v10 = vadd.f32 %v727_v9, %v561_v1  ;;  %v2622_v11 = vpop.f32.mrb[18].mxu1 }
 0x159   : >> { %v730_v12 = vpop.f32.mrb[19].mxu1  ;;  %v2733_v14 = vpop.f32.mrb[16].mxu0 }
 0x15a   : >> { %v750_v17 = vadd.f32 %v730_v12, %v564_v5  ;;  %v1527_v18 = vpop.f32.mrb[17].mxu0 }
 0x15b   : >> { %v2734_v19 = vpop.f32.mrb[18].mxu0 }
 0x15c   : >> { %v1530_v21 = vpop.f32.mrb[19].mxu0 }
 0x166   : >> { %v2641_v25 = vpop.f32.mrb[0].mxu1 }
 0x167   : >> { %v900_v26 = vpop.f32.mrb[1].mxu1 }
 0x168   : >> { %v2642_v27 = vpop.f32.mrb[2].mxu1 }
 0x169   : >> { %v903_v28 = vpop.f32.mrb[3].mxu1 }
 0x16e   : >> { %v2645_v13 = vpop.f32.mrb[4].mxu1 }
 0x16f   : >> { %v2757_v29 = vpop.f32.mrb[4].mxu0  ;;  %v916_v30 = vpop.f32.mrb[5].mxu1 }
 0x170   : >> { %v2811_v54 = vadd.f32 %v2757_v29, %v2645_v13  ;;  %v1724_v23 = vpop.f32.mrb[5].mxu0  ;;  %v2646_v57 = vpop.f32.mrb[6].mxu1 }
 0x171   : >> { %v2813_v16 = vadd.f32 %v1724_v23, %v916_v30  ;;  %v2758_v32 = vpop.f32.mrb[6].mxu0  ;;  %v919_v33 = vpop.f32.mrb[7].mxu1 }
 0x172   : >> { %v2815_v35 = vadd.f32 %v2758_v32, %v2646_v57  ;;  %v1727_v36 = vpop.f32.mrb[7].mxu0 }
 0x173   : >> { %v2817_v37 = vadd.f32 %v1727_v36, %v919_v33 }
 0x176   : >> { %v2649_v38 = vpop.f32.mrb[20].mxu1 }
 0x177   : >> { %v956_v39 = vadd.f32 %v2649_v38, %v751_v8  ;;  %v932_v31 = vpop.f32.mrb[21].mxu1  ;;  %v2761_v62 = vpop.f32.mrb[20].mxu0 }
 0x178   : >> { %v954_v40 = vadd.f32 %v932_v31, %v749_v10  ;;  %v2650_v41 = vpop.f32.mrb[22].mxu1  ;;  %v1740_v42 = vpop.f32.mrb[21].mxu0 }
 0x179   : >> { %v1169_v43 = vadd.f32 %v2677_v52, %v956_v39  ;;  %v935_v7 = vpop.f32.mrb[23].mxu1  ;;  %v2762_v44 = vpop.f32.mrb[22].mxu0 }
 0x17a   : >> { %v1167_v45 = vadd.f32 %v1145_v55, %v954_v40  ;;  %v955_v46 = vadd.f32 %v935_v7, %v750_v17  ;;  %v1743_v47 = vpop.f32.mrb[23].mxu0 }
 0x17b   : >> { %v1346_v34 = vadd.f32 %v2705_v4, %v1169_v43 }
 0x17c   : >> { %v1168_v48 = vadd.f32 %v1148_v59, %v955_v46  ;;  %v1344_v49 = vadd.f32 %v1322_v24, %v1167_v45 }
 0x17d   : >> { %v1551_v50 = vadd.f32 %v2733_v14, %v1346_v34 }
 0x17e   : >> { %v1549_v51 = vadd.f32 %v1527_v18, %v1344_v49  ;;  %v1345_v22 = vadd.f32 %v1325_v15, %v1168_v48 }
 0x17f   : >> { %v1764_v53 = vadd.f32 %v2761_v62, %v1551_v50 }
 0x180   : >> { %v1762_v56 = vadd.f32 %v1740_v42, %v1549_v51  ;;  %v1550_v58 = vadd.f32 %v1530_v21, %v1345_v22 }
 0x182   : >> { %v1763_v60 = vadd.f32 %v1743_v47, %v1550_v58 }
 0x186   : >> { %v2785_v61 = vpop.f32.mrb[24].mxu1 }
 0x187   : >> { %v2781_v63 = vpop.f32.mrb[0].mxu0  ;;  %v2812_v1 = vadd.f32 %v2811_v54, %v2785_v61  ;;  %v1901_v2 = vpop.f32.mrb[25].mxu1 }
 0x188   : >> { %v2807_v52 = vadd.f32 %v2781_v63, %v2641_v25  ;;  %v1885_v3 = vpop.f32.mrb[1].mxu0  ;;  %v2814_v5 = vadd.f32 %v2813_v16, %v1901_v2  ;;  %v2786_v55 = vpop.f32.mrb[26].mxu1 }
 0x189   : >> { %v1954_v20 = vadd.f32 %v2812_v1, %v3032_v0  ;;  %v2808_v4 = vadd.f32 %v1885_v3, %v900_v26  ;;  %v2782_v59 = vpop.f32.mrb[2].mxu0  ;;  %v2816_v24 = vadd.f32 %v2815_v35, %v2786_v55  ;;  %v1904_v6 = vpop.f32.mrb[27].mxu1 }
 0x18a   : >> { %v1950_v15 = vadd.f32 %v2807_v52, %v3032_v0  ;;  %v1952_v8 = vadd.f32 %v2814_v5, %v3032_v0  ;;  %v2809_v9 = vadd.f32 %v2782_v59, %v2642_v27  ;;  %v1888_v10 = vpop.f32.mrb[3].mxu0  ;;  %v2818_v11 = vadd.f32 %v2817_v37, %v1904_v6 }
 0x18b   : >> { %v1948_v12 = vadd.f32 %v2808_v4, %v3032_v0  ;;  %v1955_v14 = vadd.f32 %v2816_v24, %v3032_v0  ;;  %v2810_v17 = vadd.f32 %v1888_v10, %v903_v28  ;;  %v1965_v21 = vmax.f32 %v1954_v20, 0.0 }
 0x18c   : >> { %v1951_v18 = vadd.f32 %v2809_v9, %v3032_v0  ;;  %v1953_v19 = vadd.f32 %v2818_v11, %v3032_v0  ;;  %v1961_v13 = vmax.f32 %v1950_v15, 0.0  ;;  %v1963_v29 = vmax.f32 %v1952_v8, 0.0 }
 0x18d   : >> { %v1966_v25 = vmax.f32 %v1955_v14, 0.0  ;;  %v1949_v26 = vadd.f32 %v2810_v17, %v3032_v0  ;;  %v1959_v23 = vmax.f32 %v1948_v12, 0.0 }
 0x18e   : >> { %v1962_v30 = vmax.f32 %v1951_v18, 0.0  ;;  %v1964_v27 = vmax.f32 %v1953_v19, 0.0  ;;  %v2789_v54 = vpop.f32.mrb[28].mxu1 }
 0x18f   : >> { %v2402_v57 = vpack.c.bf16 %v1966_v25, %v1965_v21  ;;  %v1960_v16 = vmax.f32 %v1949_v26, 0.0  ;;  %v1941_v32 = vadd.f32 %v2789_v54, %v1764_v53  ;;  %v1917_v28 = vpop.f32.mrb[29].mxu1 }
 0x190   : >> { %v2392_v33 = vpack.c.bf16 %v1962_v30, %v1961_v13  ;;  %v2397_v35 = vpack.c.bf16 %v1964_v27, %v1963_v29  ;;  %v1939_v36 = vadd.f32 %v1917_v28, %v1762_v56  ;;  %v2790_v37 = vpop.f32.mrb[30].mxu1 }
 0x191   : >> { %2411 = vst [vmem:[%s2016_s17 + $0x18] sm:$0xff] %v2402_v57   ;;  %v2387_v38 = vpack.c.bf16 %v1960_v16, %v1959_v23  ;;  %v1958_v39 = vadd.f32 %v3032_v0, %v1941_v32  ;;  %v1920_v31 = vpop.f32.mrb[31].mxu1 }
 0x192   : >> { %2409 = vst [vmem:[%s2016_s17 + $0x8] sm:$0xff] %v2392_v33   ;;  %2410 = vst [vmem:[%s2016_s17 + $0x10] sm:$0xff] %v2397_v35   ;;  %v1956_v62 = vadd.f32 %v3032_v0, %v1939_v36  ;;  %v1940_v40 = vadd.f32 %v1920_v31, %v1763_v60 }
 0x193   : >> { %2388 = vst [vmem:[%s2016_s17] sm:$0xff] %v2387_v38   ;;  %v1969_v41 = vmax.f32 %v1958_v39, 0.0 }
 0x194   : >> { %v1957_v42 = vadd.f32 %v3032_v0, %v1940_v40  ;;  %v1967_v7 = vmax.f32 %v1956_v62, 0.0  ;;  %177 = sbr.rel (!%p175_p4) target bundleno = 18 (0x12), region = 81 }
 0x195   : >> { %v2382_v43 = vpack.c.bf16 %v1969_v41, %v1969_v41 }
 0x196   : >> { %v1968_v44 = vmax.f32 %v1957_v42, 0.0 }
 0x197   : >> { %2027 = vst [vmem:[%s2016_s17 + $0x28] sm:$0x1] %v2382_v43 }
 0x198   : >> { %v2407_v45 = vpack.c.bf16 %v1968_v44, %v1967_v7 }
 0x19a   : >> { %2412 = vst [vmem:[%s2016_s17 + $0x20] sm:$0xff] %v2407_v45  }
 0x19b PF: > { %s13_s12 = sadd.s32 1, %s2995_s12  }
 0x19c   : > { %p10_p5 = scmp.ge.s32.totalorder %s13_s12, 4  }
 0x19e   :  { %12 = sbr.rel (!%p10_p5) target bundleno = 1 (0x1), region = 92 }

// kernel: deep_eigenspace_cnn_forward.4
= control target key start
LH: loop header
LB: loop body
LE: loop exit
PB: predicated region body
PF: predicated region fallthrough
CT: control target
= control target key end

     0   :  { %s2434_s12 = smov 0   ;;  %s2918_s0 = inlined_call_operand.vmem [shape: bf16[2,8,43,128], index: 0, kind: input, shape index: {}]   ;;  %s2919_s1 = inlined_call_operand.vmem [shape: bf16[9,128,128], index: 1, kind: input, shape index: {}]   ;;  %s2920_s2 = inlined_call_operand.vmem [shape: f32[1,128], index: 2, kind: input, shape index: {}]   ;;  %s2921_s3 = inlined_call_operand.vmem [shape: bf16[2,6,41,128], index: 3, kind: output, shape index: {}]  }
   0x1 LB: > { %s1654_s13 = sadd.s32 4294967295, %s2406_s12   ;;  %p1658_p0 = scmp.ge.s32.totalorder %s2406_s12, 1  ;;  %s2406_s12 = sphi %s2434_s12, %s13_s12  }
   0x2   : > { %p137_p1 = scmp.lt.s32.totalorder %s2406_s12, 3 }
   0x4   : > { %p138_p2 = pnand %p1658_p0, %p137_p1 }
   0x5   : > { %p161_p3 = scmp.lt.s32.totalorder (!%p138_p2), %s1654_s13, 1  ;;  %v2445_v0 = vld [vmem:[%s2920_s2] ss:$0 sm:$0xff] (!%p138_p2)  ;;  %s2457_s24 = smov (!%p138_p2), 0  }
   0x6   : > { %141 = sbr.rel (%p138_p2) target bundleno = 412 (0x19c), region = 32 }
   0xd   : > { %s2923_s13 = smov (!%p161_p3, %s1654_s13), 1 }
   0xe   : > { %s2289_s16 = smul.u32 192, %s2923_s13 }
   0xf   : > { %s2290_s17 = smul.u32 144, %s2923_s13 }
  0x10   : > { %s2450_s20 = scalar_lea.vmem %s2918_s0, %s2289_s16 }
  0x11   : > { %s2455_s23 = scalar_lea.vmem %s2921_s3, %s2290_s17 }
  0x12 LB: >> { %v2309_v1 = vld [vmem:[%s2919_s1 + $0x40] sm:$0xff]   ;;  %v2412_v2 = vmov 0.0   ;;  %v2311_v4 = vld [vmem:[%s2919_s1 + $0x48] sm:$0xff]   ;;  %vm2413_vm0 = vmmov 0   ;;  %v2313_v6 = vld [vmem:[%s2919_s1 + $0x50] sm:$0xff]   ;;  %s1903_s10 = smul.u32 24, %s2410_s24  ;;  %s2410_s24 = sphi %s2457_s24, %s178_s24  }
  0x13   : >> { %2021 = vmatprep.subr.bf16.mxu0 %v2412_v2  ;;  %2049 = vmatprep.subr.bf16.mxu1 %v2412_v2  ;;  %v2310_v3 = vld [vmem:[%s2919_s1] sm:$0xff]   ;;  %v2312_v5 = vld [vmem:[%s2919_s1 + $0x8] sm:$0xff]   ;;  %v2314_v7 = vld [vmem:[%s2919_s1 + $0x10] sm:$0xff]   ;;  %vm236_vm1 = vsmask.f32 7424  ;;  %vm501_vm2 = vcmask 1046528  }
  0x14   : >> { %2022 = vmatpush3.bf16.msra.mxu0 %v2309_v1  ;;  %2037 = vmatprep.mubr.msk.bf16.mxu0 %vm2413_vm0, %v2412_v2  ;;  %v2315_v8 = vld [vmem:[%s2919_s1 + $0x58] sm:$0xff]   ;;  %s2502_s16 = scalar_lea.vmem %s2450_s20, %s1903_s10  ;;  %v2317_v10 = vld [vmem:[%s2919_s1 + $0x60] sm:$0xff]   ;;  %v2319_v14 = vld [vmem:[%s2919_s1 + $0x68] sm:$0xff]   ;;  %s1572_s18 = scalar_lea.vmem %s2455_s23, %s1903_s10  ;;  %vm1578_vm3 = vcmask 1040384   ;;  %vm1579_vm4 = vsmask.f32 256 }
  0x15   : >> { %2050 = vmatpush3.bf16.msra.mxu1 %v2310_v3  ;;  %2023 = vmatprep.subr.bf16.mxu0 %v2412_v2  ;;  %v2316_v9 = vld [vmem:[%s2919_s1 + $0x18] sm:$0xff]   ;;  %v2318_v11 = vld [vmem:[%s2919_s1 + $0x20] sm:$0xff]   ;;  %v2521_v16 = vld [vmem:[%s2502_s16 + $0x8] sm:$0xff]   ;;  %s178_s24 = sadd.s32 1, %s2410_s24  }
  0x16   : >> { %2051 = vmatprep.subr.bf16.mxu1 %v2412_v2  ;;  %2065 = vmatprep.mubr.msk.bf16.mxu1 %vm2413_vm0, %v2412_v2  ;;  %v182_v12 = vld [vmem:[%s2502_s16] sm:$0xf]  ;;  %v2514_v13 = vld [vmem:[%s2502_s16 + $0x4] sm:$0xf]  ;;  %v2320_v17 = vld [vmem:[%s2919_s1 + $0x28] sm:$0xff]   ;;  %v245_v22 = vshll.u32 %v2521_v16, 16 }
  0x17   : >> { %v1678_v15 = vcombine.low %v182_v12, %v2514_v13  ;;  %v2321_v19 = vld [vmem:[%s2919_s1 + $0x70] sm:$0xff]   ;;  %v2323_v24 = vld [vmem:[%s2919_s1 + $0x78] sm:$0xff]   ;;  %v2327_v31 = vld [vmem:[%s2919_s1 + $0x80] sm:$0xff]   ;;  %v249_v33 = vshrl.u32 %v2521_v16, 16  ;;  %v503_v56 = vrot.slane %v2521_v16, 1  ;;  %p175_p4 = scmp.ge.s32.totalorder %s178_s24, 6  }
  0x18   : >> { %2024 = vmatpush3.bf16.msra.mxu0 %v2311_v4  ;;  %v2322_v23 = vld [vmem:[%s2919_s1 + $0x30] sm:$0xff]   ;;  %v2324_v25 = vld [vmem:[%s2919_s1 + $0x38] sm:$0xff]   ;;  %v247_v27 = vrot.slane %v245_v22, 1  ;;  %v2328_v35 = vld [vmem:[%s2919_s1 + $0xc0] sm:$0xff]  }
  0x19   : >> { %2052 = vmatpush3.bf16.msra.mxu1 %v2312_v5  ;;  %2025 = vmatprep.subr.bf16.mxu0 %v2412_v2  ;;  %v240_v18 = vshll.u32 %v1678_v15, 16  ;;  %v238_v20 = vshrl.u32 %v1678_v15, 16  ;;  %v2544_v28 = vld [vmem:[%s2502_s16 + $0x10] sm:$0xf]  ;;  %v187_v29 = vld [vmem:[%s2502_s16 + $0x14] sm:$0x1]  ;;  %vm1580_vm5 = vmand %vm1578_vm3, %vm1579_vm4 }
  0x1a   : >> { %2053 = vmatprep.subr.bf16.mxu1 %v2412_v2  ;;  %v1680_v30 = vcombine.low %v2544_v28, %v187_v29  ;;  %v2329_v36 = vld [vmem:[%s2919_s1 + $0x88] sm:$0xff]   ;;  %v251_v37 = vor.u32 %v249_v33, %v247_v27  ;;  %v2331_v40 = vld [vmem:[%s2919_s1 + $0x90] sm:$0xff]   ;;  %v2333_v44 = vld [vmem:[%s2919_s1 + $0x98] sm:$0xff]  }
  0x1b   : >> { %v242_v21 = vrot.slane %v240_v18, 1  ;;  %v2330_v39 = vld [vmem:[%s2919_s1 + $0xc8] sm:$0xff]   ;;  %v2332_v42 = vld [vmem:[%s2919_s1 + $0xd0] sm:$0xff]   ;;  %v2334_v45 = vld [vmem:[%s2919_s1 + $0xd8] sm:$0xff]  }
  0x1c   : >> { %2026 = vmatpush3.bf16.msra.mxu0 %v2313_v6  ;;  %v253_v34 = vshll.u32 %v1680_v30, 16  ;;  %v257_v43 = vshrl.u32 %v1680_v30, 16  ;;  %v2336_v47 = vld [vmem:[%s2919_s1 + $0xa0] sm:$0xff]   ;;  %v2338_v49 = vld [vmem:[%s2919_s1 + $0xa8] sm:$0xff]   ;;  %v2340_v52 = vld [vmem:[%s2919_s1 + $0xb0] sm:$0xff]  }
  0x1d   : >> { %2054 = vmatpush3.bf16.msra.mxu1 %v2314_v7  ;;  %2027 = vmatprep.subr.bf16.mxu0 %v2412_v2  ;;  %v243_v26 = vor.u32 %v242_v21, %v238_v20  ;;  %v2337_v48 = vld [vmem:[%s2919_s1 + $0xe0] sm:$0xff]   ;;  %v2339_v50 = vld [vmem:[%s2919_s1 + $0xe8] sm:$0xff]   ;;  %v2341_v54 = vld [vmem:[%s2919_s1 + $0xf0] sm:$0xff]  }
  0x1e   : >> { %2055 = vmatprep.subr.bf16.mxu1 %v2412_v2  ;;  %v255_v38 = vrot.slane %v253_v34, 1  ;;  %v476_v51 = vld [vmem:[%s2502_s16] sm:$0xe]  ;;  %v2342_v55 = vld [vmem:[%s2919_s1 + $0xb8] sm:$0xff]   ;;  %v477_v61 = vld [vmem:[%s2502_s16 + $0x14] sm:$0x3] }
  0x1f   : >> { %v248_v32 = vsel %vm236_vm1, %v243_v26, %v247_v27  ;;  %v1713_v53 = vcombine.low %v476_v51, %v2514_v13  ;;  %v1723_v57 = vld [vmem:[%s2502_s16 + $0x18] sm:$0xf]  ;;  %v2630_v58 = vld [vmem:[%s2502_s16 + $0x1c] sm:$0xf]  ;;  %v2346_v1 = vld [vmem:[%s2919_s1 + $0x100] sm:$0xff]   ;;  %v1714_v3 = vcombine.low %v2544_v28, %v477_v61 }
  0x20   : >> { %2028 = vmatpush3.bf16.msra.mxu0 %v2315_v8  ;;  %v256_v41 = vsel %vm236_vm1, %v251_v37, %v255_v38  ;;  %v259_v46 = vor.u32 %v257_v43, %v255_v38  ;;  %v2343_v59 = vld [vmem:[%s2919_s1 + $0xf8] sm:$0xff]   ;;  %v2640_v63 = vcombine.low %v1723_v57, %v2630_v58  ;;  %v2347_v4 = vld [vmem:[%s2919_s1 + $0x140] sm:$0xff]   ;;  %v2348_v5 = vld [vmem:[%s2919_s1 + $0x108] sm:$0xff]  }
  0x21   : >> { %2056 = vmatpush3.bf16.msra.mxu1 %v2316_v9  ;;  %2029 = vmatprep.subr.bf16.mxu0 %v2412_v2  ;;  %v502_v60 = vrot.slane %v1713_v53, 1  ;;  %v505_v6 = vrot.slane %v1714_v3, 1  ;;  %v2349_v7 = vld [vmem:[%s2919_s1 + $0x148] sm:$0xff]   ;;  %v2351_v9 = vld [vmem:[%s2919_s1 + $0x110] sm:$0xff]   ;;  %v2354_v12 = vld [vmem:[%s2919_s1 + $0x118] sm:$0xff]  }
  0x22   : >> { %2057 = vmatprep.subr.bf16.mxu1 %v2412_v2  ;;  %v2355_v13 = vld [vmem:[%s2919_s1 + $0x158] sm:$0xff]   ;;  %v2357_v18 = vld [vmem:[%s2919_s1 + $0x160] sm:$0xff]   ;;  %v797_v20 = vshll.u32 %v2640_v63, 16  ;;  %v2361_v21 = vld [vmem:[%s2919_s1 + $0x168] sm:$0xff]  }
  0x23   : >> { %v504_v62 = vsel %vm501_vm2, %v502_v60, %v503_v56  ;;  %v506_v8 = vsel %vm501_vm2, %v503_v56, %v505_v6  ;;  %v1780_v22 = vld [vmem:[%s2502_s16 + $0x18] sm:$0xe]  ;;  %v2363_v27 = vld [vmem:[%s2919_s1 + $0x170] sm:$0xff]   ;;  %v2367_v37 = vld [vmem:[%s2919_s1 + $0x180] sm:$0xff]  }
  0x24   : >> { %2030 = vmatpush3.bf16.msra.mxu0 %v2317_v10  ;;  %v2669_v10 = vld [vmem:[%s2502_s16 + $0x20] sm:$0xff]   ;;  %v1798_v28 = vcombine.low %v1780_v22, %v2630_v58  ;;  %v2364_v29 = vld [vmem:[%s2919_s1 + $0x138] sm:$0xff]   ;;  %v2369_v43 = vld [vmem:[%s2919_s1 + $0x188] sm:$0xff]  }
  0x25   : >> { %2058 = vmatpush3.bf16.msra.mxu1 %v2318_v11  ;;  %2031 = vmatprep.subr.bf16.mxu0 %v2412_v2  ;;  %v2352_v11 = vld [vmem:[%s2919_s1 + $0x150] sm:$0xff]   ;;  %v802_v26 = vshll.u32 %v2669_v10, 16  ;;  %v957_v34 = vrot.slane %v2669_v10, 1  ;;  %v806_v38 = vshrl.u32 %v2669_v10, 16  ;;  %v2373_v53 = vld [vmem:[%s2919_s1 + $0x198] sm:$0xff]   ;;  %v2375_v58 = vld [vmem:[%s2919_s1 + $0x1a0] sm:$0xff]  }
  0x26   : >> { %2059 = vmatprep.subr.bf16.mxu1 %v2412_v2  ;;  %v956_v33 = vrot.slane %v1798_v28, 1  ;;  %v2788_v56 = vld [vmem:[%s2502_s16 + $0x34] sm:$0xf]  ;;  %v2377_v61 = vld [vmem:[%s2919_s1 + $0x1a8] sm:$0xff]  }
  0x27   : >> { %v2379_v3 = vld [vmem:[%s2919_s1 + $0x1b0] sm:$0xff]   ;;  %v2391_v28 = vld [vmem:[%s2919_s1 + $0x228] sm:$0xff]  }
  0x28   : >> { %2032 = vmatpush3.bf16.msra.mxu0 %v2319_v14  ;;  %v2685_v14 = vld [vmem:[%s2502_s16 + $0x28] sm:$0xf]  ;;  %v2387_v22 = vld [vmem:[%s2919_s1 + $0x210] sm:$0xff]  }
  0x29   : >> { %2060 = vmatpush3.bf16.msra.mxu1 %v2320_v17  ;;  %2033 = vmatprep.subr.bf16.mxu0 %v2412_v2 }
  0x2a   : >> { %2061 = vmatprep.subr.bf16.mxu1 %v2412_v2 }
  0x2c   : >> { %2034 = vmatpush3.bf16.msra.mxu0 %v2321_v19  ;;  %v2360_v19 = vld [vmem:[%s2919_s1 + $0x128] sm:$0xff]  }
  0x2d   : >> { %2062 = vmatpush3.bf16.msra.mxu1 %v2322_v23  ;;  %2035 = vmatprep.subr.bf16.mxu0 %v2412_v2  ;;  %v2362_v23 = vld [vmem:[%s2919_s1 + $0x130] sm:$0xff]  }
  0x2e   : >> { %2063 = vmatprep.subr.bf16.mxu1 %v2412_v2 }
  0x30   : >> { %2036 = vmatpush3.bf16.msra.mxu0 %v2323_v24  ;;  %v795_v24 = vshrl.u32 %v2640_v63, 16 }
  0x31   : >> { %2064 = vmatpush3.bf16.msra.mxu1 %v2324_v25  ;;  %2077 = vmatprep.subr.bf16.mxu0 %v2412_v2  ;;  %v799_v25 = vrot.slane %v797_v20, 1 }
  0x32   : >> { %2105 = vmatprep.subr.bf16.mxu1 %v2412_v2 }
  0x33   : >> { %2038 = vmatmul.mubr.bf16.vlgmr.msra.gmra.mrb[0].mxu0 %v248_v32  ;;  %v2365_v32 = vld [vmem:[%s2919_s1 + $0x178] sm:$0xff]  }
  0x34   : >> { %2066 = vmatmul.mubr.bf16.vlgmr.msra.gmra.mrb[0].mxu1 %v1678_v15  ;;  %2078 = vmatpush3.bf16.msra.mxu0 %v2327_v31  ;;  %v1728_v15 = vld [vmem:[%s2502_s16 + $0x2c] sm:$0x1]  ;;  %v804_v31 = vrot.slane %v802_v26, 1  ;;  %v2390_v26 = vld [vmem:[%s2919_s1 + $0x220] sm:$0xff]  }
  0x35   : >> { %2106 = vmatpush3.bf16.msra.mxu1 %v2328_v35  ;;  %2079 = vmatprep.subr.bf16.mxu0 %v2412_v2  ;;  %v2697_v17 = vcombine.low %v2685_v14, %v1728_v15  ;;  %v1781_v35 = vld [vmem:[%s2502_s16 + $0x2c] sm:$0x3]  ;;  %v2385_v15 = vld [vmem:[%s2919_s1 + $0x200] sm:$0xff]  }
  0x36   : >> { %2107 = vmatprep.subr.bf16.mxu1 %v2412_v2  ;;  %2069 = vmatprep.mubr.msk.bf16.mxu1 %vm2413_vm0, %v2412_v2 }
  0x37   : >> { %2041 = vmatprep.mubr.msk.bf16.mxu0 %vm2413_vm0, %v2412_v2 }
  0x38   : >> { %2080 = vmatpush3.bf16.msra.mxu0 %v2329_v36 }
  0x39   : >> { %2108 = vmatpush3.bf16.msra.mxu1 %v2330_v39  ;;  %2081 = vmatprep.subr.bf16.mxu0 %v2412_v2  ;;  %v810_v39 = vshll.u32 %v2697_v17, 16 }
  0x3a   : >> { %2109 = vmatprep.subr.bf16.mxu1 %v2412_v2 }
  0x3b   : >> { %2042 = vmatmul.mubr.bf16.gmra.mrb[4].mxu0 %v256_v41  ;;  %v958_v41 = vsel %vm501_vm2, %v956_v33, %v957_v34 }
  0x3c   : >> { %2082 = vmatpush3.bf16.msra.mxu0 %v2331_v40  ;;  %2070 = vmatmul.mubr.bf16.gmra.mrb[4].mxu1 %v2521_v16  ;;  %v2356_v16 = vld [vmem:[%s2919_s1 + $0x120] sm:$0xff]   ;;  %v1799_v40 = vcombine.low %v2685_v14, %v1781_v35 }
  0x3d   : >> { %2110 = vmatpush3.bf16.msra.mxu1 %v2332_v42  ;;  %2083 = vmatprep.subr.bf16.mxu0 %v2412_v2  ;;  %v2368_v42 = vld [vmem:[%s2919_s1 + $0x1c0] sm:$0xff]  }
  0x3e   : >> { %2111 = vmatprep.subr.bf16.mxu1 %v2412_v2  ;;  %2073 = vmatprep.mubr.msk.bf16.mxu1 %vm2413_vm0, %v2412_v2 }
  0x3f   : >> { %2045 = vmatprep.mubr.msk.bf16.mxu0 %vm2413_vm0, %v2412_v2 }
  0x40   : >> { %2084 = vmatpush3.bf16.msra.mxu0 %v2333_v44  ;;  %v808_v44 = vor.u32 %v806_v38, %v804_v31 }
  0x41   : >> { %2112 = vmatpush3.bf16.msra.mxu1 %v2334_v45  ;;  %2085 = vmatprep.subr.bf16.mxu0 %v2412_v2  ;;  %v812_v45 = vrot.slane %v810_v39, 1 }
  0x42   : >> { %2113 = vmatprep.subr.bf16.mxu1 %v2412_v2 }
  0x43   : >> { %2046 = vmatmul.mubr.bf16.gmra.mrb[8].mxu0 %v259_v46  ;;  %v2370_v46 = vld [vmem:[%s2919_s1 + $0x1c8] sm:$0xff]  }
  0x44   : >> { %2086 = vmatpush3.bf16.msra.mxu0 %v2336_v47  ;;  %2074 = vmatmul.mubr.bf16.gmra.mrb[8].mxu1 %v1680_v30  ;;  %v800_v30 = vor.u32 %v799_v25, %v795_v24  ;;  %v959_v47 = vrot.slane %v1799_v40, 1  ;;  %v2389_v24 = vld [vmem:[%s2919_s1 + $0x218] sm:$0xff]  }
  0x45   : >> { %2114 = vmatpush3.bf16.msra.mxu1 %v2337_v48  ;;  %2087 = vmatprep.subr.bf16.mxu0 %v2412_v2  ;;  %v813_v48 = vsel %vm236_vm1, %v808_v44, %v812_v45 }
  0x46   : >> { %2115 = vmatprep.subr.bf16.mxu1 %v2412_v2  ;;  %2093 = vmatprep.mubr.msk.bf16.mxu0 %vm2413_vm0, %v2412_v2  ;;  %v805_v36 = vsel %vm236_vm1, %v800_v30, %v804_v31  ;;  %v960_v51 = vsel %vm501_vm2, %v957_v34, %v959_v47  ;;  %v1866_v30 = vld [vmem:[%s2502_s16 + $0x44] sm:$0x3]  ;;  %v2392_v31 = vld [vmem:[%s2919_s1 + $0x230] sm:$0xff]   ;;  %v2393_v34 = vld [vmem:[%s2919_s1 + $0x238] sm:$0xff]  }
  0x47   : >> { %2121 = vmatprep.mubr.msk.bf16.mxu1 %vm2413_vm0, %v2412_v2 }
  0x48   : >> { %2088 = vmatpush3.bf16.msra.mxu0 %v2338_v49  ;;  %v2371_v49 = vld [vmem:[%s2919_s1 + $0x190] sm:$0xff]  }
  0x49   : >> { %2116 = vmatpush3.bf16.msra.mxu1 %v2339_v50  ;;  %2089 = vmatprep.subr.bf16.mxu0 %v2412_v2  ;;  %v2372_v50 = vld [vmem:[%s2919_s1 + $0x1d0] sm:$0xff]  }
  0x4a   : >> { %2117 = vmatprep.subr.bf16.mxu1 %v2412_v2 }
  0x4c   : >> { %2090 = vmatpush3.bf16.msra.mxu0 %v2340_v52  ;;  %v814_v52 = vshrl.u32 %v2697_v17, 16 }
  0x4d   : >> { %2118 = vmatpush3.bf16.msra.mxu1 %v2341_v54  ;;  %2091 = vmatprep.subr.bf16.mxu0 %v2412_v2  ;;  %v2374_v54 = vld [vmem:[%s2919_s1 + $0x1d8] sm:$0xff]  }
  0x4e   : >> { %2119 = vmatprep.subr.bf16.mxu1 %v2412_v2  ;;  %v816_v57 = vor.u32 %v814_v52, %v812_v45 }
  0x50   : >> { %2092 = vmatpush3.bf16.msra.mxu0 %v2342_v55  ;;  %v1808_v55 = vld [vmem:[%s2502_s16 + $0x30] sm:$0xf] }
  0x51   : >> { %2120 = vmatpush3.bf16.msra.mxu1 %v2343_v59  ;;  %2133 = vmatprep.subr.bf16.mxu0 %v2412_v2  ;;  %v2376_v59 = vld [vmem:[%s2919_s1 + $0x1e0] sm:$0xff]   ;;  %v1830_v60 = vcombine.low %v1808_v55, %v2788_v56 }
  0x52   : >> { %2161 = vmatprep.subr.bf16.mxu1 %v2412_v2 }
  0x53   : >> { %2094 = vmatmul.mubr.bf16.vlgmr.msra.gmra.mrb[12].mxu0 %v504_v62  ;;  %v2378_v62 = vld [vmem:[%s2919_s1 + $0x1e8] sm:$0xff]  }
  0x54   : >> { %2122 = vmatmul.mubr.bf16.vlgmr.msra.gmra.mrb[12].mxu1 %v2640_v63  ;;  %2134 = vmatpush3.bf16.msra.mxu0 %v2346_v1  ;;  %v2809_v63 = vld [vmem:[%s2502_s16 + $0x38] sm:$0xff]   ;;  %v1251_v1 = vshll.u32 %v1830_v60, 16 }
  0x55   : >> { %2162 = vmatpush3.bf16.msra.mxu1 %v2347_v4  ;;  %2135 = vmatprep.subr.bf16.mxu0 %v2412_v2  ;;  %v2380_v4 = vld [vmem:[%s2919_s1 + $0x1f0] sm:$0xff]  }
  0x56   : >> { %2163 = vmatprep.subr.bf16.mxu1 %v2412_v2  ;;  %2097 = vmatprep.mubr.msk.bf16.mxu0 %vm2413_vm0, %v2412_v2 }
  0x57   : >> { %2125 = vmatprep.mubr.msk.bf16.mxu1 %vm2413_vm0, %v2412_v2 }
  0x58   : >> { %2136 = vmatpush3.bf16.msra.mxu0 %v2348_v5  ;;  %v1249_v5 = vshrl.u32 %v1830_v60, 16 }
  0x59   : >> { %2164 = vmatpush3.bf16.msra.mxu1 %v2349_v7  ;;  %2137 = vmatprep.subr.bf16.mxu0 %v2412_v2  ;;  %v1256_v7 = vshll.u32 %v2809_v63, 16 }
  0x5a   : >> { %2165 = vmatprep.subr.bf16.mxu1 %v2412_v2 }
  0x5b   : >> { %2098 = vmatmul.mubr.bf16.gmra.mrb[16].mxu0 %v506_v8  ;;  %v2826_v8 = vld [vmem:[%s2502_s16 + $0x40] sm:$0xf] }
  0x5c   : >> { %2138 = vmatpush3.bf16.msra.mxu0 %v2351_v9  ;;  %2126 = vmatmul.mubr.bf16.gmra.mrb[16].mxu1 %v2669_v10  ;;  %v1813_v9 = vld [vmem:[%s2502_s16 + $0x44] sm:$0x1]  ;;  %v2381_v10 = vld [vmem:[%s2919_s1 + $0x1b8] sm:$0xff]   ;;  %v1884_v33 = vcombine.low %v2826_v8, %v1866_v30 }
  0x5d   : >> { %2166 = vmatpush3.bf16.msra.mxu1 %v2352_v11  ;;  %2139 = vmatprep.subr.bf16.mxu0 %v2412_v2  ;;  %v2382_v11 = vld [vmem:[%s2919_s1 + $0x1f8] sm:$0xff]   ;;  %v1832_v14 = vcombine.low %v2826_v8, %v1813_v9 }
  0x5e   : >> { %2167 = vmatprep.subr.bf16.mxu1 %v2412_v2  ;;  %2101 = vmatprep.mubr.msk.bf16.mxu0 %vm2413_vm0, %v2412_v2 }
  0x5f   : >> { %2129 = vmatprep.mubr.msk.bf16.mxu1 %vm2413_vm0, %v2412_v2  ;;  %v1268_v25 = vshrl.u32 %v1832_v14, 16 }
  0x60   : >> { %2140 = vmatpush3.bf16.msra.mxu0 %v2354_v12 }
  0x61   : >> { %2168 = vmatpush3.bf16.msra.mxu1 %v2355_v13  ;;  %2141 = vmatprep.subr.bf16.mxu0 %v2412_v2  ;;  %v1258_v13 = vrot.slane %v1256_v7, 1 }
  0x62   : >> { %2169 = vmatprep.subr.bf16.mxu1 %v2412_v2 }
  0x63   : >> { %2102 = vmatmul.mubr.bf16.gmra.mrb[20].mxu0 %v505_v6  ;;  %v1253_v6 = vrot.slane %v1251_v1, 1 }
  0x64   : >> { %2142 = vmatpush3.bf16.msra.mxu0 %v2356_v16  ;;  %2130 = vmatmul.mubr.bf16.gmra.mrb[20].mxu1 %v2697_v17  ;;  %v1260_v17 = vshrl.u32 %v2809_v63, 16 }
  0x65   : >> { %2170 = vmatpush3.bf16.msra.mxu1 %v2357_v18  ;;  %2143 = vmatprep.subr.bf16.mxu0 %v2412_v2  ;;  %v1254_v12 = vor.u32 %v1253_v6, %v1249_v5  ;;  %v1264_v18 = vshll.u32 %v1832_v14, 16 }
  0x66   : >> { %2171 = vmatprep.subr.bf16.mxu1 %v2412_v2  ;;  %2149 = vmatprep.mubr.msk.bf16.mxu0 %vm2413_vm0, %v2412_v2  ;;  %v1262_v20 = vor.u32 %v1260_v17, %v1258_v13 }
  0x67   : >> { %2177 = vmatprep.mubr.msk.bf16.mxu1 %vm2413_vm0, %v2412_v2  ;;  %v1259_v16 = vsel %vm236_vm1, %v1254_v12, %v1258_v13 }
  0x68   : >> { %2144 = vmatpush3.bf16.msra.mxu0 %v2360_v19  ;;  %v2386_v19 = vld [vmem:[%s2919_s1 + $0x208] sm:$0xff]  }
  0x69   : >> { %2172 = vmatpush3.bf16.msra.mxu1 %v2361_v21  ;;  %2145 = vmatprep.subr.bf16.mxu0 %v2412_v2  ;;  %v1266_v21 = vrot.slane %v1264_v18, 1 }
  0x6a   : >> { %2173 = vmatprep.subr.bf16.mxu1 %v2412_v2 }
  0x6c   : >> { %2146 = vmatpush3.bf16.msra.mxu0 %v2362_v23  ;;  %v1267_v23 = vsel %vm236_vm1, %v1262_v20, %v1266_v21 }
  0x6d   : >> { %2174 = vmatpush3.bf16.msra.mxu1 %v2363_v27  ;;  %2147 = vmatprep.subr.bf16.mxu0 %v2412_v2  ;;  %v1270_v27 = vor.u32 %v1268_v25, %v1266_v21 }
  0x6e   : >> { %2175 = vmatprep.subr.bf16.mxu1 %v2412_v2 }
  0x70   : >> { %2148 = vmatpush3.bf16.msra.mxu0 %v2364_v29  ;;  %v1865_v29 = vld [vmem:[%s2502_s16 + $0x30] sm:$0xe] }
  0x71   : >> { %2176 = vmatpush3.bf16.msra.mxu1 %v2365_v32  ;;  %2189 = vmatprep.subr.bf16.mxu0 %v2412_v2  ;;  %v1883_v32 = vcombine.low %v1865_v29, %v2788_v56 }
  0x72   : >> { %2217 = vmatprep.subr.bf16.mxu1 %v2412_v2 }
  0x73   : >> { %2150 = vmatmul.mubr.bf16.vlgmr.msra.gmra.mrb[24].mxu0 %v805_v36  ;;  %v1410_v35 = vrot.slane %v1883_v32, 1  ;;  %v1411_v36 = vrot.slane %v2809_v63, 1 }
  0x74   : >> { %2178 = vmatmul.mubr.bf16.vlgmr.msra.gmra.mrb[24].mxu1 %v958_v41  ;;  %2190 = vmatpush3.bf16.msra.mxu0 %v2367_v37  ;;  %v1413_v37 = vrot.slane %v1884_v33, 1 }
  0x75   : >> { %2218 = vmatpush3.bf16.msra.mxu1 %v2368_v42  ;;  %2191 = vmatprep.subr.bf16.mxu0 %v2412_v2  ;;  %v1412_v38 = vsel %vm501_vm2, %v1410_v35, %v1411_v36 }
  0x76   : >> { %2219 = vmatprep.subr.bf16.mxu1 %v2412_v2  ;;  %2153 = vmatprep.mubr.msk.bf16.mxu0 %vm2413_vm0, %v2412_v2  ;;  %v1414_v39 = vsel %vm501_vm2, %v1411_v36, %v1413_v37 }
  0x77   : >> { %2181 = vmatprep.mubr.msk.bf16.mxu1 %vm2413_vm0, %v2412_v2 }
  0x78   : >> { %2192 = vmatpush3.bf16.msra.mxu0 %v2369_v43 }
  0x79   : >> { %2220 = vmatpush3.bf16.msra.mxu1 %v2370_v46  ;;  %2193 = vmatprep.subr.bf16.mxu0 %v2412_v2 }
  0x7a   : >> { %2221 = vmatprep.subr.bf16.mxu1 %v2412_v2 }
  0x7b   : >> { %2154 = vmatmul.mubr.bf16.gmra.mrb[28].mxu0 %v813_v48 }
  0x7c   : >> { %2194 = vmatpush3.bf16.msra.mxu0 %v2371_v49  ;;  %2182 = vmatmul.mubr.bf16.gmra.mrb[28].mxu1 %v960_v51 }
  0x7d   : >> { %2222 = vmatpush3.bf16.msra.mxu1 %v2372_v50  ;;  %2195 = vmatprep.subr.bf16.mxu0 %v2412_v2 }
  0x7e   : >> { %2223 = vmatprep.subr.bf16.mxu1 %v2412_v2  ;;  %2157 = vmatprep.mubr.msk.bf16.mxu0 %vm2413_vm0, %v2412_v2 }
  0x7f   : >> { %2185 = vmatprep.mubr.msk.bf16.mxu1 %vm2413_vm0, %v2412_v2 }
  0x80   : >> { %2196 = vmatpush3.bf16.msra.mxu0 %v2373_v53 }
  0x81   : >> { %2224 = vmatpush3.bf16.msra.mxu1 %v2374_v54  ;;  %2197 = vmatprep.subr.bf16.mxu0 %v2412_v2 }
  0x82   : >> { %2225 = vmatprep.subr.bf16.mxu1 %v2412_v2 }
  0x83   : >> { %2158 = vmatmul.mubr.bf16.gmra.mrb[32].mxu0 %v816_v57 }
  0x84   : >> { %2198 = vmatpush3.bf16.msra.mxu0 %v2375_v58  ;;  %2186 = vmatmul.mubr.bf16.gmra.mrb[32].mxu1 %v959_v47 }
  0x85   : >> { %2226 = vmatpush3.bf16.msra.mxu1 %v2376_v59  ;;  %2199 = vmatprep.subr.bf16.mxu0 %v2412_v2 }
  0x86   : >> { %2227 = vmatprep.subr.bf16.mxu1 %v2412_v2  ;;  %2205 = vmatprep.mubr.msk.bf16.mxu0 %vm2413_vm0, %v2412_v2 }
  0x87   : >> { %2233 = vmatprep.mubr.msk.bf16.mxu1 %vm2413_vm0, %v2412_v2 }
  0x88   : >> { %2200 = vmatpush3.bf16.msra.mxu0 %v2377_v61 }
  0x89   : >> { %2228 = vmatpush3.bf16.msra.mxu1 %v2378_v62  ;;  %2201 = vmatprep.subr.bf16.mxu0 %v2412_v2 }
  0x8a   : >> { %2229 = vmatprep.subr.bf16.mxu1 %v2412_v2 }
  0x8c   : >> { %2202 = vmatpush3.bf16.msra.mxu0 %v2379_v3 }
  0x8d   : >> { %2230 = vmatpush3.bf16.msra.mxu1 %v2380_v4  ;;  %2203 = vmatprep.subr.bf16.mxu0 %v2412_v2 }
  0x8e   : >> { %2231 = vmatprep.subr.bf16.mxu1 %v2412_v2 }
  0x90   : >> { %2204 = vmatpush3.bf16.msra.mxu0 %v2381_v10 }
  0x91   : >> { %2232 = vmatpush3.bf16.msra.mxu1 %v2382_v11  ;;  %2245 = vmatprep.subr.bf16.mxu0 %v2412_v2 }
  0x92   : >> { %2273 = vmatprep.subr.bf16.mxu1 %v2412_v2 }
  0x93   : >> { %2206 = vmatmul.mubr.bf16.vlgmr.msra.gmra.mrb[36].mxu0 %v1830_v60 }
  0x94   : >> { %2234 = vmatmul.mubr.bf16.vlgmr.msra.gmra.mrb[36].mxu1 %v1259_v16  ;;  %2246 = vmatpush3.bf16.msra.mxu0 %v2385_v15 }
  0x95   : >> { %2281 = vmatpush3.bf16.msra.mxu1 %v2385_v15  ;;  %2247 = vmatprep.subr.bf16.mxu0 %v2412_v2 }
  0x96   : >> { %2274 = vmatprep.subr.bf16.mxu1 %v2412_v2  ;;  %2209 = vmatprep.mubr.msk.bf16.mxu0 %vm2413_vm0, %v2412_v2 }
  0x97   : >> { %2237 = vmatprep.mubr.msk.bf16.mxu1 %vm2413_vm0, %v2412_v2 }
  0x98   : >> { %2248 = vmatpush3.bf16.msra.mxu0 %v2386_v19 }
  0x99   : >> { %2282 = vmatpush3.bf16.msra.mxu1 %v2386_v19  ;;  %2249 = vmatprep.subr.bf16.mxu0 %v2412_v2 }
  0x9a   : >> { %2275 = vmatprep.subr.bf16.mxu1 %v2412_v2 }
  0x9b   : >> { %2210 = vmatmul.mubr.bf16.gmra.mrb[40].mxu0 %v2809_v63 }
  0x9c   : >> { %2250 = vmatpush3.bf16.msra.mxu0 %v2387_v22  ;;  %2238 = vmatmul.mubr.bf16.gmra.mrb[40].mxu1 %v1267_v23 }
  0x9d   : >> { %2283 = vmatpush3.bf16.msra.mxu1 %v2387_v22  ;;  %2251 = vmatprep.subr.bf16.mxu0 %v2412_v2 }
  0x9e   : >> { %2276 = vmatprep.subr.bf16.mxu1 %v2412_v2  ;;  %2213 = vmatprep.mubr.msk.bf16.mxu0 %vm2413_vm0, %v2412_v2 }
  0x9f   : >> { %2241 = vmatprep.mubr.msk.bf16.mxu1 %vm2413_vm0, %v2412_v2 }
  0xa0   : >> { %2252 = vmatpush3.bf16.msra.mxu0 %v2389_v24 }
  0xa1   : >> { %2284 = vmatpush3.bf16.msra.mxu1 %v2389_v24  ;;  %2253 = vmatprep.subr.bf16.mxu0 %v2412_v2 }
  0xa2   : >> { %2277 = vmatprep.subr.bf16.mxu1 %v2412_v2 }
  0xa3   : >> { %2214 = vmatmul.mubr.bf16.gmra.mrb[44].mxu0 %v1832_v14 }
  0xa4   : >> { %2254 = vmatpush3.bf16.msra.mxu0 %v2390_v26  ;;  %2242 = vmatmul.mubr.bf16.gmra.mrb[44].mxu1 %v1270_v27 }
  0xa5   : >> { %2285 = vmatpush3.bf16.msra.mxu1 %v2390_v26  ;;  %2255 = vmatprep.subr.bf16.mxu0 %v2412_v2 }
  0xa6   : >> { %2278 = vmatprep.subr.bf16.mxu1 %v2412_v2  ;;  %2261 = vmatprep.mubr.msk.bf16.mxu0 %vm2413_vm0, %v2412_v2 }
  0xa7   : >> { %2265 = vmatprep.mubr.msk.bf16.mxu1 %vm2413_vm0, %v2412_v2 }
  0xa8   : >> { %2256 = vmatpush3.bf16.msra.mxu0 %v2391_v28 }
  0xa9   : >> { %2286 = vmatpush3.bf16.msra.mxu1 %v2391_v28  ;;  %2257 = vmatprep.subr.bf16.mxu0 %v2412_v2 }
  0xaa   : >> { %2279 = vmatprep.subr.bf16.mxu1 %v2412_v2 }
  0xac   : >> { %2258 = vmatpush3.bf16.msra.mxu0 %v2392_v31 }
  0xad   : >> { %2287 = vmatpush3.bf16.msra.mxu1 %v2392_v31  ;;  %2259 = vmatprep.subr.bf16.mxu0 %v2412_v2 }
  0xae   : >> { %2280 = vmatprep.subr.bf16.mxu1 %v2412_v2 }
  0xb0   : >> { %2260 = vmatpush3.bf16.msra.mxu0 %v2393_v34 }
  0xb1   : >> { %2288 = vmatpush3.bf16.msra.mxu1 %v2393_v34 }
  0xb3   : >> { %2262 = vmatmul.mubr.bf16.vlgmr.msra.gmra.mrb[48].mxu0 %v1412_v38 }
  0xb4   : >> { %2266 = vmatmul.mubr.bf16.vlgmr.msra.gmra.mrb[48].mxu1 %v1414_v39 }
  0xb5   : >> { %2269 = vmatprep.mubr.msk.bf16.mxu1 %vm2413_vm0, %v2412_v2 }
  0xbc   : >> { %2270 = vmatmul.mubr.bf16.gmra.mrb[52].mxu1 %v1413_v37 }
 0x106   : >> { %v345_v40 = vpop.f32.mrb[0].mxu0 }
 0x107   : >> { %v453_v41 = vpop.f32.mrb[0].mxu1  ;;  %v2039_v42 = vpop.f32.mrb[1].mxu0 }
 0x108   : >> { %v454_v43 = vadd.f32 %v453_v41, %v345_v40  ;;  %v2067_v44 = vpop.f32.mrb[1].mxu1  ;;  %v348_v45 = vpop.f32.mrb[2].mxu0 }
 0x109   : >> { %v456_v46 = vpop.f32.mrb[2].mxu1  ;;  %v2040_v47 = vpop.f32.mrb[3].mxu0 }
 0x10a   : >> { %v457_v48 = vadd.f32 %v456_v46, %v348_v45  ;;  %v2068_v49 = vpop.f32.mrb[3].mxu1 }
 0x10e   : >> { %v353_v50 = vpop.f32.mrb[4].mxu0 }
 0x10f   : >> { %v461_v51 = vpop.f32.mrb[4].mxu1  ;;  %v2043_v52 = vpop.f32.mrb[5].mxu0 }
 0x110   : >> { %v462_v53 = vadd.f32 %v461_v51, %v353_v50  ;;  %v2071_v54 = vpop.f32.mrb[5].mxu1  ;;  %v356_v55 = vpop.f32.mrb[6].mxu0 }
 0x111   : >> { %v464_v56 = vpop.f32.mrb[6].mxu1  ;;  %v2044_v57 = vpop.f32.mrb[7].mxu0 }
 0x112   : >> { %v465_v2 = vadd.f32 %v464_v56, %v356_v55  ;;  %v2072_v58 = vpop.f32.mrb[7].mxu1 }
 0x116   : >> { %v361_v59 = vpop.f32.mrb[8].mxu0 }
 0x117   : >> { %v469_v60 = vpop.f32.mrb[8].mxu1  ;;  %v2047_v61 = vpop.f32.mrb[9].mxu0 }
 0x118   : >> { %v470_v62 = vadd.f32 %v469_v60, %v361_v59  ;;  %v2075_v63 = vpop.f32.mrb[9].mxu1  ;;  %v364_v1 = vpop.f32.mrb[10].mxu0 }
 0x119   : >> { %v472_v3 = vpop.f32.mrb[10].mxu1  ;;  %v2048_v4 = vpop.f32.mrb[11].mxu0 }
 0x11a   : >> { %v473_v5 = vadd.f32 %v472_v3, %v364_v1  ;;  %v2076_v6 = vpop.f32.mrb[11].mxu1 }
 0x126   : >> { %v592_v7 = vpop.f32.mrb[12].mxu0 }
 0x127   : >> { %v615_v8 = vadd.f32 %v592_v7, %v454_v43  ;;  %v748_v9 = vpop.f32.mrb[12].mxu1  ;;  %v2095_v10 = vpop.f32.mrb[13].mxu0 }
 0x128   : >> { %v2123_v11 = vpop.f32.mrb[13].mxu1  ;;  %v595_v12 = vpop.f32.mrb[14].mxu0 }
 0x129   : >> { %v771_v13 = vadd.f32 %v748_v9, %v615_v8  ;;  %v616_v14 = vadd.f32 %v595_v12, %v457_v48  ;;  %v751_v15 = vpop.f32.mrb[14].mxu1  ;;  %v2096_v16 = vpop.f32.mrb[15].mxu0 }
 0x12a   : >> { %v2124_v17 = vpop.f32.mrb[15].mxu1 }
 0x12b   : >> { %v772_v18 = vadd.f32 %v751_v15, %v616_v14 }
 0x12e   : >> { %v600_v19 = vpop.f32.mrb[16].mxu0 }
 0x12f   : >> { %v617_v20 = vadd.f32 %v600_v19, %v462_v53  ;;  %v2099_v21 = vpop.f32.mrb[17].mxu0  ;;  %v756_v22 = vpop.f32.mrb[16].mxu1 }
 0x130   : >> { %v603_v23 = vpop.f32.mrb[18].mxu0  ;;  %v2127_v24 = vpop.f32.mrb[17].mxu1 }
 0x131   : >> { %v618_v25 = vadd.f32 %v603_v23, %v465_v2  ;;  %v773_v26 = vadd.f32 %v756_v22, %v617_v20  ;;  %v759_v27 = vpop.f32.mrb[18].mxu1  ;;  %v2100_v28 = vpop.f32.mrb[19].mxu0 }
 0x132   : >> { %v2128_v29 = vpop.f32.mrb[19].mxu1 }
 0x133   : >> { %v774_v30 = vadd.f32 %v759_v27, %v618_v25 }
 0x136   : >> { %v608_v31 = vpop.f32.mrb[20].mxu0 }
 0x137   : >> { %v619_v32 = vadd.f32 %v608_v31, %v470_v62  ;;  %v2103_v33 = vpop.f32.mrb[21].mxu0  ;;  %v764_v34 = vpop.f32.mrb[20].mxu1 }
 0x138   : >> { %v611_v35 = vpop.f32.mrb[22].mxu0  ;;  %v2131_v36 = vpop.f32.mrb[21].mxu1 }
 0x139   : >> { %v620_v37 = vadd.f32 %v611_v35, %v473_v5  ;;  %v775_v38 = vadd.f32 %v764_v34, %v619_v32  ;;  %v767_v39 = vpop.f32.mrb[22].mxu1  ;;  %v2104_v40 = vpop.f32.mrb[23].mxu0 }
 0x13a   : >> { %v2132_v41 = vpop.f32.mrb[23].mxu1 }
 0x13b   : >> { %v776_v42 = vadd.f32 %v767_v39, %v620_v37 }
 0x146   : >> { %v902_v43 = vpop.f32.mrb[24].mxu0 }
 0x147   : >> { %v925_v44 = vadd.f32 %v902_v43, %v771_v13  ;;  %v1046_v45 = vpop.f32.mrb[24].mxu1  ;;  %v2151_v46 = vpop.f32.mrb[25].mxu0 }
 0x148   : >> { %v2179_v47 = vpop.f32.mrb[25].mxu1  ;;  %v905_v48 = vpop.f32.mrb[26].mxu0 }
 0x149   : >> { %v1069_v49 = vadd.f32 %v1046_v45, %v925_v44  ;;  %v926_v50 = vadd.f32 %v905_v48, %v772_v18  ;;  %v1049_v51 = vpop.f32.mrb[26].mxu1  ;;  %v2152_v52 = vpop.f32.mrb[27].mxu0 }
 0x14a   : >> { %v2180_v53 = vpop.f32.mrb[27].mxu1 }
 0x14b   : >> { %v1070_v54 = vadd.f32 %v1049_v51, %v926_v50 }
 0x14e   : >> { %v910_v55 = vpop.f32.mrb[28].mxu0 }
 0x14f   : >> { %v927_v56 = vadd.f32 %v910_v55, %v773_v26  ;;  %v2155_v57 = vpop.f32.mrb[29].mxu0  ;;  %v1054_v2 = vpop.f32.mrb[28].mxu1 }
 0x150   : >> { %v913_v58 = vpop.f32.mrb[30].mxu0  ;;  %v2183_v59 = vpop.f32.mrb[29].mxu1 }
 0x151   : >> { %v928_v60 = vadd.f32 %v913_v58, %v774_v30  ;;  %v1071_v61 = vadd.f32 %v1054_v2, %v927_v56  ;;  %v1057_v62 = vpop.f32.mrb[30].mxu1  ;;  %v2156_v63 = vpop.f32.mrb[31].mxu0 }
 0x152   : >> { %v2184_v1 = vpop.f32.mrb[31].mxu1 }
 0x153   : >> { %v1072_v3 = vadd.f32 %v1057_v62, %v928_v60 }
 0x156   : >> { %v918_v4 = vpop.f32.mrb[32].mxu0 }
 0x157   : >> { %v929_v5 = vadd.f32 %v918_v4, %v775_v38  ;;  %v2159_v6 = vpop.f32.mrb[33].mxu0  ;;  %v1062_v7 = vpop.f32.mrb[32].mxu1 }
 0x158   : >> { %v921_v8 = vpop.f32.mrb[34].mxu0  ;;  %v2187_v9 = vpop.f32.mrb[33].mxu1 }
 0x159   : >> { %v930_v10 = vadd.f32 %v921_v8, %v776_v42  ;;  %v1073_v11 = vadd.f32 %v1062_v7, %v929_v5  ;;  %v1065_v12 = vpop.f32.mrb[34].mxu1  ;;  %v2160_v13 = vpop.f32.mrb[35].mxu0 }
 0x15a   : >> { %v2188_v14 = vpop.f32.mrb[35].mxu1 }
 0x15b   : >> { %v1074_v15 = vadd.f32 %v1065_v12, %v930_v10 }
 0x166   : >> { %v1202_v16 = vpop.f32.mrb[36].mxu0 }
 0x167   : >> { %v1225_v17 = vadd.f32 %v1202_v16, %v1069_v49  ;;  %v1356_v18 = vpop.f32.mrb[36].mxu1  ;;  %v2207_v19 = vpop.f32.mrb[37].mxu0 }
 0x168   : >> { %v2235_v20 = vpop.f32.mrb[37].mxu1  ;;  %v1205_v21 = vpop.f32.mrb[38].mxu0 }
 0x169   : >> { %v1379_v22 = vadd.f32 %v1356_v18, %v1225_v17  ;;  %v1226_v23 = vadd.f32 %v1205_v21, %v1070_v54  ;;  %v1359_v24 = vpop.f32.mrb[38].mxu1  ;;  %v2208_v25 = vpop.f32.mrb[39].mxu0 }
 0x16a   : >> { %v2236_v26 = vpop.f32.mrb[39].mxu1 }
 0x16b   : >> { %v1380_v27 = vadd.f32 %v1359_v24, %v1226_v23 }
 0x16e   : >> { %v1210_v28 = vpop.f32.mrb[40].mxu0 }
 0x16f   : >> { %v1227_v29 = vadd.f32 %v1210_v28, %v1071_v61  ;;  %v2211_v30 = vpop.f32.mrb[41].mxu0  ;;  %v1364_v31 = vpop.f32.mrb[40].mxu1 }
 0x170   : >> { %v1213_v32 = vpop.f32.mrb[42].mxu0  ;;  %v2239_v33 = vpop.f32.mrb[41].mxu1 }
 0x171   : >> { %v1228_v34 = vadd.f32 %v1213_v32, %v1072_v3  ;;  %v1381_v35 = vadd.f32 %v1364_v31, %v1227_v29  ;;  %v1367_v36 = vpop.f32.mrb[42].mxu1  ;;  %v2212_v37 = vpop.f32.mrb[43].mxu0 }
 0x172   : >> { %v2240_v38 = vpop.f32.mrb[43].mxu1 }
 0x173   : >> { %v1382_v39 = vadd.f32 %v1367_v36, %v1228_v34 }
 0x176   : >> { %v1218_v40 = vpop.f32.mrb[44].mxu0 }
 0x177   : >> { %v1229_v41 = vadd.f32 %v1218_v40, %v1073_v11  ;;  %v2215_v42 = vpop.f32.mrb[45].mxu0  ;;  %v1372_v43 = vpop.f32.mrb[44].mxu1 }
 0x178   : >> { %v1221_v44 = vpop.f32.mrb[46].mxu0  ;;  %v2243_v45 = vpop.f32.mrb[45].mxu1 }
 0x179   : >> { %v1230_v46 = vadd.f32 %v1221_v44, %v1074_v15  ;;  %v1383_v47 = vadd.f32 %v1372_v43, %v1229_v41  ;;  %v1375_v48 = vpop.f32.mrb[46].mxu1  ;;  %v2216_v49 = vpop.f32.mrb[47].mxu0 }
 0x17a   : >> { %v2244_v50 = vpop.f32.mrb[47].mxu1 }
 0x17b   : >> { %v1384_v51 = vadd.f32 %v1375_v48, %v1230_v46 }
 0x186   : >> { %v1500_v52 = vpop.f32.mrb[48].mxu0 }
 0x187   : >> { %v1523_v53 = vadd.f32 %v1500_v52, %v1379_v22  ;;  %v1508_v54 = vpop.f32.mrb[48].mxu1  ;;  %v2263_v55 = vpop.f32.mrb[49].mxu0  ;;  %v1581_v22 = vld [vmem:[%s1572_s18 + $0x14] sm:$0x1] }
 0x188   : >> { %v1525_v56 = vadd.f32 %v1508_v54, %v1381_v35  ;;  %v2267_v57 = vpop.f32.mrb[49].mxu1  ;;  %v1503_v2 = vpop.f32.mrb[50].mxu0 }
 0x189   : >> { %v1535_v58 = vadd.f32 %v2445_v0, %v1523_v53  ;;  %v1524_v59 = vadd.f32 %v1503_v2, %v1380_v27  ;;  %v1511_v60 = vpop.f32.mrb[50].mxu1  ;;  %v2264_v61 = vpop.f32.mrb[51].mxu0 }
 0x18a   : >> { %v1537_v62 = vadd.f32 %v2445_v0, %v1525_v56  ;;  %v1526_v63 = vadd.f32 %v1511_v60, %v1382_v39  ;;  %v2268_v1 = vpop.f32.mrb[51].mxu1 }
 0x18b   : >> { %v1536_v3 = vadd.f32 %v2445_v0, %v1524_v59  ;;  %v1541_v5 = vmax.f32 %v1535_v58, 0.0 }
 0x18c   : >> { %v1538_v4 = vadd.f32 %v2445_v0, %v1526_v63  ;;  %v1543_v7 = vmax.f32 %v1537_v62, 0.0 }
 0x18d   : >> { %v1542_v6 = vmax.f32 %v1536_v3, 0.0 }
 0x18e   : >> { %v1544_v8 = vmax.f32 %v1538_v4, 0.0 }
 0x18f   : >> { %v1914_v9 = vpack.c.bf16 %v1542_v6, %v1541_v5  ;;  %v1516_v10 = vpop.f32.mrb[52].mxu1 }
 0x190   : >> { %v1919_v11 = vpack.c.bf16 %v1544_v8, %v1543_v7  ;;  %v1527_v12 = vadd.f32 %v1516_v10, %v1383_v47  ;;  %v2271_v13 = vpop.f32.mrb[53].mxu1 }
 0x191   : >> { %1915 = vst [vmem:[%s1572_s18] sm:$0xff] %v1914_v9   ;;  %v1519_v14 = vpop.f32.mrb[54].mxu1 }
 0x192   : >> { %1921 = vst [vmem:[%s1572_s18 + $0x8] sm:$0xff] %v1919_v11   ;;  %v1539_v15 = vadd.f32 %v2445_v0, %v1527_v12  ;;  %v1528_v16 = vadd.f32 %v1519_v14, %v1384_v51  ;;  %v2272_v17 = vpop.f32.mrb[55].mxu1 }
 0x194   : >> { %v1545_v18 = vmax.f32 %v1539_v15, 0.0  ;;  %v1540_v19 = vadd.f32 %v2445_v0, %v1528_v16 }
 0x195   : > { %177 = sbr.rel (!%p175_p4) target bundleno = 18 (0x12), region = 81 }
 0x196   : >> { %v1908_v20 = vpack.c.bf16 %v1545_v18, %v1545_v18  ;;  %v1546_v21 = vmax.f32 %v1540_v19, 0.0 }
 0x198   : >> { %1577 = vst [vmem:[%s1572_s18 + $0x10] sm:$0xf] %v1908_v20  ;;  %v1909_v23 = vpack.c.bf16 %v1546_v21, %v1546_v21 }
 0x19a   : >> { %v1582_v24 = vsel %vm1580_vm5, %v1909_v23, %v1581_v22 }
 0x19b   : >> { %1583 = vst [vmem:[%s1572_s18 + $0x14] sm:$0x1] %v1582_v24 }
 0x19c PF: > { %s13_s12 = sadd.s32 1, %s2406_s12  }
 0x19d   : > { %p10_p5 = scmp.ge.s32.totalorder %s13_s12, 4  }
 0x19f   :  { %12 = sbr.rel (!%p10_p5) target bundleno = 1 (0x1), region = 92 }

// kernel: deep_eigenspace_cnn_forward.5
= control target key start
LH: loop header
LB: loop body
LE: loop exit
PB: predicated region body
PF: predicated region fallthrough
CT: control target
= control target key end

     0   :  { %v550_v36 = vlaneseq  ;;  %v6334_v37 = vmov 1966171168   ;;  %s8320_s0 = inlined_call_operand.vmem [shape: bf16[2,2048], index: 0, kind: input, shape index: {}]   ;;  %s8321_s1 = inlined_call_operand.vmem [shape: bf16[2048,512], index: 1, kind: input, shape index: {}]   ;;  %s8322_s2 = inlined_call_operand.vmem [shape: f32[1,512], index: 2, kind: input, shape index: {}]   ;;  %s8323_s3 = inlined_call_operand.vmem [shape: bf16[512,256], index: 3, kind: input, shape index: {}]   ;;  %s8324_s4 = inlined_call_operand.vmem [shape: f32[1,256], index: 4, kind: input, shape index: {}]   ;;  %s8325_s5 = inlined_call_operand.vmem [shape: bf16[256,128], index: 5, kind: input, shape index: {}]   ;;  %s8326_s6 = inlined_call_operand.vmem [shape: f32[1,128], index: 6, kind: input, shape index: {}]   ;;  %s8327_s7 = inlined_call_operand.vmem [shape: bf16[128,128], index: 7, kind: input, shape index: {}]   ;;  %s8328_s8 = inlined_call_operand.vmem [shape: f32[1,128], index: 8, kind: input, shape index: {}]   ;;  %s8329_s9 = inlined_call_operand.hbm [shape: f32[2,128], index: 9, kind: output, shape index: {}]  }
   0x1   :  { %v5418_v0 = vld [vmem:[%s8321_s1 + $0x4] ss:$16 sps:$4 sm:$0xff]   ;;  %v5420_v1 = vld [vmem:[%s8321_s1 + $0xc] ss:$16 sps:$4 sm:$0xff]   ;;  %v5422_v2 = vld [vmem:[%s8321_s1] ss:$16 sps:$4 sm:$0xff]   ;;  %v574_v38 = vunpack.c.l.s4 %v6334_v37 }
   0x2   :  { %3246 = vmatprep.subr.bf16.mxu0 %v5418_v0  ;;  %v5423_v3 = vld [vmem:[%s8321_s1 + $0x8] ss:$16 sps:$4 sm:$0xff]   ;;  %3574 = vmatprep.subr.bf16.mxu1 %v5420_v1  ;;  %v5424_v4 = vld [vmem:[%s8321_s1 + $0x24] ss:$16 sps:$4 sm:$0xff]   ;;  %v5426_v5 = vld [vmem:[%s8321_s1 + $0x2c] ss:$16 sps:$4 sm:$0xff]  }
   0x3   :  { %3247 = vmatpush1.bf16.msra.mxu0 %v5422_v2  ;;  %3575 = vmatpush1.bf16.msra.mxu1 %v5423_v3  ;;  %v5428_v6 = vld [vmem:[%s8321_s1 + $0x20] ss:$16 sps:$4 sm:$0xff]   ;;  %v5429_v7 = vld [vmem:[%s8321_s1 + $0x28] ss:$16 sps:$4 sm:$0xff]   ;;  %v5430_v8 = vld [vmem:[%s8321_s1 + $0x44] ss:$16 sps:$4 sm:$0xff]   ;;  %v575_v43 = vunpack.c.0.s8 %v574_v38 }
   0x4   :  { %3248 = vmatprep.subr.bf16.mxu0 %v5424_v4  ;;  %3576 = vmatprep.subr.bf16.mxu1 %v5426_v5  ;;  %v5432_v9 = vld [vmem:[%s8321_s1 + $0x4c] ss:$16 sps:$4 sm:$0xff]   ;;  %v5434_v10 = vld [vmem:[%s8321_s1 + $0x40] ss:$16 sps:$4 sm:$0xff]   ;;  %v5435_v11 = vld [vmem:[%s8321_s1 + $0x48] ss:$16 sps:$4 sm:$0xff]  }
   0x5   :  { %v5436_v12 = vld [vmem:[%s8321_s1 + $0x64] ss:$16 sps:$4 sm:$0xff]   ;;  %v5438_v13 = vld [vmem:[%s8321_s1 + $0x6c] ss:$16 sps:$4 sm:$0xff]   ;;  %v5440_v14 = vld [vmem:[%s8321_s1 + $0x60] ss:$16 sps:$4 sm:$0xff]  }
   0x6   :  { %v5441_v15 = vld [vmem:[%s8321_s1 + $0x68] ss:$16 sps:$4 sm:$0xff]   ;;  %v5442_v16 = vld [vmem:[%s8321_s1 + $0x84] ss:$16 sps:$4 sm:$0xff]   ;;  %v5444_v17 = vld [vmem:[%s8321_s1 + $0x8c] ss:$16 sps:$4 sm:$0xff]  }
   0x7   :  { %3249 = vmatpush1.bf16.msra.mxu0 %v5428_v6  ;;  %3577 = vmatpush1.bf16.msra.mxu1 %v5429_v7  ;;  %v5446_v18 = vld [vmem:[%s8321_s1 + $0x80] ss:$16 sps:$4 sm:$0xff]   ;;  %v5447_v19 = vld [vmem:[%s8321_s1 + $0x88] ss:$16 sps:$4 sm:$0xff]   ;;  %v5448_v20 = vld [vmem:[%s8321_s1 + $0xa4] ss:$16 sps:$4 sm:$0xff]  }
   0x8   :  { %3250 = vmatprep.subr.bf16.mxu0 %v5430_v8  ;;  %3578 = vmatprep.subr.bf16.mxu1 %v5432_v9  ;;  %v5450_v21 = vld [vmem:[%s8321_s1 + $0xac] ss:$16 sps:$4 sm:$0xff]   ;;  %v5452_v22 = vld [vmem:[%s8321_s1 + $0xa0] ss:$16 sps:$4 sm:$0xff]   ;;  %v5453_v23 = vld [vmem:[%s8321_s1 + $0xa8] ss:$16 sps:$4 sm:$0xff]  }
   0x9   :  { %v5454_v24 = vld [vmem:[%s8321_s1 + $0xc4] ss:$16 sps:$4 sm:$0xff]   ;;  %v5456_v25 = vld [vmem:[%s8321_s1 + $0xcc] ss:$16 sps:$4 sm:$0xff]   ;;  %v5458_v26 = vld [vmem:[%s8321_s1 + $0xc0] ss:$16 sps:$4 sm:$0xff]  }
   0xa   :  { %v5459_v27 = vld [vmem:[%s8321_s1 + $0xc8] ss:$16 sps:$4 sm:$0xff]   ;;  %v5460_v28 = vld [vmem:[%s8321_s1 + $0xe4] ss:$16 sps:$4 sm:$0xff]   ;;  %v5462_v29 = vld [vmem:[%s8321_s1 + $0xec] ss:$16 sps:$4 sm:$0xff]  }
   0xb   :  { %3251 = vmatpush1.bf16.msra.mxu0 %v5434_v10  ;;  %3579 = vmatpush1.bf16.msra.mxu1 %v5435_v11  ;;  %v5464_v30 = vld [vmem:[%s8321_s1 + $0xe0] ss:$16 sps:$4 sm:$0xff]   ;;  %v5465_v31 = vld [vmem:[%s8321_s1 + $0xe8] ss:$16 sps:$4 sm:$0xff]   ;;  %v5466_v32 = vld [vmem:[%s8321_s1 + $0x104] ss:$16 sps:$4 sm:$0xff]  }
   0xc   :  { %3252 = vmatprep.subr.bf16.mxu0 %v5436_v12  ;;  %3580 = vmatprep.subr.bf16.mxu1 %v5438_v13  ;;  %v5468_v33 = vld [vmem:[%s8321_s1 + $0x10c] ss:$16 sps:$4 sm:$0xff]   ;;  %v5470_v34 = vld [vmem:[%s8321_s1 + $0x100] ss:$16 sps:$4 sm:$0xff]   ;;  %v5471_v35 = vld [vmem:[%s8321_s1 + $0x108] ss:$16 sps:$4 sm:$0xff]  }
   0xd   :  { %v5472_v39 = vld [vmem:[%s8321_s1 + $0x124] ss:$16 sps:$4 sm:$0xff]   ;;  %v5474_v40 = vld [vmem:[%s8321_s1 + $0x12c] ss:$16 sps:$4 sm:$0xff]   ;;  %v5476_v41 = vld [vmem:[%s8321_s1 + $0x120] ss:$16 sps:$4 sm:$0xff]  }
   0xe   :  { %v6505_v42 = vshrl.u32 %v550_v36, 7  ;;  %v5477_v44 = vld [vmem:[%s8321_s1 + $0x128] ss:$16 sps:$4 sm:$0xff]   ;;  %v5478_v45 = vld [vmem:[%s8321_s1 + $0x144] ss:$16 sps:$4 sm:$0xff]  }
   0xf   :  { %3253 = vmatpush1.bf16.msra.mxu0 %v5440_v14  ;;  %3581 = vmatpush1.bf16.msra.mxu1 %v5441_v15  ;;  %v5480_v46 = vld [vmem:[%s8321_s1 + $0x14c] ss:$16 sps:$4 sm:$0xff]   ;;  %v5482_v47 = vld [vmem:[%s8321_s1 + $0x140] ss:$16 sps:$4 sm:$0xff]   ;;  %v5483_v48 = vld [vmem:[%s8321_s1 + $0x148] ss:$16 sps:$4 sm:$0xff]  }
  0x10   :  { %3254 = vmatprep.subr.bf16.mxu0 %v5442_v16  ;;  %3582 = vmatprep.subr.bf16.mxu1 %v5444_v17  ;;  %v6523_v49 = vsub.s32 %v575_v43, %v6505_v42  ;;  %v5484_v50 = vld [vmem:[%s8321_s1 + $0x164] ss:$16 sps:$4 sm:$0xff]   ;;  %v5486_v51 = vld [vmem:[%s8321_s1 + $0x16c] ss:$16 sps:$4 sm:$0xff]   ;;  %v5488_v53 = vld [vmem:[%s8321_s1 + $0x160] ss:$16 sps:$4 sm:$0xff]  }
  0x11   :  { %v6534_v52 = vld [vmem:[%s8320_s0] sm:$0xff]  ;;  %v5489_v55 = vld [vmem:[%s8321_s1 + $0x168] ss:$16 sps:$4 sm:$0xff]   ;;  %v5492_v57 = vld [vmem:[%s8321_s1 + $0x18c] ss:$16 sps:$4 sm:$0xff]  }
  0x12   :  { %v579_v54 = vrot.slane %v6534_v52, %v6523_v49  ;;  %v5490_v56 = vld [vmem:[%s8321_s1 + $0x184] ss:$16 sps:$4 sm:$0xff]   ;;  %v5494_v59 = vld [vmem:[%s8321_s1 + $0x180] ss:$16 sps:$4 sm:$0xff]   ;;  %v5495_v61 = vld [vmem:[%s8321_s1 + $0x188] ss:$16 sps:$4 sm:$0xff]  }
  0x13   :  { %3255 = vmatpush1.bf16.msra.mxu0 %v5446_v18  ;;  %3583 = vmatpush1.bf16.msra.mxu1 %v5447_v19  ;;  %v5496_v62 = vld [vmem:[%s8321_s1 + $0x1a4] ss:$16 sps:$4 sm:$0xff]   ;;  %v5498_v63 = vld [vmem:[%s8321_s1 + $0x1ac] ss:$16 sps:$4 sm:$0xff]   ;;  %v5500_v0 = vld [vmem:[%s8321_s1 + $0x1a0] ss:$16 sps:$4 sm:$0xff]  }
  0x14   :  { %3256 = vmatprep.subr.bf16.mxu0 %v5448_v20  ;;  %3584 = vmatprep.subr.bf16.mxu1 %v5450_v21  ;;  %v587_v58 = vcombine.high %v579_v54, %v579_v54  ;;  %v5501_v1 = vld [vmem:[%s8321_s1 + $0x1a8] ss:$16 sps:$4 sm:$0xff]   ;;  %v5502_v2 = vld [vmem:[%s8321_s1 + $0x1c4] ss:$16 sps:$4 sm:$0xff]   ;;  %v5504_v3 = vld [vmem:[%s8321_s1 + $0x1cc] ss:$16 sps:$4 sm:$0xff]   ;;  %v6603_v13 = vrot.slane %v579_v54, %v6523_v49 }
  0x15   :  { %v5506_v4 = vld [vmem:[%s8321_s1 + $0x1c0] ss:$16 sps:$4 sm:$0xff]   ;;  %v5507_v5 = vld [vmem:[%s8321_s1 + $0x1c8] ss:$16 sps:$4 sm:$0xff]   ;;  %v5508_v6 = vld [vmem:[%s8321_s1 + $0x1e4] ss:$16 sps:$4 sm:$0xff]  }
  0x16   :  { %v609_v60 = vrot.slane %v587_v58, %v6523_v49  ;;  %v5510_v7 = vld [vmem:[%s8321_s1 + $0x1ec] ss:$16 sps:$4 sm:$0xff]   ;;  %v5512_v8 = vld [vmem:[%s8321_s1 + $0x1e0] ss:$16 sps:$4 sm:$0xff]   ;;  %v5513_v9 = vld [vmem:[%s8321_s1 + $0x1e8] ss:$16 sps:$4 sm:$0xff]  }
  0x17   :  { %3257 = vmatpush1.bf16.msra.mxu0 %v5452_v22  ;;  %3585 = vmatpush1.bf16.msra.mxu1 %v5453_v23  ;;  %v5516_v10 = vld [vmem:[%s8321_s1 + $0x204] ss:$16 sps:$4 sm:$0xff]   ;;  %v5519_v11 = vld [vmem:[%s8321_s1 + $0x20c] ss:$16 sps:$4 sm:$0xff]   ;;  %v5514_v12 = vld [vmem:[%s8321_s1 + $0x200] ss:$16 sps:$4 sm:$0xff]  }
  0x18   :  { %3258 = vmatprep.subr.bf16.mxu0 %v5454_v24  ;;  %3586 = vmatprep.subr.bf16.mxu1 %v5456_v25  ;;  %v5517_v14 = vld [vmem:[%s8321_s1 + $0x208] ss:$16 sps:$4 sm:$0xff]   ;;  %v5522_v15 = vld [vmem:[%s8321_s1 + $0x224] ss:$16 sps:$4 sm:$0xff]   ;;  %v5525_v16 = vld [vmem:[%s8321_s1 + $0x22c] ss:$16 sps:$4 sm:$0xff]   ;;  %v619_v17 = vcombine.high %v609_v60, %v609_v60 }
  0x19   :  { %3278 = vmatprep.mubr.bf16.mxu0 %v609_v60  ;;  %3606 = vmatprep.mubr.bf16.mxu1 %v609_v60  ;;  %v5520_v18 = vld [vmem:[%s8321_s1 + $0x220] ss:$16 sps:$4 sm:$0xff]   ;;  %v5523_v19 = vld [vmem:[%s8321_s1 + $0x228] ss:$16 sps:$4 sm:$0xff]   ;;  %v5528_v20 = vld [vmem:[%s8321_s1 + $0x244] ss:$16 sps:$4 sm:$0xff]  }
  0x1a   :  { %v5531_v21 = vld [vmem:[%s8321_s1 + $0x24c] ss:$16 sps:$4 sm:$0xff]   ;;  %v5526_v22 = vld [vmem:[%s8321_s1 + $0x240] ss:$16 sps:$4 sm:$0xff]   ;;  %v5529_v23 = vld [vmem:[%s8321_s1 + $0x248] ss:$16 sps:$4 sm:$0xff]  }
  0x1b   :  { %3259 = vmatpush1.bf16.msra.mxu0 %v5458_v26  ;;  %3587 = vmatpush1.bf16.msra.mxu1 %v5459_v27  ;;  %v5534_v24 = vld [vmem:[%s8321_s1 + $0x264] ss:$16 sps:$4 sm:$0xff]   ;;  %v5537_v25 = vld [vmem:[%s8321_s1 + $0x26c] ss:$16 sps:$4 sm:$0xff]   ;;  %v5532_v26 = vld [vmem:[%s8321_s1 + $0x260] ss:$16 sps:$4 sm:$0xff]  }
  0x1c   :  { %3260 = vmatprep.subr.bf16.mxu0 %v5460_v28  ;;  %3588 = vmatprep.subr.bf16.mxu1 %v5462_v29  ;;  %v5535_v27 = vld [vmem:[%s8321_s1 + $0x268] ss:$16 sps:$4 sm:$0xff]   ;;  %v5540_v28 = vld [vmem:[%s8321_s1 + $0x284] ss:$16 sps:$4 sm:$0xff]   ;;  %v5543_v29 = vld [vmem:[%s8321_s1 + $0x28c] ss:$16 sps:$4 sm:$0xff]  }
  0x1d   :  { %v5552_v36 = vld [vmem:[%s8321_s1 + $0x2c4] ss:$16 sps:$4 sm:$0xff]   ;;  %v5555_v37 = vld [vmem:[%s8321_s1 + $0x2cc] ss:$16 sps:$4 sm:$0xff]   ;;  %v5550_v38 = vld [vmem:[%s8321_s1 + $0x2c0] ss:$16 sps:$4 sm:$0xff]  }
  0x1e   :  { %v5556_v43 = vld [vmem:[%s8321_s1 + $0x2e0] ss:$16 sps:$4 sm:$0xff]   ;;  %v5571_v54 = vld [vmem:[%s8321_s1 + $0x328] ss:$16 sps:$4 sm:$0xff]   ;;  %v5585_v60 = vld [vmem:[%s8321_s1 + $0x36c] ss:$16 sps:$4 sm:$0xff]  }
  0x1f   :  { %3261 = vmatpush1.bf16.msra.mxu0 %v5464_v30  ;;  %3589 = vmatpush1.bf16.msra.mxu1 %v5465_v31  ;;  %v5538_v30 = vld [vmem:[%s8321_s1 + $0x280] ss:$16 sps:$4 sm:$0xff]   ;;  %v5541_v31 = vld [vmem:[%s8321_s1 + $0x288] ss:$16 sps:$4 sm:$0xff]  }
  0x20   :  { %3262 = vmatprep.subr.bf16.mxu0 %v5466_v32  ;;  %3590 = vmatprep.subr.bf16.mxu1 %v5468_v33  ;;  %v5546_v32 = vld [vmem:[%s8321_s1 + $0x2a4] ss:$16 sps:$4 sm:$0xff]   ;;  %v5549_v33 = vld [vmem:[%s8321_s1 + $0x2ac] ss:$16 sps:$4 sm:$0xff]   ;;  %v5577_v58 = vld [vmem:[%s8321_s1 + $0x348] ss:$16 sps:$4 sm:$0xff]  }
  0x23   :  { %3263 = vmatpush1.bf16.msra.mxu0 %v5470_v34  ;;  %3591 = vmatpush1.bf16.msra.mxu1 %v5471_v35  ;;  %v5544_v34 = vld [vmem:[%s8321_s1 + $0x2a0] ss:$16 sps:$4 sm:$0xff]   ;;  %v5547_v35 = vld [vmem:[%s8321_s1 + $0x2a8] ss:$16 sps:$4 sm:$0xff]  }
  0x24   :  { %3264 = vmatprep.subr.bf16.mxu0 %v5472_v39  ;;  %3592 = vmatprep.subr.bf16.mxu1 %v5474_v40  ;;  %v5553_v39 = vld [vmem:[%s8321_s1 + $0x2c8] ss:$16 sps:$4 sm:$0xff]   ;;  %v5558_v40 = vld [vmem:[%s8321_s1 + $0x2e4] ss:$16 sps:$4 sm:$0xff]  }
  0x27   :  { %3265 = vmatpush1.bf16.msra.mxu0 %v5476_v41  ;;  %3593 = vmatpush1.bf16.msra.mxu1 %v5477_v44  ;;  %v5561_v41 = vld [vmem:[%s8321_s1 + $0x2ec] ss:$16 sps:$4 sm:$0xff]   ;;  %v5559_v44 = vld [vmem:[%s8321_s1 + $0x2e8] ss:$16 sps:$4 sm:$0xff]  }
  0x28   :  { %3266 = vmatprep.subr.bf16.mxu0 %v5478_v45  ;;  %3594 = vmatprep.subr.bf16.mxu1 %v5480_v46  ;;  %v5564_v45 = vld [vmem:[%s8321_s1 + $0x304] ss:$16 sps:$4 sm:$0xff]   ;;  %v5567_v46 = vld [vmem:[%s8321_s1 + $0x30c] ss:$16 sps:$4 sm:$0xff]  }
  0x2b   :  { %3267 = vmatpush1.bf16.msra.mxu0 %v5482_v47  ;;  %3595 = vmatpush1.bf16.msra.mxu1 %v5483_v48  ;;  %v5562_v47 = vld [vmem:[%s8321_s1 + $0x300] ss:$16 sps:$4 sm:$0xff]   ;;  %v5565_v48 = vld [vmem:[%s8321_s1 + $0x308] ss:$16 sps:$4 sm:$0xff]  }
  0x2c   :  { %3268 = vmatprep.subr.bf16.mxu0 %v5484_v50  ;;  %3596 = vmatprep.subr.bf16.mxu1 %v5486_v51  ;;  %v5570_v50 = vld [vmem:[%s8321_s1 + $0x324] ss:$16 sps:$4 sm:$0xff]   ;;  %v5573_v51 = vld [vmem:[%s8321_s1 + $0x32c] ss:$16 sps:$4 sm:$0xff]  }
  0x2f   :  { %3269 = vmatpush1.bf16.msra.mxu0 %v5488_v53  ;;  %3597 = vmatpush1.bf16.msra.mxu1 %v5489_v55  ;;  %v5568_v53 = vld [vmem:[%s8321_s1 + $0x320] ss:$16 sps:$4 sm:$0xff]   ;;  %v5576_v55 = vld [vmem:[%s8321_s1 + $0x344] ss:$16 sps:$4 sm:$0xff]  }
  0x30   :  { %3270 = vmatprep.subr.bf16.mxu0 %v5490_v56  ;;  %3598 = vmatprep.subr.bf16.mxu1 %v5492_v57  ;;  %v5579_v56 = vld [vmem:[%s8321_s1 + $0x34c] ss:$16 sps:$4 sm:$0xff]   ;;  %v5574_v57 = vld [vmem:[%s8321_s1 + $0x340] ss:$16 sps:$4 sm:$0xff]  }
  0x33   :  { %3271 = vmatpush1.bf16.msra.mxu0 %v5494_v59  ;;  %3599 = vmatpush1.bf16.msra.mxu1 %v5495_v61  ;;  %v5582_v59 = vld [vmem:[%s8321_s1 + $0x364] ss:$16 sps:$4 sm:$0xff]   ;;  %v5580_v61 = vld [vmem:[%s8321_s1 + $0x360] ss:$16 sps:$4 sm:$0xff]  }
  0x34   :  { %3272 = vmatprep.subr.bf16.mxu0 %v5496_v62  ;;  %3600 = vmatprep.subr.bf16.mxu1 %v5498_v63  ;;  %v5583_v62 = vld [vmem:[%s8321_s1 + $0x368] ss:$16 sps:$4 sm:$0xff]   ;;  %v5588_v63 = vld [vmem:[%s8321_s1 + $0x384] ss:$16 sps:$4 sm:$0xff]  }
  0x37   :  { %3273 = vmatpush1.bf16.msra.mxu0 %v5500_v0  ;;  %3601 = vmatpush1.bf16.msra.mxu1 %v5501_v1  ;;  %v5591_v0 = vld [vmem:[%s8321_s1 + $0x38c] ss:$16 sps:$4 sm:$0xff]   ;;  %v5586_v1 = vld [vmem:[%s8321_s1 + $0x380] ss:$16 sps:$4 sm:$0xff]  }
  0x38   :  { %3274 = vmatprep.subr.bf16.mxu0 %v5502_v2  ;;  %3602 = vmatprep.subr.bf16.mxu1 %v5504_v3  ;;  %v5589_v2 = vld [vmem:[%s8321_s1 + $0x388] ss:$16 sps:$4 sm:$0xff]   ;;  %v5594_v3 = vld [vmem:[%s8321_s1 + $0x3a4] ss:$16 sps:$4 sm:$0xff]  }
  0x3b   :  { %3275 = vmatpush1.bf16.msra.mxu0 %v5506_v4  ;;  %3603 = vmatpush1.bf16.msra.mxu1 %v5507_v5  ;;  %v5597_v4 = vld [vmem:[%s8321_s1 + $0x3ac] ss:$16 sps:$4 sm:$0xff]   ;;  %v5592_v5 = vld [vmem:[%s8321_s1 + $0x3a0] ss:$16 sps:$4 sm:$0xff]  }
  0x3c   :  { %3276 = vmatprep.subr.bf16.mxu0 %v5508_v6  ;;  %3604 = vmatprep.subr.bf16.mxu1 %v5510_v7  ;;  %v5595_v6 = vld [vmem:[%s8321_s1 + $0x3a8] ss:$16 sps:$4 sm:$0xff]   ;;  %v5600_v7 = vld [vmem:[%s8321_s1 + $0x3c4] ss:$16 sps:$4 sm:$0xff]  }
  0x3f   :  { %3277 = vmatpush1.bf16.msra.mxu0 %v5512_v8  ;;  %3605 = vmatpush1.bf16.msra.mxu1 %v5513_v9  ;;  %v5603_v8 = vld [vmem:[%s8321_s1 + $0x3cc] ss:$16 sps:$4 sm:$0xff]   ;;  %v572_v9 = vcombine.high %v6534_v52, %v6534_v52 }
  0x40   :  { %3287 = vmatprep.subr.bf16.mxu0 %v5516_v10  ;;  %3615 = vmatprep.subr.bf16.mxu1 %v5519_v11  ;;  %v5598_v10 = vld [vmem:[%s8321_s1 + $0x3c0] ss:$16 sps:$4 sm:$0xff]   ;;  %v5601_v11 = vld [vmem:[%s8321_s1 + $0x3c8] ss:$16 sps:$4 sm:$0xff]   ;;  %v5609_v52 = vld [vmem:[%s8321_s1 + $0x3ec] ss:$16 sps:$4 sm:$0xff]  }
  0x42   :  { %3279 = vmatmul.mubr.bf16.vlgmr.msra.gmra.mrb[0].mxu0 %v6603_v13  ;;  %3607 = vmatmul.mubr.bf16.vlgmr.msra.gmra.mrb[0].mxu1 %v6603_v13 }
  0x43   :  { %3288 = vmatpush1.bf16.msra.mxu0 %v5514_v12  ;;  %3616 = vmatpush1.bf16.msra.mxu1 %v5517_v14  ;;  %v5606_v12 = vld [vmem:[%s8321_s1 + $0x3e4] ss:$16 sps:$4 sm:$0xff]   ;;  %v6787_v14 = vrot.slane %v572_v9, %v6523_v49  ;;  %v5685_v9 = vld [vmem:[%s8321_s1 + $0x588] ss:$16 sps:$4 sm:$0xff]  }
  0x44   :  { %3289 = vmatprep.subr.bf16.mxu0 %v5522_v15  ;;  %3617 = vmatprep.subr.bf16.mxu1 %v5525_v16  ;;  %v5604_v15 = vld [vmem:[%s8321_s1 + $0x3e0] ss:$16 sps:$4 sm:$0xff]   ;;  %v5607_v16 = vld [vmem:[%s8321_s1 + $0x3e8] ss:$16 sps:$4 sm:$0xff]  }
  0x45   :  { %3319 = vmatprep.mubr.bf16.mxu0 %v619_v17  ;;  %3647 = vmatprep.mubr.bf16.mxu1 %v619_v17  ;;  %v5612_v17 = vld [vmem:[%s8321_s1 + $0x404] ss:$16 sps:$4 sm:$0xff]  }
  0x47   :  { %3290 = vmatpush1.bf16.msra.mxu0 %v5520_v18  ;;  %3618 = vmatpush1.bf16.msra.mxu1 %v5523_v19  ;;  %v5615_v18 = vld [vmem:[%s8321_s1 + $0x40c] ss:$16 sps:$4 sm:$0xff]   ;;  %v588_v19 = vcombine.high %v6787_v14, %v6787_v14 }
  0x48   :  { %3291 = vmatprep.subr.bf16.mxu0 %v5528_v20  ;;  %3619 = vmatprep.subr.bf16.mxu1 %v5531_v21  ;;  %v5610_v20 = vld [vmem:[%s8321_s1 + $0x400] ss:$16 sps:$4 sm:$0xff]   ;;  %v617_v21 = vcombine.high %v6603_v13, %v6603_v13 }
  0x49   :  { %v5616_v13 = vld [vmem:[%s8321_s1 + $0x420] ss:$16 sps:$4 sm:$0xff]  }
  0x4b   :  { %3292 = vmatpush1.bf16.msra.mxu0 %v5526_v22  ;;  %3620 = vmatpush1.bf16.msra.mxu1 %v5529_v23  ;;  %v5613_v22 = vld [vmem:[%s8321_s1 + $0x408] ss:$16 sps:$4 sm:$0xff]   ;;  %v5618_v23 = vld [vmem:[%s8321_s1 + $0x424] ss:$16 sps:$4 sm:$0xff]  }
  0x4c   :  { %3293 = vmatprep.subr.bf16.mxu0 %v5534_v24  ;;  %3621 = vmatprep.subr.bf16.mxu1 %v5537_v25  ;;  %v5621_v24 = vld [vmem:[%s8321_s1 + $0x42c] ss:$16 sps:$4 sm:$0xff]   ;;  %v6818_v25 = vrot.slane %v588_v19, %v6523_v49  ;;  %v5702_v19 = vld [vmem:[%s8321_s1 + $0x5e4] ss:$16 sps:$4 sm:$0xff]  }
  0x4f   :  { %3294 = vmatpush1.bf16.msra.mxu0 %v5532_v26  ;;  %3622 = vmatpush1.bf16.msra.mxu1 %v5535_v27  ;;  %v5619_v26 = vld [vmem:[%s8321_s1 + $0x428] ss:$16 sps:$4 sm:$0xff]   ;;  %v5624_v27 = vld [vmem:[%s8321_s1 + $0x444] ss:$16 sps:$4 sm:$0xff]  }
  0x50   :  { %3295 = vmatprep.subr.bf16.mxu0 %v5540_v28  ;;  %3623 = vmatprep.subr.bf16.mxu1 %v5543_v29  ;;  %v5627_v28 = vld [vmem:[%s8321_s1 + $0x44c] ss:$16 sps:$4 sm:$0xff]   ;;  %v5622_v29 = vld [vmem:[%s8321_s1 + $0x440] ss:$16 sps:$4 sm:$0xff]  }
  0x53   :  { %3296 = vmatpush1.bf16.msra.mxu0 %v5538_v30  ;;  %3624 = vmatpush1.bf16.msra.mxu1 %v5541_v31  ;;  %v5625_v30 = vld [vmem:[%s8321_s1 + $0x448] ss:$16 sps:$4 sm:$0xff]   ;;  %v5630_v31 = vld [vmem:[%s8321_s1 + $0x464] ss:$16 sps:$4 sm:$0xff]  }
  0x54   :  { %3297 = vmatprep.subr.bf16.mxu0 %v5546_v32  ;;  %3625 = vmatprep.subr.bf16.mxu1 %v5549_v33  ;;  %v5633_v32 = vld [vmem:[%s8321_s1 + $0x46c] ss:$16 sps:$4 sm:$0xff]   ;;  %v5628_v33 = vld [vmem:[%s8321_s1 + $0x460] ss:$16 sps:$4 sm:$0xff]  }
  0x57   :  { %3298 = vmatpush1.bf16.msra.mxu0 %v5544_v34  ;;  %3626 = vmatpush1.bf16.msra.mxu1 %v5547_v35  ;;  %v5631_v34 = vld [vmem:[%s8321_s1 + $0x468] ss:$16 sps:$4 sm:$0xff]   ;;  %v5636_v35 = vld [vmem:[%s8321_s1 + $0x484] ss:$16 sps:$4 sm:$0xff]  }
  0x58   :  { %3299 = vmatprep.subr.bf16.mxu0 %v5552_v36  ;;  %3627 = vmatprep.subr.bf16.mxu1 %v5555_v37  ;;  %v5639_v36 = vld [vmem:[%s8321_s1 + $0x48c] ss:$16 sps:$4 sm:$0xff]   ;;  %v5634_v37 = vld [vmem:[%s8321_s1 + $0x480] ss:$16 sps:$4 sm:$0xff]  }
  0x5b   :  { %3300 = vmatpush1.bf16.msra.mxu0 %v5550_v38  ;;  %3628 = vmatpush1.bf16.msra.mxu1 %v5553_v39  ;;  %v5637_v38 = vld [vmem:[%s8321_s1 + $0x488] ss:$16 sps:$4 sm:$0xff]   ;;  %v5642_v39 = vld [vmem:[%s8321_s1 + $0x4a4] ss:$16 sps:$4 sm:$0xff]  }
  0x5c   :  { %3301 = vmatprep.subr.bf16.mxu0 %v5558_v40  ;;  %3629 = vmatprep.subr.bf16.mxu1 %v5561_v41  ;;  %v5645_v40 = vld [vmem:[%s8321_s1 + $0x4ac] ss:$16 sps:$4 sm:$0xff]   ;;  %v5640_v41 = vld [vmem:[%s8321_s1 + $0x4a0] ss:$16 sps:$4 sm:$0xff]  }
  0x5f   :  { %3302 = vmatpush1.bf16.msra.mxu0 %v5556_v43  ;;  %3630 = vmatpush1.bf16.msra.mxu1 %v5559_v44  ;;  %v5643_v43 = vld [vmem:[%s8321_s1 + $0x4a8] ss:$16 sps:$4 sm:$0xff]   ;;  %v5648_v44 = vld [vmem:[%s8321_s1 + $0x4c4] ss:$16 sps:$4 sm:$0xff]  }
  0x60   :  { %3303 = vmatprep.subr.bf16.mxu0 %v5564_v45  ;;  %3631 = vmatprep.subr.bf16.mxu1 %v5567_v46  ;;  %v5651_v45 = vld [vmem:[%s8321_s1 + $0x4cc] ss:$16 sps:$4 sm:$0xff]   ;;  %v5646_v46 = vld [vmem:[%s8321_s1 + $0x4c0] ss:$16 sps:$4 sm:$0xff]  }
  0x63   :  { %3304 = vmatpush1.bf16.msra.mxu0 %v5562_v47  ;;  %3632 = vmatpush1.bf16.msra.mxu1 %v5565_v48  ;;  %v5649_v47 = vld [vmem:[%s8321_s1 + $0x4c8] ss:$16 sps:$4 sm:$0xff]   ;;  %v5654_v48 = vld [vmem:[%s8321_s1 + $0x4e4] ss:$16 sps:$4 sm:$0xff]  }
  0x64   :  { %3305 = vmatprep.subr.bf16.mxu0 %v5570_v50  ;;  %3633 = vmatprep.subr.bf16.mxu1 %v5573_v51  ;;  %v5657_v50 = vld [vmem:[%s8321_s1 + $0x4ec] ss:$16 sps:$4 sm:$0xff]   ;;  %v5652_v51 = vld [vmem:[%s8321_s1 + $0x4e0] ss:$16 sps:$4 sm:$0xff]  }
  0x67   :  { %3306 = vmatpush1.bf16.msra.mxu0 %v5568_v53  ;;  %3634 = vmatpush1.bf16.msra.mxu1 %v5571_v54  ;;  %v5655_v53 = vld [vmem:[%s8321_s1 + $0x4e8] ss:$16 sps:$4 sm:$0xff]   ;;  %v5660_v54 = vld [vmem:[%s8321_s1 + $0x504] ss:$16 sps:$4 sm:$0xff]  }
  0x68   :  { %3307 = vmatprep.subr.bf16.mxu0 %v5576_v55  ;;  %3635 = vmatprep.subr.bf16.mxu1 %v5579_v56  ;;  %v5663_v55 = vld [vmem:[%s8321_s1 + $0x50c] ss:$16 sps:$4 sm:$0xff]   ;;  %v5658_v56 = vld [vmem:[%s8321_s1 + $0x500] ss:$16 sps:$4 sm:$0xff]  }
  0x6b   :  { %3308 = vmatpush1.bf16.msra.mxu0 %v5574_v57  ;;  %3636 = vmatpush1.bf16.msra.mxu1 %v5577_v58  ;;  %v5661_v57 = vld [vmem:[%s8321_s1 + $0x508] ss:$16 sps:$4 sm:$0xff]   ;;  %v5666_v58 = vld [vmem:[%s8321_s1 + $0x524] ss:$16 sps:$4 sm:$0xff]  }
  0x6c   :  { %3309 = vmatprep.subr.bf16.mxu0 %v5582_v59  ;;  %3637 = vmatprep.subr.bf16.mxu1 %v5585_v60  ;;  %v5669_v59 = vld [vmem:[%s8321_s1 + $0x52c] ss:$16 sps:$4 sm:$0xff]   ;;  %v5664_v60 = vld [vmem:[%s8321_s1 + $0x520] ss:$16 sps:$4 sm:$0xff]  }
  0x6f   :  { %3310 = vmatpush1.bf16.msra.mxu0 %v5580_v61  ;;  %3638 = vmatpush1.bf16.msra.mxu1 %v5583_v62  ;;  %v5667_v61 = vld [vmem:[%s8321_s1 + $0x528] ss:$16 sps:$4 sm:$0xff]   ;;  %v5672_v62 = vld [vmem:[%s8321_s1 + $0x544] ss:$16 sps:$4 sm:$0xff]  }
  0x70   :  { %3311 = vmatprep.subr.bf16.mxu0 %v5588_v63  ;;  %3639 = vmatprep.subr.bf16.mxu1 %v5591_v0  ;;  %v5675_v63 = vld [vmem:[%s8321_s1 + $0x54c] ss:$16 sps:$4 sm:$0xff]   ;;  %v5670_v0 = vld [vmem:[%s8321_s1 + $0x540] ss:$16 sps:$4 sm:$0xff]  }
  0x73   :  { %3312 = vmatpush1.bf16.msra.mxu0 %v5586_v1  ;;  %3640 = vmatpush1.bf16.msra.mxu1 %v5589_v2  ;;  %v5673_v1 = vld [vmem:[%s8321_s1 + $0x548] ss:$16 sps:$4 sm:$0xff]   ;;  %v5678_v2 = vld [vmem:[%s8321_s1 + $0x564] ss:$16 sps:$4 sm:$0xff]  }
  0x74   :  { %3313 = vmatprep.subr.bf16.mxu0 %v5594_v3  ;;  %3641 = vmatprep.subr.bf16.mxu1 %v5597_v4  ;;  %v5681_v3 = vld [vmem:[%s8321_s1 + $0x56c] ss:$16 sps:$4 sm:$0xff]   ;;  %v5676_v4 = vld [vmem:[%s8321_s1 + $0x560] ss:$16 sps:$4 sm:$0xff]  }
  0x77   :  { %3314 = vmatpush1.bf16.msra.mxu0 %v5592_v5  ;;  %3642 = vmatpush1.bf16.msra.mxu1 %v5595_v6  ;;  %v5679_v5 = vld [vmem:[%s8321_s1 + $0x568] ss:$16 sps:$4 sm:$0xff]   ;;  %v5684_v6 = vld [vmem:[%s8321_s1 + $0x584] ss:$16 sps:$4 sm:$0xff]  }
  0x78   :  { %3315 = vmatprep.subr.bf16.mxu0 %v5600_v7  ;;  %3643 = vmatprep.subr.bf16.mxu1 %v5603_v8  ;;  %v5687_v7 = vld [vmem:[%s8321_s1 + $0x58c] ss:$16 sps:$4 sm:$0xff]   ;;  %v5682_v8 = vld [vmem:[%s8321_s1 + $0x580] ss:$16 sps:$4 sm:$0xff]  }
  0x7b   :  { %3316 = vmatpush1.bf16.msra.mxu0 %v5598_v10  ;;  %3644 = vmatpush1.bf16.msra.mxu1 %v5601_v11  ;;  %v5690_v10 = vld [vmem:[%s8321_s1 + $0x5a4] ss:$16 sps:$4 sm:$0xff]   ;;  %v5693_v11 = vld [vmem:[%s8321_s1 + $0x5ac] ss:$16 sps:$4 sm:$0xff]  }
  0x7c   :  { %3317 = vmatprep.subr.bf16.mxu0 %v5606_v12  ;;  %3645 = vmatprep.subr.bf16.mxu1 %v5609_v52  ;;  %v5688_v12 = vld [vmem:[%s8321_s1 + $0x5a0] ss:$16 sps:$4 sm:$0xff]   ;;  %v5691_v52 = vld [vmem:[%s8321_s1 + $0x5a8] ss:$16 sps:$4 sm:$0xff]  }
  0x7f   :  { %3318 = vmatpush1.bf16.msra.mxu0 %v5604_v15  ;;  %3646 = vmatpush1.bf16.msra.mxu1 %v5607_v16  ;;  %v5696_v15 = vld [vmem:[%s8321_s1 + $0x5c4] ss:$16 sps:$4 sm:$0xff]   ;;  %v5699_v16 = vld [vmem:[%s8321_s1 + $0x5cc] ss:$16 sps:$4 sm:$0xff]  }
  0x80   :  { %3328 = vmatprep.subr.bf16.mxu0 %v5612_v17  ;;  %3656 = vmatprep.subr.bf16.mxu1 %v5615_v18  ;;  %v5694_v17 = vld [vmem:[%s8321_s1 + $0x5c0] ss:$16 sps:$4 sm:$0xff]   ;;  %v5697_v18 = vld [vmem:[%s8321_s1 + $0x5c8] ss:$16 sps:$4 sm:$0xff]  }
  0x82   :  { %3320 = vmatmul.mubr.bf16.vlgmr.msra.gmra.mrb[0].mxu0 %v617_v21  ;;  %3648 = vmatmul.mubr.bf16.vlgmr.msra.gmra.mrb[0].mxu1 %v617_v21  ;;  %v5700_v21 = vld [vmem:[%s8321_s1 + $0x5e0] ss:$16 sps:$4 sm:$0xff]  }
  0x83   :  { %3329 = vmatpush1.bf16.msra.mxu0 %v5610_v20  ;;  %3657 = vmatpush1.bf16.msra.mxu1 %v5613_v22  ;;  %v5705_v20 = vld [vmem:[%s8321_s1 + $0x5ec] ss:$16 sps:$4 sm:$0xff]   ;;  %v5703_v22 = vld [vmem:[%s8321_s1 + $0x5e8] ss:$16 sps:$4 sm:$0xff]  }
  0x84   :  { %3330 = vmatprep.subr.bf16.mxu0 %v5618_v23  ;;  %3658 = vmatprep.subr.bf16.mxu1 %v5621_v24  ;;  %v5709_v23 = vld [vmem:[%s8321_s1 + $0x604] ss:$16 sps:$4 sm:$0xff]   ;;  %v5712_v24 = vld [vmem:[%s8321_s1 + $0x60c] ss:$16 sps:$4 sm:$0xff]  }
  0x85   :  { %3360 = vmatprep.mubr.bf16.mxu0 %v6818_v25  ;;  %3688 = vmatprep.mubr.bf16.mxu1 %v6818_v25 }
  0x87   :  { %3331 = vmatpush1.bf16.msra.mxu0 %v5616_v13  ;;  %3659 = vmatpush1.bf16.msra.mxu1 %v5619_v26  ;;  %v5707_v13 = vld [vmem:[%s8321_s1 + $0x600] ss:$16 sps:$4 sm:$0xff]   ;;  %v7007_v26 = vrot.slane %v6787_v14, %v6523_v49  ;;  %v620_v14 = vcombine.high %v6818_v25, %v6818_v25  ;;  %v5721_v25 = vld [vmem:[%s8321_s1 + $0x644] ss:$16 sps:$4 sm:$0xff]  }
  0x88   :  { %3332 = vmatprep.subr.bf16.mxu0 %v5624_v27  ;;  %3660 = vmatprep.subr.bf16.mxu1 %v5627_v28  ;;  %v5710_v27 = vld [vmem:[%s8321_s1 + $0x608] ss:$16 sps:$4 sm:$0xff]   ;;  %v5715_v28 = vld [vmem:[%s8321_s1 + $0x624] ss:$16 sps:$4 sm:$0xff]  }
  0x8b   :  { %3333 = vmatpush1.bf16.msra.mxu0 %v5622_v29  ;;  %3661 = vmatpush1.bf16.msra.mxu1 %v5625_v30  ;;  %v5718_v29 = vld [vmem:[%s8321_s1 + $0x62c] ss:$16 sps:$4 sm:$0xff]   ;;  %v5713_v30 = vld [vmem:[%s8321_s1 + $0x620] ss:$16 sps:$4 sm:$0xff]  }
  0x8c   :  { %3334 = vmatprep.subr.bf16.mxu0 %v5630_v31  ;;  %3662 = vmatprep.subr.bf16.mxu1 %v5633_v32  ;;  %v5716_v31 = vld [vmem:[%s8321_s1 + $0x628] ss:$16 sps:$4 sm:$0xff]   ;;  %v5724_v32 = vld [vmem:[%s8321_s1 + $0x64c] ss:$16 sps:$4 sm:$0xff]  }
  0x8f   :  { %3335 = vmatpush1.bf16.msra.mxu0 %v5628_v33  ;;  %3663 = vmatpush1.bf16.msra.mxu1 %v5631_v34  ;;  %v5719_v33 = vld [vmem:[%s8321_s1 + $0x640] ss:$16 sps:$4 sm:$0xff]   ;;  %v5722_v34 = vld [vmem:[%s8321_s1 + $0x648] ss:$16 sps:$4 sm:$0xff]  }
  0x90   :  { %3336 = vmatprep.subr.bf16.mxu0 %v5636_v35  ;;  %3664 = vmatprep.subr.bf16.mxu1 %v5639_v36  ;;  %v5727_v35 = vld [vmem:[%s8321_s1 + $0x664] ss:$16 sps:$4 sm:$0xff]   ;;  %v5730_v36 = vld [vmem:[%s8321_s1 + $0x66c] ss:$16 sps:$4 sm:$0xff]  }
  0x93   :  { %3337 = vmatpush1.bf16.msra.mxu0 %v5634_v37  ;;  %3665 = vmatpush1.bf16.msra.mxu1 %v5637_v38  ;;  %v5725_v37 = vld [vmem:[%s8321_s1 + $0x660] ss:$16 sps:$4 sm:$0xff]   ;;  %v5728_v38 = vld [vmem:[%s8321_s1 + $0x668] ss:$16 sps:$4 sm:$0xff]  }
  0x94   :  { %3338 = vmatprep.subr.bf16.mxu0 %v5642_v39  ;;  %3666 = vmatprep.subr.bf16.mxu1 %v5645_v40  ;;  %v5733_v39 = vld [vmem:[%s8321_s1 + $0x684] ss:$16 sps:$4 sm:$0xff]   ;;  %v5736_v40 = vld [vmem:[%s8321_s1 + $0x68c] ss:$16 sps:$4 sm:$0xff]  }
  0x97   :  { %3339 = vmatpush1.bf16.msra.mxu0 %v5640_v41  ;;  %3667 = vmatpush1.bf16.msra.mxu1 %v5643_v43  ;;  %v5731_v41 = vld [vmem:[%s8321_s1 + $0x680] ss:$16 sps:$4 sm:$0xff]   ;;  %v5734_v43 = vld [vmem:[%s8321_s1 + $0x688] ss:$16 sps:$4 sm:$0xff]  }
  0x98   :  { %3340 = vmatprep.subr.bf16.mxu0 %v5648_v44  ;;  %3668 = vmatprep.subr.bf16.mxu1 %v5651_v45  ;;  %v5739_v44 = vld [vmem:[%s8321_s1 + $0x6a4] ss:$16 sps:$4 sm:$0xff]   ;;  %v5742_v45 = vld [vmem:[%s8321_s1 + $0x6ac] ss:$16 sps:$4 sm:$0xff]  }
  0x9b   :  { %3341 = vmatpush1.bf16.msra.mxu0 %v5646_v46  ;;  %3669 = vmatpush1.bf16.msra.mxu1 %v5649_v47  ;;  %v5737_v46 = vld [vmem:[%s8321_s1 + $0x6a0] ss:$16 sps:$4 sm:$0xff]   ;;  %v5740_v47 = vld [vmem:[%s8321_s1 + $0x6a8] ss:$16 sps:$4 sm:$0xff]  }
  0x9c   :  { %3342 = vmatprep.subr.bf16.mxu0 %v5654_v48  ;;  %3670 = vmatprep.subr.bf16.mxu1 %v5657_v50  ;;  %v5745_v48 = vld [vmem:[%s8321_s1 + $0x6c4] ss:$16 sps:$4 sm:$0xff]   ;;  %v5748_v50 = vld [vmem:[%s8321_s1 + $0x6cc] ss:$16 sps:$4 sm:$0xff]  }
  0x9f   :  { %3343 = vmatpush1.bf16.msra.mxu0 %v5652_v51  ;;  %3671 = vmatpush1.bf16.msra.mxu1 %v5655_v53  ;;  %v5743_v51 = vld [vmem:[%s8321_s1 + $0x6c0] ss:$16 sps:$4 sm:$0xff]   ;;  %v5746_v53 = vld [vmem:[%s8321_s1 + $0x6c8] ss:$16 sps:$4 sm:$0xff]  }
  0xa0   :  { %3344 = vmatprep.subr.bf16.mxu0 %v5660_v54  ;;  %3672 = vmatprep.subr.bf16.mxu1 %v5663_v55  ;;  %v5751_v54 = vld [vmem:[%s8321_s1 + $0x6e4] ss:$16 sps:$4 sm:$0xff]   ;;  %v5754_v55 = vld [vmem:[%s8321_s1 + $0x6ec] ss:$16 sps:$4 sm:$0xff]  }
  0xa3   :  { %3345 = vmatpush1.bf16.msra.mxu0 %v5658_v56  ;;  %3673 = vmatpush1.bf16.msra.mxu1 %v5661_v57  ;;  %v5749_v56 = vld [vmem:[%s8321_s1 + $0x6e0] ss:$16 sps:$4 sm:$0xff]   ;;  %v5752_v57 = vld [vmem:[%s8321_s1 + $0x6e8] ss:$16 sps:$4 sm:$0xff]  }
  0xa4   :  { %3346 = vmatprep.subr.bf16.mxu0 %v5666_v58  ;;  %3674 = vmatprep.subr.bf16.mxu1 %v5669_v59  ;;  %v5757_v58 = vld [vmem:[%s8321_s1 + $0x704] ss:$16 sps:$4 sm:$0xff]   ;;  %v5760_v59 = vld [vmem:[%s8321_s1 + $0x70c] ss:$16 sps:$4 sm:$0xff]  }
  0xa7   :  { %3347 = vmatpush1.bf16.msra.mxu0 %v5664_v60  ;;  %3675 = vmatpush1.bf16.msra.mxu1 %v5667_v61  ;;  %v5755_v60 = vld [vmem:[%s8321_s1 + $0x700] ss:$16 sps:$4 sm:$0xff]   ;;  %v5758_v61 = vld [vmem:[%s8321_s1 + $0x708] ss:$16 sps:$4 sm:$0xff]  }
  0xa8   :  { %3348 = vmatprep.subr.bf16.mxu0 %v5672_v62  ;;  %3676 = vmatprep.subr.bf16.mxu1 %v5675_v63  ;;  %v5763_v62 = vld [vmem:[%s8321_s1 + $0x724] ss:$16 sps:$4 sm:$0xff]   ;;  %v5766_v63 = vld [vmem:[%s8321_s1 + $0x72c] ss:$16 sps:$4 sm:$0xff]  }
  0xab   :  { %3349 = vmatpush1.bf16.msra.mxu0 %v5670_v0  ;;  %3677 = vmatpush1.bf16.msra.mxu1 %v5673_v1  ;;  %v5761_v0 = vld [vmem:[%s8321_s1 + $0x720] ss:$16 sps:$4 sm:$0xff]   ;;  %v5764_v1 = vld [vmem:[%s8321_s1 + $0x728] ss:$16 sps:$4 sm:$0xff]  }
  0xac   :  { %3350 = vmatprep.subr.bf16.mxu0 %v5678_v2  ;;  %3678 = vmatprep.subr.bf16.mxu1 %v5681_v3  ;;  %v5769_v2 = vld [vmem:[%s8321_s1 + $0x744] ss:$16 sps:$4 sm:$0xff]   ;;  %v5772_v3 = vld [vmem:[%s8321_s1 + $0x74c] ss:$16 sps:$4 sm:$0xff]  }
  0xaf   :  { %3351 = vmatpush1.bf16.msra.mxu0 %v5676_v4  ;;  %3679 = vmatpush1.bf16.msra.mxu1 %v5679_v5  ;;  %v5767_v4 = vld [vmem:[%s8321_s1 + $0x740] ss:$16 sps:$4 sm:$0xff]   ;;  %v5770_v5 = vld [vmem:[%s8321_s1 + $0x748] ss:$16 sps:$4 sm:$0xff]  }
  0xb0   :  { %3352 = vmatprep.subr.bf16.mxu0 %v5684_v6  ;;  %3680 = vmatprep.subr.bf16.mxu1 %v5687_v7  ;;  %v5775_v6 = vld [vmem:[%s8321_s1 + $0x764] ss:$16 sps:$4 sm:$0xff]   ;;  %v5778_v7 = vld [vmem:[%s8321_s1 + $0x76c] ss:$16 sps:$4 sm:$0xff]  }
  0xb3   :  { %3353 = vmatpush1.bf16.msra.mxu0 %v5682_v8  ;;  %3681 = vmatpush1.bf16.msra.mxu1 %v5685_v9  ;;  %v5773_v8 = vld [vmem:[%s8321_s1 + $0x760] ss:$16 sps:$4 sm:$0xff]   ;;  %v5776_v9 = vld [vmem:[%s8321_s1 + $0x768] ss:$16 sps:$4 sm:$0xff]  }
  0xb4   :  { %3354 = vmatprep.subr.bf16.mxu0 %v5690_v10  ;;  %3682 = vmatprep.subr.bf16.mxu1 %v5693_v11  ;;  %v5781_v10 = vld [vmem:[%s8321_s1 + $0x784] ss:$16 sps:$4 sm:$0xff]   ;;  %v5784_v11 = vld [vmem:[%s8321_s1 + $0x78c] ss:$16 sps:$4 sm:$0xff]  }
  0xb7   :  { %3355 = vmatpush1.bf16.msra.mxu0 %v5688_v12  ;;  %3683 = vmatpush1.bf16.msra.mxu1 %v5691_v52  ;;  %v5779_v12 = vld [vmem:[%s8321_s1 + $0x780] ss:$16 sps:$4 sm:$0xff]   ;;  %v5782_v52 = vld [vmem:[%s8321_s1 + $0x788] ss:$16 sps:$4 sm:$0xff]  }
  0xb8   :  { %3356 = vmatprep.subr.bf16.mxu0 %v5696_v15  ;;  %3684 = vmatprep.subr.bf16.mxu1 %v5699_v16  ;;  %v5787_v15 = vld [vmem:[%s8321_s1 + $0x7a4] ss:$16 sps:$4 sm:$0xff]   ;;  %v5790_v16 = vld [vmem:[%s8321_s1 + $0x7ac] ss:$16 sps:$4 sm:$0xff]  }
  0xbb   :  { %3357 = vmatpush1.bf16.msra.mxu0 %v5694_v17  ;;  %3685 = vmatpush1.bf16.msra.mxu1 %v5697_v18  ;;  %v5785_v17 = vld [vmem:[%s8321_s1 + $0x7a0] ss:$16 sps:$4 sm:$0xff]   ;;  %v5788_v18 = vld [vmem:[%s8321_s1 + $0x7a8] ss:$16 sps:$4 sm:$0xff]  }
  0xbc   :  { %3358 = vmatprep.subr.bf16.mxu0 %v5702_v19  ;;  %3686 = vmatprep.subr.bf16.mxu1 %v5705_v20  ;;  %v5793_v19 = vld [vmem:[%s8321_s1 + $0x7c4] ss:$16 sps:$4 sm:$0xff]   ;;  %v5796_v20 = vld [vmem:[%s8321_s1 + $0x7cc] ss:$16 sps:$4 sm:$0xff]  }
  0xbf   :  { %3359 = vmatpush1.bf16.msra.mxu0 %v5700_v21  ;;  %3687 = vmatpush1.bf16.msra.mxu1 %v5703_v22  ;;  %v7181_v21 = vld.sshfl [vmem:[%s8320_s0 + $0x8] sm:$0xff pattern:$0x75316420]  ;;  %v5791_v22 = vld [vmem:[%s8321_s1 + $0x7c0] ss:$16 sps:$4 sm:$0xff]  }
  0xc0   :  { %3369 = vmatprep.subr.bf16.mxu0 %v5709_v23  ;;  %3697 = vmatprep.subr.bf16.mxu1 %v5712_v24  ;;  %v5794_v23 = vld [vmem:[%s8321_s1 + $0x7c8] ss:$16 sps:$4 sm:$0xff]   ;;  %v5799_v24 = vld [vmem:[%s8321_s1 + $0x7e4] ss:$16 sps:$4 sm:$0xff]  }
  0xc2   :  { %3361 = vmatmul.mubr.bf16.vlgmr.msra.gmra.mrb[0].mxu0 %v7007_v26  ;;  %3689 = vmatmul.mubr.bf16.vlgmr.msra.gmra.mrb[0].mxu1 %v7007_v26 }
  0xc3   :  { %3370 = vmatpush1.bf16.msra.mxu0 %v5707_v13  ;;  %3698 = vmatpush1.bf16.msra.mxu1 %v5710_v27  ;;  %v5802_v13 = vld [vmem:[%s8321_s1 + $0x7ec] ss:$16 sps:$4 sm:$0xff]   ;;  %v5797_v27 = vld [vmem:[%s8321_s1 + $0x7e0] ss:$16 sps:$4 sm:$0xff]  }
  0xc4   :  { %3371 = vmatprep.subr.bf16.mxu0 %v5715_v28  ;;  %3699 = vmatprep.subr.bf16.mxu1 %v5718_v29  ;;  %v5800_v28 = vld [vmem:[%s8321_s1 + $0x7e8] ss:$16 sps:$4 sm:$0xff]   ;;  %v5805_v29 = vld [vmem:[%s8321_s1 + $0x804] ss:$16 sps:$4 sm:$0xff]  }
  0xc5   :  { %3401 = vmatprep.mubr.bf16.mxu0 %v620_v14  ;;  %3729 = vmatprep.mubr.bf16.mxu1 %v620_v14  ;;  %v5808_v14 = vld [vmem:[%s8321_s1 + $0x80c] ss:$16 sps:$4 sm:$0xff]  }
  0xc7   :  { %3372 = vmatpush1.bf16.msra.mxu0 %v5713_v30  ;;  %3700 = vmatpush1.bf16.msra.mxu1 %v5716_v31  ;;  %v636_v30 = vcombine.high %v7181_v21, %v7181_v21  ;;  %v618_v31 = vcombine.high %v7007_v26, %v7007_v26  ;;  %v5814_v26 = vld [vmem:[%s8321_s1 + $0x82c] ss:$16 sps:$4 sm:$0xff]  }
  0xc8   :  { %3373 = vmatprep.subr.bf16.mxu0 %v5721_v25  ;;  %3701 = vmatprep.subr.bf16.mxu1 %v5724_v32  ;;  %v5803_v25 = vld [vmem:[%s8321_s1 + $0x800] ss:$16 sps:$4 sm:$0xff]   ;;  %v5806_v32 = vld [vmem:[%s8321_s1 + $0x808] ss:$16 sps:$4 sm:$0xff]  }
  0xcb   :  { %3374 = vmatpush1.bf16.msra.mxu0 %v5719_v33  ;;  %3702 = vmatpush1.bf16.msra.mxu1 %v5722_v34  ;;  %v5811_v33 = vld [vmem:[%s8321_s1 + $0x824] ss:$16 sps:$4 sm:$0xff]   ;;  %v7224_v34 = vrot.slane %v636_v30, %v6523_v49 }
  0xcc   :  { %3375 = vmatprep.subr.bf16.mxu0 %v5727_v35  ;;  %3703 = vmatprep.subr.bf16.mxu1 %v5730_v36  ;;  %v5809_v35 = vld [vmem:[%s8321_s1 + $0x820] ss:$16 sps:$4 sm:$0xff]   ;;  %v5812_v36 = vld [vmem:[%s8321_s1 + $0x828] ss:$16 sps:$4 sm:$0xff]   ;;  %v5895_v30 = vld [vmem:[%s8321_s1 + $0x9e4] ss:$16 sps:$4 sm:$0xff]  }
  0xcf   :  { %3376 = vmatpush1.bf16.msra.mxu0 %v5725_v37  ;;  %3704 = vmatpush1.bf16.msra.mxu1 %v5728_v38  ;;  %v5817_v37 = vld [vmem:[%s8321_s1 + $0x844] ss:$16 sps:$4 sm:$0xff]   ;;  %v5820_v38 = vld [vmem:[%s8321_s1 + $0x84c] ss:$16 sps:$4 sm:$0xff]  }
  0xd0   :  { %3377 = vmatprep.subr.bf16.mxu0 %v5733_v39  ;;  %3705 = vmatprep.subr.bf16.mxu1 %v5736_v40  ;;  %v5815_v39 = vld [vmem:[%s8321_s1 + $0x840] ss:$16 sps:$4 sm:$0xff]   ;;  %v5818_v40 = vld [vmem:[%s8321_s1 + $0x848] ss:$16 sps:$4 sm:$0xff]  }
  0xd3   :  { %3378 = vmatpush1.bf16.msra.mxu0 %v5731_v41  ;;  %3706 = vmatpush1.bf16.msra.mxu1 %v5734_v43  ;;  %v5823_v41 = vld [vmem:[%s8321_s1 + $0x864] ss:$16 sps:$4 sm:$0xff]   ;;  %v5826_v43 = vld [vmem:[%s8321_s1 + $0x86c] ss:$16 sps:$4 sm:$0xff]  }
  0xd4   :  { %3379 = vmatprep.subr.bf16.mxu0 %v5739_v44  ;;  %3707 = vmatprep.subr.bf16.mxu1 %v5742_v45  ;;  %v5821_v44 = vld [vmem:[%s8321_s1 + $0x860] ss:$16 sps:$4 sm:$0xff]   ;;  %v5824_v45 = vld [vmem:[%s8321_s1 + $0x868] ss:$16 sps:$4 sm:$0xff]  }
  0xd7   :  { %3380 = vmatpush1.bf16.msra.mxu0 %v5737_v46  ;;  %3708 = vmatpush1.bf16.msra.mxu1 %v5740_v47  ;;  %v5829_v46 = vld [vmem:[%s8321_s1 + $0x884] ss:$16 sps:$4 sm:$0xff]   ;;  %v5832_v47 = vld [vmem:[%s8321_s1 + $0x88c] ss:$16 sps:$4 sm:$0xff]  }
  0xd8   :  { %3381 = vmatprep.subr.bf16.mxu0 %v5745_v48  ;;  %3709 = vmatprep.subr.bf16.mxu1 %v5748_v50  ;;  %v5827_v48 = vld [vmem:[%s8321_s1 + $0x880] ss:$16 sps:$4 sm:$0xff]   ;;  %v5830_v50 = vld [vmem:[%s8321_s1 + $0x888] ss:$16 sps:$4 sm:$0xff]  }
  0xdb   :  { %3382 = vmatpush1.bf16.msra.mxu0 %v5743_v51  ;;  %3710 = vmatpush1.bf16.msra.mxu1 %v5746_v53  ;;  %v5835_v51 = vld [vmem:[%s8321_s1 + $0x8a4] ss:$16 sps:$4 sm:$0xff]   ;;  %v5838_v53 = vld [vmem:[%s8321_s1 + $0x8ac] ss:$16 sps:$4 sm:$0xff]  }
  0xdc   :  { %3383 = vmatprep.subr.bf16.mxu0 %v5751_v54  ;;  %3711 = vmatprep.subr.bf16.mxu1 %v5754_v55  ;;  %v5833_v54 = vld [vmem:[%s8321_s1 + $0x8a0] ss:$16 sps:$4 sm:$0xff]   ;;  %v5836_v55 = vld [vmem:[%s8321_s1 + $0x8a8] ss:$16 sps:$4 sm:$0xff]  }
  0xdf   :  { %3384 = vmatpush1.bf16.msra.mxu0 %v5749_v56  ;;  %3712 = vmatpush1.bf16.msra.mxu1 %v5752_v57  ;;  %v5841_v56 = vld [vmem:[%s8321_s1 + $0x8c4] ss:$16 sps:$4 sm:$0xff]   ;;  %v5844_v57 = vld [vmem:[%s8321_s1 + $0x8cc] ss:$16 sps:$4 sm:$0xff]  }
  0xe0   :  { %3385 = vmatprep.subr.bf16.mxu0 %v5757_v58  ;;  %3713 = vmatprep.subr.bf16.mxu1 %v5760_v59  ;;  %v5839_v58 = vld [vmem:[%s8321_s1 + $0x8c0] ss:$16 sps:$4 sm:$0xff]   ;;  %v5842_v59 = vld [vmem:[%s8321_s1 + $0x8c8] ss:$16 sps:$4 sm:$0xff]  }
  0xe3   :  { %3386 = vmatpush1.bf16.msra.mxu0 %v5755_v60  ;;  %3714 = vmatpush1.bf16.msra.mxu1 %v5758_v61  ;;  %v5847_v60 = vld [vmem:[%s8321_s1 + $0x8e4] ss:$16 sps:$4 sm:$0xff]   ;;  %v5850_v61 = vld [vmem:[%s8321_s1 + $0x8ec] ss:$16 sps:$4 sm:$0xff]  }
  0xe4   :  { %3387 = vmatprep.subr.bf16.mxu0 %v5763_v62  ;;  %3715 = vmatprep.subr.bf16.mxu1 %v5766_v63  ;;  %v5845_v62 = vld [vmem:[%s8321_s1 + $0x8e0] ss:$16 sps:$4 sm:$0xff]   ;;  %v5848_v63 = vld [vmem:[%s8321_s1 + $0x8e8] ss:$16 sps:$4 sm:$0xff]  }
  0xe7   :  { %3388 = vmatpush1.bf16.msra.mxu0 %v5761_v0  ;;  %3716 = vmatpush1.bf16.msra.mxu1 %v5764_v1  ;;  %v5853_v0 = vld [vmem:[%s8321_s1 + $0x904] ss:$16 sps:$4 sm:$0xff]   ;;  %v5856_v1 = vld [vmem:[%s8321_s1 + $0x90c] ss:$16 sps:$4 sm:$0xff]  }
  0xe8   :  { %3389 = vmatprep.subr.bf16.mxu0 %v5769_v2  ;;  %3717 = vmatprep.subr.bf16.mxu1 %v5772_v3  ;;  %v5851_v2 = vld [vmem:[%s8321_s1 + $0x900] ss:$16 sps:$4 sm:$0xff]   ;;  %v5854_v3 = vld [vmem:[%s8321_s1 + $0x908] ss:$16 sps:$4 sm:$0xff]  }
  0xeb   :  { %3390 = vmatpush1.bf16.msra.mxu0 %v5767_v4  ;;  %3718 = vmatpush1.bf16.msra.mxu1 %v5770_v5  ;;  %v5859_v4 = vld [vmem:[%s8321_s1 + $0x924] ss:$16 sps:$4 sm:$0xff]   ;;  %v5862_v5 = vld [vmem:[%s8321_s1 + $0x92c] ss:$16 sps:$4 sm:$0xff]  }
  0xec   :  { %3391 = vmatprep.subr.bf16.mxu0 %v5775_v6  ;;  %3719 = vmatprep.subr.bf16.mxu1 %v5778_v7  ;;  %v5857_v6 = vld [vmem:[%s8321_s1 + $0x920] ss:$16 sps:$4 sm:$0xff]   ;;  %v5860_v7 = vld [vmem:[%s8321_s1 + $0x928] ss:$16 sps:$4 sm:$0xff]  }
  0xef   :  { %3392 = vmatpush1.bf16.msra.mxu0 %v5773_v8  ;;  %3720 = vmatpush1.bf16.msra.mxu1 %v5776_v9  ;;  %v5865_v8 = vld [vmem:[%s8321_s1 + $0x944] ss:$16 sps:$4 sm:$0xff]   ;;  %v5868_v9 = vld [vmem:[%s8321_s1 + $0x94c] ss:$16 sps:$4 sm:$0xff]  }
  0xf0   :  { %3393 = vmatprep.subr.bf16.mxu0 %v5781_v10  ;;  %3721 = vmatprep.subr.bf16.mxu1 %v5784_v11  ;;  %v5863_v10 = vld [vmem:[%s8321_s1 + $0x940] ss:$16 sps:$4 sm:$0xff]   ;;  %v5866_v11 = vld [vmem:[%s8321_s1 + $0x948] ss:$16 sps:$4 sm:$0xff]  }
  0xf3   :  { %3394 = vmatpush1.bf16.msra.mxu0 %v5779_v12  ;;  %3722 = vmatpush1.bf16.msra.mxu1 %v5782_v52  ;;  %v5871_v12 = vld [vmem:[%s8321_s1 + $0x964] ss:$16 sps:$4 sm:$0xff]   ;;  %v5874_v52 = vld [vmem:[%s8321_s1 + $0x96c] ss:$16 sps:$4 sm:$0xff]  }
  0xf4   :  { %3395 = vmatprep.subr.bf16.mxu0 %v5787_v15  ;;  %3723 = vmatprep.subr.bf16.mxu1 %v5790_v16  ;;  %v5869_v15 = vld [vmem:[%s8321_s1 + $0x960] ss:$16 sps:$4 sm:$0xff]   ;;  %v5872_v16 = vld [vmem:[%s8321_s1 + $0x968] ss:$16 sps:$4 sm:$0xff]  }
  0xf7   :  { %3396 = vmatpush1.bf16.msra.mxu0 %v5785_v17  ;;  %3724 = vmatpush1.bf16.msra.mxu1 %v5788_v18  ;;  %v5877_v17 = vld [vmem:[%s8321_s1 + $0x984] ss:$16 sps:$4 sm:$0xff]   ;;  %v5880_v18 = vld [vmem:[%s8321_s1 + $0x98c] ss:$16 sps:$4 sm:$0xff]  }
  0xf8   :  { %3397 = vmatprep.subr.bf16.mxu0 %v5793_v19  ;;  %3725 = vmatprep.subr.bf16.mxu1 %v5796_v20  ;;  %v5875_v19 = vld [vmem:[%s8321_s1 + $0x980] ss:$16 sps:$4 sm:$0xff]   ;;  %v5878_v20 = vld [vmem:[%s8321_s1 + $0x988] ss:$16 sps:$4 sm:$0xff]  }
  0xfb   :  { %3398 = vmatpush1.bf16.msra.mxu0 %v5791_v22  ;;  %3726 = vmatpush1.bf16.msra.mxu1 %v5794_v23  ;;  %v5883_v22 = vld [vmem:[%s8321_s1 + $0x9a4] ss:$16 sps:$4 sm:$0xff]   ;;  %v5886_v23 = vld [vmem:[%s8321_s1 + $0x9ac] ss:$16 sps:$4 sm:$0xff]  }
  0xfc   :  { %3399 = vmatprep.subr.bf16.mxu0 %v5799_v24  ;;  %3727 = vmatprep.subr.bf16.mxu1 %v5802_v13  ;;  %v5881_v24 = vld [vmem:[%s8321_s1 + $0x9a0] ss:$16 sps:$4 sm:$0xff]   ;;  %v5884_v13 = vld [vmem:[%s8321_s1 + $0x9a8] ss:$16 sps:$4 sm:$0xff]  }
  0xff   :  { %3400 = vmatpush1.bf16.msra.mxu0 %v5797_v27  ;;  %3728 = vmatpush1.bf16.msra.mxu1 %v5800_v28  ;;  %v5889_v27 = vld [vmem:[%s8321_s1 + $0x9c4] ss:$16 sps:$4 sm:$0xff]   ;;  %v5892_v28 = vld [vmem:[%s8321_s1 + $0x9cc] ss:$16 sps:$4 sm:$0xff]  }
 0x100   :  { %3410 = vmatprep.subr.bf16.mxu0 %v5805_v29  ;;  %3738 = vmatprep.subr.bf16.mxu1 %v5808_v14  ;;  %v5887_v29 = vld [vmem:[%s8321_s1 + $0x9c0] ss:$16 sps:$4 sm:$0xff]   ;;  %v5890_v14 = vld [vmem:[%s8321_s1 + $0x9c8] ss:$16 sps:$4 sm:$0xff]  }
 0x102   :  { %3402 = vmatmul.mubr.bf16.vlgmr.msra.gmra.mrb[0].mxu0 %v618_v31  ;;  %3730 = vmatmul.mubr.bf16.vlgmr.msra.gmra.mrb[0].mxu1 %v618_v31  ;;  %v5898_v31 = vld [vmem:[%s8321_s1 + $0x9ec] ss:$16 sps:$4 sm:$0xff]  }
 0x103   :  { %3411 = vmatpush1.bf16.msra.mxu0 %v5803_v25  ;;  %3739 = vmatpush1.bf16.msra.mxu1 %v5806_v32  ;;  %v5893_v25 = vld [vmem:[%s8321_s1 + $0x9e0] ss:$16 sps:$4 sm:$0xff]   ;;  %v5896_v32 = vld [vmem:[%s8321_s1 + $0x9e8] ss:$16 sps:$4 sm:$0xff]  }
 0x104   :  { %3412 = vmatprep.subr.bf16.mxu0 %v5811_v33  ;;  %3740 = vmatprep.subr.bf16.mxu1 %v5814_v26  ;;  %v5901_v33 = vld [vmem:[%s8321_s1 + $0xa04] ss:$16 sps:$4 sm:$0xff]   ;;  %v5904_v26 = vld [vmem:[%s8321_s1 + $0xa0c] ss:$16 sps:$4 sm:$0xff]  }
 0x105   :  { %3442 = vmatprep.mubr.bf16.mxu0 %v7224_v34  ;;  %3770 = vmatprep.mubr.bf16.mxu1 %v7224_v34 }
 0x107   :  { %3413 = vmatpush1.bf16.msra.mxu0 %v5809_v35  ;;  %3741 = vmatpush1.bf16.msra.mxu1 %v5812_v36  ;;  %v7410_v35 = vrot.slane %v7181_v21, %v6523_v49  ;;  %v5899_v36 = vld [vmem:[%s8321_s1 + $0xa00] ss:$16 sps:$4 sm:$0xff]   ;;  %v5910_v21 = vld [vmem:[%s8321_s1 + $0xa2c] ss:$16 sps:$4 sm:$0xff]  }
 0x108   :  { %3414 = vmatprep.subr.bf16.mxu0 %v5817_v37  ;;  %3742 = vmatprep.subr.bf16.mxu1 %v5820_v38  ;;  %v5902_v37 = vld [vmem:[%s8321_s1 + $0xa08] ss:$16 sps:$4 sm:$0xff]   ;;  %v5907_v38 = vld [vmem:[%s8321_s1 + $0xa24] ss:$16 sps:$4 sm:$0xff]  }
 0x10b   :  { %3415 = vmatpush1.bf16.msra.mxu0 %v5815_v39  ;;  %3743 = vmatpush1.bf16.msra.mxu1 %v5818_v40  ;;  %v668_v39 = vcombine.high %v7224_v34, %v7224_v34  ;;  %v5905_v40 = vld [vmem:[%s8321_s1 + $0xa20] ss:$16 sps:$4 sm:$0xff]   ;;  %v5913_v34 = vld [vmem:[%s8321_s1 + $0xa44] ss:$16 sps:$4 sm:$0xff]  }
 0x10c   :  { %3416 = vmatprep.subr.bf16.mxu0 %v5823_v41  ;;  %3744 = vmatprep.subr.bf16.mxu1 %v5826_v43  ;;  %v5908_v41 = vld [vmem:[%s8321_s1 + $0xa28] ss:$16 sps:$4 sm:$0xff]   ;;  %v5916_v43 = vld [vmem:[%s8321_s1 + $0xa4c] ss:$16 sps:$4 sm:$0xff]  }
 0x10f   :  { %3417 = vmatpush1.bf16.msra.mxu0 %v5821_v44  ;;  %3745 = vmatpush1.bf16.msra.mxu1 %v5824_v45  ;;  %v5911_v44 = vld [vmem:[%s8321_s1 + $0xa40] ss:$16 sps:$4 sm:$0xff]   ;;  %v5914_v45 = vld [vmem:[%s8321_s1 + $0xa48] ss:$16 sps:$4 sm:$0xff]  }
 0x110   :  { %3418 = vmatprep.subr.bf16.mxu0 %v5829_v46  ;;  %3746 = vmatprep.subr.bf16.mxu1 %v5832_v47  ;;  %v5919_v46 = vld [vmem:[%s8321_s1 + $0xa64] ss:$16 sps:$4 sm:$0xff]   ;;  %v5922_v47 = vld [vmem:[%s8321_s1 + $0xa6c] ss:$16 sps:$4 sm:$0xff]  }
 0x113   :  { %3419 = vmatpush1.bf16.msra.mxu0 %v5827_v48  ;;  %3747 = vmatpush1.bf16.msra.mxu1 %v5830_v50  ;;  %v5917_v48 = vld [vmem:[%s8321_s1 + $0xa60] ss:$16 sps:$4 sm:$0xff]   ;;  %v5920_v50 = vld [vmem:[%s8321_s1 + $0xa68] ss:$16 sps:$4 sm:$0xff]  }
 0x114   :  { %3420 = vmatprep.subr.bf16.mxu0 %v5835_v51  ;;  %3748 = vmatprep.subr.bf16.mxu1 %v5838_v53  ;;  %v5925_v51 = vld [vmem:[%s8321_s1 + $0xa84] ss:$16 sps:$4 sm:$0xff]   ;;  %v5928_v53 = vld [vmem:[%s8321_s1 + $0xa8c] ss:$16 sps:$4 sm:$0xff]  }
 0x117   :  { %3421 = vmatpush1.bf16.msra.mxu0 %v5833_v54  ;;  %3749 = vmatpush1.bf16.msra.mxu1 %v5836_v55  ;;  %v5923_v54 = vld [vmem:[%s8321_s1 + $0xa80] ss:$16 sps:$4 sm:$0xff]   ;;  %v5926_v55 = vld [vmem:[%s8321_s1 + $0xa88] ss:$16 sps:$4 sm:$0xff]  }
 0x118   :  { %3422 = vmatprep.subr.bf16.mxu0 %v5841_v56  ;;  %3750 = vmatprep.subr.bf16.mxu1 %v5844_v57  ;;  %v5931_v56 = vld [vmem:[%s8321_s1 + $0xaa4] ss:$16 sps:$4 sm:$0xff]   ;;  %v5934_v57 = vld [vmem:[%s8321_s1 + $0xaac] ss:$16 sps:$4 sm:$0xff]  }
 0x11b   :  { %3423 = vmatpush1.bf16.msra.mxu0 %v5839_v58  ;;  %3751 = vmatpush1.bf16.msra.mxu1 %v5842_v59  ;;  %v5929_v58 = vld [vmem:[%s8321_s1 + $0xaa0] ss:$16 sps:$4 sm:$0xff]   ;;  %v5932_v59 = vld [vmem:[%s8321_s1 + $0xaa8] ss:$16 sps:$4 sm:$0xff]  }
 0x11c   :  { %3424 = vmatprep.subr.bf16.mxu0 %v5847_v60  ;;  %3752 = vmatprep.subr.bf16.mxu1 %v5850_v61  ;;  %v5937_v60 = vld [vmem:[%s8321_s1 + $0xac4] ss:$16 sps:$4 sm:$0xff]   ;;  %v5940_v61 = vld [vmem:[%s8321_s1 + $0xacc] ss:$16 sps:$4 sm:$0xff]  }
 0x11f   :  { %3425 = vmatpush1.bf16.msra.mxu0 %v5845_v62  ;;  %3753 = vmatpush1.bf16.msra.mxu1 %v5848_v63  ;;  %v5935_v62 = vld [vmem:[%s8321_s1 + $0xac0] ss:$16 sps:$4 sm:$0xff]   ;;  %v5938_v63 = vld [vmem:[%s8321_s1 + $0xac8] ss:$16 sps:$4 sm:$0xff]  }
 0x120   :  { %3426 = vmatprep.subr.bf16.mxu0 %v5853_v0  ;;  %3754 = vmatprep.subr.bf16.mxu1 %v5856_v1  ;;  %v5943_v0 = vld [vmem:[%s8321_s1 + $0xae4] ss:$16 sps:$4 sm:$0xff]   ;;  %v5946_v1 = vld [vmem:[%s8321_s1 + $0xaec] ss:$16 sps:$4 sm:$0xff]  }
 0x123   :  { %3427 = vmatpush1.bf16.msra.mxu0 %v5851_v2  ;;  %3755 = vmatpush1.bf16.msra.mxu1 %v5854_v3  ;;  %v5941_v2 = vld [vmem:[%s8321_s1 + $0xae0] ss:$16 sps:$4 sm:$0xff]   ;;  %v5944_v3 = vld [vmem:[%s8321_s1 + $0xae8] ss:$16 sps:$4 sm:$0xff]  }
 0x124   :  { %3428 = vmatprep.subr.bf16.mxu0 %v5859_v4  ;;  %3756 = vmatprep.subr.bf16.mxu1 %v5862_v5  ;;  %v5949_v4 = vld [vmem:[%s8321_s1 + $0xb04] ss:$16 sps:$4 sm:$0xff]   ;;  %v5952_v5 = vld [vmem:[%s8321_s1 + $0xb0c] ss:$16 sps:$4 sm:$0xff]  }
 0x127   :  { %3429 = vmatpush1.bf16.msra.mxu0 %v5857_v6  ;;  %3757 = vmatpush1.bf16.msra.mxu1 %v5860_v7  ;;  %v5947_v6 = vld [vmem:[%s8321_s1 + $0xb00] ss:$16 sps:$4 sm:$0xff]   ;;  %v5950_v7 = vld [vmem:[%s8321_s1 + $0xb08] ss:$16 sps:$4 sm:$0xff]  }
 0x128   :  { %3430 = vmatprep.subr.bf16.mxu0 %v5865_v8  ;;  %3758 = vmatprep.subr.bf16.mxu1 %v5868_v9  ;;  %v5955_v8 = vld [vmem:[%s8321_s1 + $0xb24] ss:$16 sps:$4 sm:$0xff]   ;;  %v5958_v9 = vld [vmem:[%s8321_s1 + $0xb2c] ss:$16 sps:$4 sm:$0xff]  }
 0x12b   :  { %3431 = vmatpush1.bf16.msra.mxu0 %v5863_v10  ;;  %3759 = vmatpush1.bf16.msra.mxu1 %v5866_v11  ;;  %v5953_v10 = vld [vmem:[%s8321_s1 + $0xb20] ss:$16 sps:$4 sm:$0xff]   ;;  %v5956_v11 = vld [vmem:[%s8321_s1 + $0xb28] ss:$16 sps:$4 sm:$0xff]  }
 0x12c   :  { %3432 = vmatprep.subr.bf16.mxu0 %v5871_v12  ;;  %3760 = vmatprep.subr.bf16.mxu1 %v5874_v52  ;;  %v5961_v12 = vld [vmem:[%s8321_s1 + $0xb44] ss:$16 sps:$4 sm:$0xff]   ;;  %v5964_v52 = vld [vmem:[%s8321_s1 + $0xb4c] ss:$16 sps:$4 sm:$0xff]  }
 0x12f   :  { %3433 = vmatpush1.bf16.msra.mxu0 %v5869_v15  ;;  %3761 = vmatpush1.bf16.msra.mxu1 %v5872_v16  ;;  %v5959_v15 = vld [vmem:[%s8321_s1 + $0xb40] ss:$16 sps:$4 sm:$0xff]   ;;  %v5962_v16 = vld [vmem:[%s8321_s1 + $0xb48] ss:$16 sps:$4 sm:$0xff]  }
 0x130   :  { %3434 = vmatprep.subr.bf16.mxu0 %v5877_v17  ;;  %3762 = vmatprep.subr.bf16.mxu1 %v5880_v18  ;;  %v5967_v17 = vld [vmem:[%s8321_s1 + $0xb64] ss:$16 sps:$4 sm:$0xff]   ;;  %v5970_v18 = vld [vmem:[%s8321_s1 + $0xb6c] ss:$16 sps:$4 sm:$0xff]  }
 0x133   :  { %3435 = vmatpush1.bf16.msra.mxu0 %v5875_v19  ;;  %3763 = vmatpush1.bf16.msra.mxu1 %v5878_v20  ;;  %v5965_v19 = vld [vmem:[%s8321_s1 + $0xb60] ss:$16 sps:$4 sm:$0xff]   ;;  %v5968_v20 = vld [vmem:[%s8321_s1 + $0xb68] ss:$16 sps:$4 sm:$0xff]  }
 0x134   :  { %3436 = vmatprep.subr.bf16.mxu0 %v5883_v22  ;;  %3764 = vmatprep.subr.bf16.mxu1 %v5886_v23  ;;  %v5973_v22 = vld [vmem:[%s8321_s1 + $0xb84] ss:$16 sps:$4 sm:$0xff]   ;;  %v5976_v23 = vld [vmem:[%s8321_s1 + $0xb8c] ss:$16 sps:$4 sm:$0xff]  }
 0x137   :  { %3437 = vmatpush1.bf16.msra.mxu0 %v5881_v24  ;;  %3765 = vmatpush1.bf16.msra.mxu1 %v5884_v13  ;;  %v5971_v24 = vld [vmem:[%s8321_s1 + $0xb80] ss:$16 sps:$4 sm:$0xff]   ;;  %v5974_v13 = vld [vmem:[%s8321_s1 + $0xb88] ss:$16 sps:$4 sm:$0xff]  }
 0x138   :  { %3438 = vmatprep.subr.bf16.mxu0 %v5889_v27  ;;  %3766 = vmatprep.subr.bf16.mxu1 %v5892_v28  ;;  %v5979_v27 = vld [vmem:[%s8321_s1 + $0xba4] ss:$16 sps:$4 sm:$0xff]   ;;  %v5982_v28 = vld [vmem:[%s8321_s1 + $0xbac] ss:$16 sps:$4 sm:$0xff]  }
 0x13b   :  { %3439 = vmatpush1.bf16.msra.mxu0 %v5887_v29  ;;  %3767 = vmatpush1.bf16.msra.mxu1 %v5890_v14  ;;  %v5977_v29 = vld [vmem:[%s8321_s1 + $0xba0] ss:$16 sps:$4 sm:$0xff]   ;;  %v5980_v14 = vld [vmem:[%s8321_s1 + $0xba8] ss:$16 sps:$4 sm:$0xff]  }
 0x13c   :  { %3440 = vmatprep.subr.bf16.mxu0 %v5895_v30  ;;  %3768 = vmatprep.subr.bf16.mxu1 %v5898_v31  ;;  %v5985_v30 = vld [vmem:[%s8321_s1 + $0xbc4] ss:$16 sps:$4 sm:$0xff]   ;;  %v5988_v31 = vld [vmem:[%s8321_s1 + $0xbcc] ss:$16 sps:$4 sm:$0xff]  }
 0x13f   :  { %3441 = vmatpush1.bf16.msra.mxu0 %v5893_v25  ;;  %3769 = vmatpush1.bf16.msra.mxu1 %v5896_v32  ;;  %v6308_v25 = vld [vmem:[%s8320_s0 + $0x8] sm:$0xff] }
 0x140   :  { %3451 = vmatprep.subr.bf16.mxu0 %v5901_v33  ;;  %3779 = vmatprep.subr.bf16.mxu1 %v5904_v26  ;;  %v621_v32 = vcombine.high %v6308_v25, %v6308_v25  ;;  %v5983_v33 = vld [vmem:[%s8321_s1 + $0xbc0] ss:$16 sps:$4 sm:$0xff]   ;;  %v5986_v26 = vld [vmem:[%s8321_s1 + $0xbc8] ss:$16 sps:$4 sm:$0xff]  }
 0x142   :  { %3443 = vmatmul.mubr.bf16.vlgmr.msra.gmra.mrb[0].mxu0 %v7410_v35  ;;  %3771 = vmatmul.mubr.bf16.vlgmr.msra.gmra.mrb[0].mxu1 %v7410_v35 }
 0x143   :  { %3452 = vmatpush1.bf16.msra.mxu0 %v5899_v36  ;;  %3780 = vmatpush1.bf16.msra.mxu1 %v5902_v37  ;;  %v5991_v36 = vld [vmem:[%s8321_s1 + $0xbe4] ss:$16 sps:$4 sm:$0xff]   ;;  %v5994_v37 = vld [vmem:[%s8321_s1 + $0xbec] ss:$16 sps:$4 sm:$0xff]  }
 0x144   :  { %3453 = vmatprep.subr.bf16.mxu0 %v5907_v38  ;;  %3781 = vmatprep.subr.bf16.mxu1 %v5910_v21  ;;  %v7600_v38 = vrot.slane %v621_v32, %v6523_v49 }
 0x145   :  { %3483 = vmatprep.mubr.bf16.mxu0 %v668_v39  ;;  %3811 = vmatprep.mubr.bf16.mxu1 %v668_v39 }
 0x147   :  { %3454 = vmatpush1.bf16.msra.mxu0 %v5905_v40  ;;  %3782 = vmatpush1.bf16.msra.mxu1 %v5908_v41 }
 0x148   :  { %3455 = vmatprep.subr.bf16.mxu0 %v5913_v34  ;;  %3783 = vmatprep.subr.bf16.mxu1 %v5916_v43 }
 0x14b   :  { %3456 = vmatpush1.bf16.msra.mxu0 %v5911_v44  ;;  %3784 = vmatpush1.bf16.msra.mxu1 %v5914_v45 }
 0x14c   :  { %3457 = vmatprep.subr.bf16.mxu0 %v5919_v46  ;;  %3785 = vmatprep.subr.bf16.mxu1 %v5922_v47 }
 0x14f   :  { %3458 = vmatpush1.bf16.msra.mxu0 %v5917_v48  ;;  %3786 = vmatpush1.bf16.msra.mxu1 %v5920_v50 }
 0x150   :  { %3459 = vmatprep.subr.bf16.mxu0 %v5925_v51  ;;  %3787 = vmatprep.subr.bf16.mxu1 %v5928_v53 }
 0x153   :  { %3460 = vmatpush1.bf16.msra.mxu0 %v5923_v54  ;;  %3788 = vmatpush1.bf16.msra.mxu1 %v5926_v55 }
 0x154   :  { %3461 = vmatprep.subr.bf16.mxu0 %v5931_v56  ;;  %3789 = vmatprep.subr.bf16.mxu1 %v5934_v57 }
 0x157   :  { %3462 = vmatpush1.bf16.msra.mxu0 %v5929_v58  ;;  %3790 = vmatpush1.bf16.msra.mxu1 %v5932_v59 }
 0x158   :  { %3463 = vmatprep.subr.bf16.mxu0 %v5937_v60  ;;  %3791 = vmatprep.subr.bf16.mxu1 %v5940_v61 }
 0x15b   :  { %3464 = vmatpush1.bf16.msra.mxu0 %v5935_v62  ;;  %3792 = vmatpush1.bf16.msra.mxu1 %v5938_v63 }
 0x15c   :  { %3465 = vmatprep.subr.bf16.mxu0 %v5943_v0  ;;  %3793 = vmatprep.subr.bf16.mxu1 %v5946_v1 }
 0x15f   :  { %3466 = vmatpush1.bf16.msra.mxu0 %v5941_v2  ;;  %3794 = vmatpush1.bf16.msra.mxu1 %v5944_v3 }
 0x160   :  { %3467 = vmatprep.subr.bf16.mxu0 %v5949_v4  ;;  %3795 = vmatprep.subr.bf16.mxu1 %v5952_v5 }
 0x163   :  { %3468 = vmatpush1.bf16.msra.mxu0 %v5947_v6  ;;  %3796 = vmatpush1.bf16.msra.mxu1 %v5950_v7 }
 0x164   :  { %3469 = vmatprep.subr.bf16.mxu0 %v5955_v8  ;;  %3797 = vmatprep.subr.bf16.mxu1 %v5958_v9 }
 0x167   :  { %3470 = vmatpush1.bf16.msra.mxu0 %v5953_v10  ;;  %3798 = vmatpush1.bf16.msra.mxu1 %v5956_v11 }
 0x168   :  { %3471 = vmatprep.subr.bf16.mxu0 %v5961_v12  ;;  %3799 = vmatprep.subr.bf16.mxu1 %v5964_v52 }
 0x16b   :  { %3472 = vmatpush1.bf16.msra.mxu0 %v5959_v15  ;;  %3800 = vmatpush1.bf16.msra.mxu1 %v5962_v16 }
 0x16c   :  { %3473 = vmatprep.subr.bf16.mxu0 %v5967_v17  ;;  %3801 = vmatprep.subr.bf16.mxu1 %v5970_v18 }
 0x16f   :  { %3474 = vmatpush1.bf16.msra.mxu0 %v5965_v19  ;;  %3802 = vmatpush1.bf16.msra.mxu1 %v5968_v20 }
 0x170   :  { %3475 = vmatprep.subr.bf16.mxu0 %v5973_v22  ;;  %3803 = vmatprep.subr.bf16.mxu1 %v5976_v23 }
 0x173   :  { %3476 = vmatpush1.bf16.msra.mxu0 %v5971_v24  ;;  %3804 = vmatpush1.bf16.msra.mxu1 %v5974_v13 }
 0x174   :  { %3477 = vmatprep.subr.bf16.mxu0 %v5979_v27  ;;  %3805 = vmatprep.subr.bf16.mxu1 %v5982_v28 }
 0x177   :  { %3478 = vmatpush1.bf16.msra.mxu0 %v5977_v29  ;;  %3806 = vmatpush1.bf16.msra.mxu1 %v5980_v14 }
 0x178   :  { %3479 = vmatprep.subr.bf16.mxu0 %v5985_v30  ;;  %3807 = vmatprep.subr.bf16.mxu1 %v5988_v31 }
 0x179   :  { %14 = vsyncpa [#allocation3], 0  ;;  %v5989_v21 = vld [vmem:[%s8321_s1 + $0xbe0] ss:$16 sps:$4 sm:$0xff]   ;;  %v5992_v39 = vld [vmem:[%s8321_s1 + $0xbe8] ss:$16 sps:$4 sm:$0xff]   ;;  %v637_v34 = vcombine.high %v7600_v38, %v7600_v38  ;;  %v666_v43 = vcombine.high %v7410_v35, %v7410_v35 }
 0x17a   :  { %v5997_v40 = vld [vmem:[%s8321_s1 + $0xc04] ss:$16 sps:$4 sm:$0xff]   ;;  %v6000_v41 = vld [vmem:[%s8321_s1 + $0xc0c] ss:$16 sps:$4 sm:$0xff]   ;;  %v5995_v44 = vld [vmem:[%s8321_s1 + $0xc00] ss:$16 sps:$4 sm:$0xff]  }
 0x17b   :  { %3480 = vmatpush1.bf16.msra.mxu0 %v5983_v33  ;;  %3808 = vmatpush1.bf16.msra.mxu1 %v5986_v26  ;;  %v5998_v45 = vld [vmem:[%s8321_s1 + $0xc08] ss:$16 sps:$4 sm:$0xff]   ;;  %v6003_v46 = vld [vmem:[%s8321_s1 + $0xc24] ss:$16 sps:$4 sm:$0xff]   ;;  %v6006_v35 = vld [vmem:[%s8321_s1 + $0xc2c] ss:$16 sps:$4 sm:$0xff]   ;;  %v7631_v47 = vrot.slane %v637_v34, %v6523_v49 }
 0x17c   :  { %3481 = vmatprep.subr.bf16.mxu0 %v5991_v36  ;;  %3809 = vmatprep.subr.bf16.mxu1 %v5994_v37  ;;  %v6001_v48 = vld [vmem:[%s8321_s1 + $0xc20] ss:$16 sps:$4 sm:$0xff]   ;;  %v6004_v50 = vld [vmem:[%s8321_s1 + $0xc28] ss:$16 sps:$4 sm:$0xff]   ;;  %v6009_v51 = vld [vmem:[%s8321_s1 + $0xc44] ss:$16 sps:$4 sm:$0xff]  }
 0x17d   :  { %v6012_v53 = vld [vmem:[%s8321_s1 + $0xc4c] ss:$16 sps:$4 sm:$0xff]   ;;  %v6007_v54 = vld [vmem:[%s8321_s1 + $0xc40] ss:$16 sps:$4 sm:$0xff]   ;;  %v6010_v55 = vld [vmem:[%s8321_s1 + $0xc48] ss:$16 sps:$4 sm:$0xff]  }
 0x17e   :  { %v6015_v56 = vld [vmem:[%s8321_s1 + $0xc64] ss:$16 sps:$4 sm:$0xff]   ;;  %v6018_v57 = vld [vmem:[%s8321_s1 + $0xc6c] ss:$16 sps:$4 sm:$0xff]   ;;  %v6013_v58 = vld [vmem:[%s8321_s1 + $0xc60] ss:$16 sps:$4 sm:$0xff]  }
 0x17f   :  { %3482 = vmatpush1.bf16.msra.mxu0 %v5989_v21  ;;  %3810 = vmatpush1.bf16.msra.mxu1 %v5992_v39  ;;  %v6016_v59 = vld [vmem:[%s8321_s1 + $0xc68] ss:$16 sps:$4 sm:$0xff]   ;;  %v6021_v60 = vld [vmem:[%s8321_s1 + $0xc84] ss:$16 sps:$4 sm:$0xff]   ;;  %v6024_v61 = vld [vmem:[%s8321_s1 + $0xc8c] ss:$16 sps:$4 sm:$0xff]  }
 0x180   :  { %3492 = vmatprep.subr.bf16.mxu0 %v5997_v40  ;;  %3820 = vmatprep.subr.bf16.mxu1 %v6000_v41  ;;  %v6019_v62 = vld [vmem:[%s8321_s1 + $0xc80] ss:$16 sps:$4 sm:$0xff]   ;;  %v6022_v63 = vld [vmem:[%s8321_s1 + $0xc88] ss:$16 sps:$4 sm:$0xff]   ;;  %v6027_v0 = vld [vmem:[%s8321_s1 + $0xca4] ss:$16 sps:$4 sm:$0xff]  }
 0x181   :  { %v6030_v1 = vld [vmem:[%s8321_s1 + $0xcac] ss:$16 sps:$4 sm:$0xff]   ;;  %v6025_v2 = vld [vmem:[%s8321_s1 + $0xca0] ss:$16 sps:$4 sm:$0xff]   ;;  %v6028_v3 = vld [vmem:[%s8321_s1 + $0xca8] ss:$16 sps:$4 sm:$0xff]  }
 0x182   :  { %3484 = vmatmul.mubr.bf16.vlgmr.msra.gmra.mrb[0].mxu0 %v666_v43  ;;  %3812 = vmatmul.mubr.bf16.vlgmr.msra.gmra.mrb[0].mxu1 %v666_v43  ;;  %v6033_v4 = vld [vmem:[%s8321_s1 + $0xcc4] ss:$16 sps:$4 sm:$0xff]   ;;  %v6036_v5 = vld [vmem:[%s8321_s1 + $0xccc] ss:$16 sps:$4 sm:$0xff]   ;;  %v6031_v6 = vld [vmem:[%s8321_s1 + $0xcc0] ss:$16 sps:$4 sm:$0xff]  }
 0x183   :  { %3493 = vmatpush1.bf16.msra.mxu0 %v5995_v44  ;;  %3821 = vmatpush1.bf16.msra.mxu1 %v5998_v45  ;;  %v6034_v7 = vld [vmem:[%s8321_s1 + $0xcc8] ss:$16 sps:$4 sm:$0xff]   ;;  %v6039_v8 = vld [vmem:[%s8321_s1 + $0xce4] ss:$16 sps:$4 sm:$0xff]   ;;  %v6042_v9 = vld [vmem:[%s8321_s1 + $0xcec] ss:$16 sps:$4 sm:$0xff]  }
 0x184   :  { %3494 = vmatprep.subr.bf16.mxu0 %v6003_v46  ;;  %3822 = vmatprep.subr.bf16.mxu1 %v6006_v35  ;;  %v6037_v10 = vld [vmem:[%s8321_s1 + $0xce0] ss:$16 sps:$4 sm:$0xff]   ;;  %v6040_v11 = vld [vmem:[%s8321_s1 + $0xce8] ss:$16 sps:$4 sm:$0xff]   ;;  %v6045_v12 = vld [vmem:[%s8321_s1 + $0xd04] ss:$16 sps:$4 sm:$0xff]  }
 0x185   :  { %3524 = vmatprep.mubr.bf16.mxu0 %v7631_v47  ;;  %3852 = vmatprep.mubr.bf16.mxu1 %v7631_v47  ;;  %v6048_v52 = vld [vmem:[%s8321_s1 + $0xd0c] ss:$16 sps:$4 sm:$0xff]   ;;  %v6043_v15 = vld [vmem:[%s8321_s1 + $0xd00] ss:$16 sps:$4 sm:$0xff]   ;;  %v6046_v16 = vld [vmem:[%s8321_s1 + $0xd08] ss:$16 sps:$4 sm:$0xff]  }
 0x186   :  { %v6051_v17 = vld [vmem:[%s8321_s1 + $0xd24] ss:$16 sps:$4 sm:$0xff]   ;;  %v6054_v18 = vld [vmem:[%s8321_s1 + $0xd2c] ss:$16 sps:$4 sm:$0xff]   ;;  %v6049_v19 = vld [vmem:[%s8321_s1 + $0xd20] ss:$16 sps:$4 sm:$0xff]  }
 0x187   :  { %3495 = vmatpush1.bf16.msra.mxu0 %v6001_v48  ;;  %3823 = vmatpush1.bf16.msra.mxu1 %v6004_v50  ;;  %v6052_v20 = vld [vmem:[%s8321_s1 + $0xd28] ss:$16 sps:$4 sm:$0xff]   ;;  %v6057_v22 = vld [vmem:[%s8321_s1 + $0xd44] ss:$16 sps:$4 sm:$0xff]   ;;  %v6060_v23 = vld [vmem:[%s8321_s1 + $0xd4c] ss:$16 sps:$4 sm:$0xff]   ;;  %v7817_v48 = vrot.slane %v7600_v38, %v6523_v49  ;;  %v669_v38 = vcombine.high %v7631_v47, %v7631_v47 }
 0x188   :  { %3496 = vmatprep.subr.bf16.mxu0 %v6009_v51  ;;  %3824 = vmatprep.subr.bf16.mxu1 %v6012_v53  ;;  %v6055_v24 = vld [vmem:[%s8321_s1 + $0xd40] ss:$16 sps:$4 sm:$0xff]   ;;  %v6058_v13 = vld [vmem:[%s8321_s1 + $0xd48] ss:$16 sps:$4 sm:$0xff]   ;;  %v6063_v27 = vld [vmem:[%s8321_s1 + $0xd64] ss:$16 sps:$4 sm:$0xff]  }
 0x189   :  { %v6066_v28 = vld [vmem:[%s8321_s1 + $0xd6c] ss:$16 sps:$4 sm:$0xff]   ;;  %v6061_v29 = vld [vmem:[%s8321_s1 + $0xd60] ss:$16 sps:$4 sm:$0xff]   ;;  %v6064_v14 = vld [vmem:[%s8321_s1 + $0xd68] ss:$16 sps:$4 sm:$0xff]  }
 0x18a   :  { %v6069_v30 = vld [vmem:[%s8321_s1 + $0xd84] ss:$16 sps:$4 sm:$0xff]   ;;  %v6072_v31 = vld [vmem:[%s8321_s1 + $0xd8c] ss:$16 sps:$4 sm:$0xff]   ;;  %v6067_v25 = vld [vmem:[%s8321_s1 + $0xd80] ss:$16 sps:$4 sm:$0xff]  }
 0x18b   :  { %3497 = vmatpush1.bf16.msra.mxu0 %v6007_v54  ;;  %3825 = vmatpush1.bf16.msra.mxu1 %v6010_v55  ;;  %v6070_v32 = vld [vmem:[%s8321_s1 + $0xd88] ss:$16 sps:$4 sm:$0xff]   ;;  %v6075_v33 = vld [vmem:[%s8321_s1 + $0xda4] ss:$16 sps:$4 sm:$0xff]   ;;  %v6078_v26 = vld [vmem:[%s8321_s1 + $0xdac] ss:$16 sps:$4 sm:$0xff]  }
 0x18c   :  { %3498 = vmatprep.subr.bf16.mxu0 %v6015_v56  ;;  %3826 = vmatprep.subr.bf16.mxu1 %v6018_v57  ;;  %v6073_v36 = vld [vmem:[%s8321_s1 + $0xda0] ss:$16 sps:$4 sm:$0xff]   ;;  %v6076_v37 = vld [vmem:[%s8321_s1 + $0xda8] ss:$16 sps:$4 sm:$0xff]   ;;  %v6081_v21 = vld [vmem:[%s8321_s1 + $0xdc4] ss:$16 sps:$4 sm:$0xff]  }
 0x18d   :  { %v6084_v39 = vld [vmem:[%s8321_s1 + $0xdcc] ss:$16 sps:$4 sm:$0xff]   ;;  %v6079_v40 = vld [vmem:[%s8321_s1 + $0xdc0] ss:$16 sps:$4 sm:$0xff]   ;;  %v6082_v41 = vld [vmem:[%s8321_s1 + $0xdc8] ss:$16 sps:$4 sm:$0xff]  }
 0x18e   :  { %v6087_v34 = vld [vmem:[%s8321_s1 + $0xde4] ss:$16 sps:$4 sm:$0xff]   ;;  %v6090_v43 = vld [vmem:[%s8321_s1 + $0xdec] ss:$16 sps:$4 sm:$0xff]   ;;  %v6085_v44 = vld [vmem:[%s8321_s1 + $0xde0] ss:$16 sps:$4 sm:$0xff]  }
 0x18f   :  { %3499 = vmatpush1.bf16.msra.mxu0 %v6013_v58  ;;  %3827 = vmatpush1.bf16.msra.mxu1 %v6016_v59  ;;  %v6088_v45 = vld [vmem:[%s8321_s1 + $0xde8] ss:$16 sps:$4 sm:$0xff]   ;;  %v6094_v46 = vld [vmem:[%s8321_s1 + $0xe04] ss:$16 sps:$4 sm:$0xff]   ;;  %v6097_v35 = vld [vmem:[%s8321_s1 + $0xe0c] ss:$16 sps:$4 sm:$0xff]  }
 0x190   :  { %3500 = vmatprep.subr.bf16.mxu0 %v6021_v60  ;;  %3828 = vmatprep.subr.bf16.mxu1 %v6024_v61  ;;  %v6092_v50 = vld [vmem:[%s8321_s1 + $0xe00] ss:$16 sps:$4 sm:$0xff]   ;;  %v6095_v51 = vld [vmem:[%s8321_s1 + $0xe08] ss:$16 sps:$4 sm:$0xff]   ;;  %v6100_v53 = vld [vmem:[%s8321_s1 + $0xe24] ss:$16 sps:$4 sm:$0xff]  }
 0x191   :  { %v6103_v49 = vld [vmem:[%s8321_s1 + $0xe2c] ss:$16 sps:$4 sm:$0xff]   ;;  %v6098_v54 = vld [vmem:[%s8321_s1 + $0xe20] ss:$16 sps:$4 sm:$0xff]   ;;  %v6101_v55 = vld [vmem:[%s8321_s1 + $0xe28] ss:$16 sps:$4 sm:$0xff]  }
 0x192   :  { %v6106_v47 = vld [vmem:[%s8321_s1 + $0xe44] ss:$16 sps:$4 sm:$0xff]   ;;  %v6109_v56 = vld [vmem:[%s8321_s1 + $0xe4c] ss:$16 sps:$4 sm:$0xff]   ;;  %v6104_v57 = vld [vmem:[%s8321_s1 + $0xe40] ss:$16 sps:$4 sm:$0xff]  }
 0x193   :  { %3501 = vmatpush1.bf16.msra.mxu0 %v6019_v62  ;;  %3829 = vmatpush1.bf16.msra.mxu1 %v6022_v63  ;;  %v6107_v58 = vld [vmem:[%s8321_s1 + $0xe48] ss:$16 sps:$4 sm:$0xff]   ;;  %v6112_v59 = vld [vmem:[%s8321_s1 + $0xe64] ss:$16 sps:$4 sm:$0xff]   ;;  %v6115_v60 = vld [vmem:[%s8321_s1 + $0xe6c] ss:$16 sps:$4 sm:$0xff]  }
 0x194   :  { %3502 = vmatprep.subr.bf16.mxu0 %v6027_v0  ;;  %3830 = vmatprep.subr.bf16.mxu1 %v6030_v1  ;;  %v6110_v61 = vld [vmem:[%s8321_s1 + $0xe60] ss:$16 sps:$4 sm:$0xff]   ;;  %v6113_v62 = vld [vmem:[%s8321_s1 + $0xe68] ss:$16 sps:$4 sm:$0xff]   ;;  %v6118_v63 = vld [vmem:[%s8321_s1 + $0xe84] ss:$16 sps:$4 sm:$0xff]  }
 0x195   :  { %v6121_v0 = vld [vmem:[%s8321_s1 + $0xe8c] ss:$16 sps:$4 sm:$0xff]   ;;  %v6116_v1 = vld [vmem:[%s8321_s1 + $0xe80] ss:$16 sps:$4 sm:$0xff]   ;;  %vm6336_vm0 = vmmov 0  }
 0x197   :  { %3503 = vmatpush1.bf16.msra.mxu0 %v6025_v2  ;;  %3831 = vmatpush1.bf16.msra.mxu1 %v6028_v3  ;;  %v6119_v2 = vld [vmem:[%s8321_s1 + $0xe88] ss:$16 sps:$4 sm:$0xff]   ;;  %v6124_v3 = vld [vmem:[%s8321_s1 + $0xea4] ss:$16 sps:$4 sm:$0xff]  }
 0x198   :  { %3504 = vmatprep.subr.bf16.mxu0 %v6033_v4  ;;  %3832 = vmatprep.subr.bf16.mxu1 %v6036_v5  ;;  %v6127_v4 = vld [vmem:[%s8321_s1 + $0xeac] ss:$16 sps:$4 sm:$0xff]   ;;  %v6122_v5 = vld [vmem:[%s8321_s1 + $0xea0] ss:$16 sps:$4 sm:$0xff]  }
 0x19b   :  { %3505 = vmatpush1.bf16.msra.mxu0 %v6031_v6  ;;  %3833 = vmatpush1.bf16.msra.mxu1 %v6034_v7  ;;  %v6125_v6 = vld [vmem:[%s8321_s1 + $0xea8] ss:$16 sps:$4 sm:$0xff]   ;;  %v6130_v7 = vld [vmem:[%s8321_s1 + $0xec4] ss:$16 sps:$4 sm:$0xff]  }
 0x19c   :  { %3506 = vmatprep.subr.bf16.mxu0 %v6039_v8  ;;  %3834 = vmatprep.subr.bf16.mxu1 %v6042_v9  ;;  %v6133_v8 = vld [vmem:[%s8321_s1 + $0xecc] ss:$16 sps:$4 sm:$0xff]   ;;  %v6128_v9 = vld [vmem:[%s8321_s1 + $0xec0] ss:$16 sps:$4 sm:$0xff]  }
 0x19f   :  { %3507 = vmatpush1.bf16.msra.mxu0 %v6037_v10  ;;  %3835 = vmatpush1.bf16.msra.mxu1 %v6040_v11  ;;  %v6131_v10 = vld [vmem:[%s8321_s1 + $0xec8] ss:$16 sps:$4 sm:$0xff]   ;;  %v6136_v11 = vld [vmem:[%s8321_s1 + $0xee4] ss:$16 sps:$4 sm:$0xff]  }
 0x1a0   :  { %3508 = vmatprep.subr.bf16.mxu0 %v6045_v12  ;;  %3836 = vmatprep.subr.bf16.mxu1 %v6048_v52  ;;  %v6139_v12 = vld [vmem:[%s8321_s1 + $0xeec] ss:$16 sps:$4 sm:$0xff]   ;;  %v6134_v52 = vld [vmem:[%s8321_s1 + $0xee0] ss:$16 sps:$4 sm:$0xff]  }
 0x1a3   :  { %3509 = vmatpush1.bf16.msra.mxu0 %v6043_v15  ;;  %3837 = vmatpush1.bf16.msra.mxu1 %v6046_v16  ;;  %v6137_v15 = vld [vmem:[%s8321_s1 + $0xee8] ss:$16 sps:$4 sm:$0xff]   ;;  %v6142_v16 = vld [vmem:[%s8321_s1 + $0xf04] ss:$16 sps:$4 sm:$0xff]  }
 0x1a4   :  { %3510 = vmatprep.subr.bf16.mxu0 %v6051_v17  ;;  %3838 = vmatprep.subr.bf16.mxu1 %v6054_v18  ;;  %v6145_v17 = vld [vmem:[%s8321_s1 + $0xf0c] ss:$16 sps:$4 sm:$0xff]   ;;  %v6140_v18 = vld [vmem:[%s8321_s1 + $0xf00] ss:$16 sps:$4 sm:$0xff]  }
 0x1a7   :  { %3511 = vmatpush1.bf16.msra.mxu0 %v6049_v19  ;;  %3839 = vmatpush1.bf16.msra.mxu1 %v6052_v20  ;;  %v6143_v19 = vld [vmem:[%s8321_s1 + $0xf08] ss:$16 sps:$4 sm:$0xff]   ;;  %v6148_v20 = vld [vmem:[%s8321_s1 + $0xf24] ss:$16 sps:$4 sm:$0xff]  }
 0x1a8   :  { %3512 = vmatprep.subr.bf16.mxu0 %v6057_v22  ;;  %3840 = vmatprep.subr.bf16.mxu1 %v6060_v23  ;;  %v6151_v22 = vld [vmem:[%s8321_s1 + $0xf2c] ss:$16 sps:$4 sm:$0xff]   ;;  %v6146_v23 = vld [vmem:[%s8321_s1 + $0xf20] ss:$16 sps:$4 sm:$0xff]  }
 0x1ab   :  { %3513 = vmatpush1.bf16.msra.mxu0 %v6055_v24  ;;  %3841 = vmatpush1.bf16.msra.mxu1 %v6058_v13  ;;  %v6149_v24 = vld [vmem:[%s8321_s1 + $0xf28] ss:$16 sps:$4 sm:$0xff]   ;;  %v6154_v13 = vld [vmem:[%s8321_s1 + $0xf44] ss:$16 sps:$4 sm:$0xff]  }
 0x1ac   :  { %3514 = vmatprep.subr.bf16.mxu0 %v6063_v27  ;;  %3842 = vmatprep.subr.bf16.mxu1 %v6066_v28  ;;  %v6157_v27 = vld [vmem:[%s8321_s1 + $0xf4c] ss:$16 sps:$4 sm:$0xff]   ;;  %v6152_v28 = vld [vmem:[%s8321_s1 + $0xf40] ss:$16 sps:$4 sm:$0xff]  }
 0x1af   :  { %3515 = vmatpush1.bf16.msra.mxu0 %v6061_v29  ;;  %3843 = vmatpush1.bf16.msra.mxu1 %v6064_v14  ;;  %v6155_v29 = vld [vmem:[%s8321_s1 + $0xf48] ss:$16 sps:$4 sm:$0xff]   ;;  %v6160_v14 = vld [vmem:[%s8321_s1 + $0xf64] ss:$16 sps:$4 sm:$0xff]  }
 0x1b0   :  { %3516 = vmatprep.subr.bf16.mxu0 %v6069_v30  ;;  %3844 = vmatprep.subr.bf16.mxu1 %v6072_v31  ;;  %v6163_v30 = vld [vmem:[%s8321_s1 + $0xf6c] ss:$16 sps:$4 sm:$0xff]   ;;  %v6158_v31 = vld [vmem:[%s8321_s1 + $0xf60] ss:$16 sps:$4 sm:$0xff]  }
 0x1b3   :  { %3517 = vmatpush1.bf16.msra.mxu0 %v6067_v25  ;;  %3845 = vmatpush1.bf16.msra.mxu1 %v6070_v32  ;;  %v6161_v25 = vld [vmem:[%s8321_s1 + $0xf68] ss:$16 sps:$4 sm:$0xff]   ;;  %v6166_v32 = vld [vmem:[%s8321_s1 + $0xf84] ss:$16 sps:$4 sm:$0xff]  }
 0x1b4   :  { %3518 = vmatprep.subr.bf16.mxu0 %v6075_v33  ;;  %3846 = vmatprep.subr.bf16.mxu1 %v6078_v26  ;;  %v6169_v33 = vld [vmem:[%s8321_s1 + $0xf8c] ss:$16 sps:$4 sm:$0xff]   ;;  %v6164_v26 = vld [vmem:[%s8321_s1 + $0xf80] ss:$16 sps:$4 sm:$0xff]  }
 0x1b7   :  { %3519 = vmatpush1.bf16.msra.mxu0 %v6073_v36  ;;  %3847 = vmatpush1.bf16.msra.mxu1 %v6076_v37  ;;  %v6167_v36 = vld [vmem:[%s8321_s1 + $0xf88] ss:$16 sps:$4 sm:$0xff]   ;;  %v6172_v37 = vld [vmem:[%s8321_s1 + $0xfa4] ss:$16 sps:$4 sm:$0xff]  }
 0x1b8   :  { %3520 = vmatprep.subr.bf16.mxu0 %v6081_v21  ;;  %3848 = vmatprep.subr.bf16.mxu1 %v6084_v39  ;;  %v6175_v21 = vld [vmem:[%s8321_s1 + $0xfac] ss:$16 sps:$4 sm:$0xff]   ;;  %v6170_v39 = vld [vmem:[%s8321_s1 + $0xfa0] ss:$16 sps:$4 sm:$0xff]  }
 0x1bb   :  { %3521 = vmatpush1.bf16.msra.mxu0 %v6079_v40  ;;  %3849 = vmatpush1.bf16.msra.mxu1 %v6082_v41  ;;  %v6173_v40 = vld [vmem:[%s8321_s1 + $0xfa8] ss:$16 sps:$4 sm:$0xff]   ;;  %v6178_v41 = vld [vmem:[%s8321_s1 + $0xfc4] ss:$16 sps:$4 sm:$0xff]  }
 0x1bc   :  { %3522 = vmatprep.subr.bf16.mxu0 %v6087_v34  ;;  %3850 = vmatprep.subr.bf16.mxu1 %v6090_v43  ;;  %v6181_v34 = vld [vmem:[%s8321_s1 + $0xfcc] ss:$16 sps:$4 sm:$0xff]   ;;  %v6176_v43 = vld [vmem:[%s8321_s1 + $0xfc0] ss:$16 sps:$4 sm:$0xff]  }
 0x1bf   :  { %3523 = vmatpush1.bf16.msra.mxu0 %v6085_v44  ;;  %3851 = vmatpush1.bf16.msra.mxu1 %v6088_v45  ;;  %v6179_v44 = vld [vmem:[%s8321_s1 + $0xfc8] ss:$16 sps:$4 sm:$0xff]   ;;  %v6184_v45 = vld [vmem:[%s8321_s1 + $0xfe4] ss:$16 sps:$4 sm:$0xff]  }
 0x1c0   :  { %3533 = vmatprep.subr.bf16.mxu0 %v6094_v46  ;;  %3861 = vmatprep.subr.bf16.mxu1 %v6097_v35  ;;  %v6187_v46 = vld [vmem:[%s8321_s1 + $0xfec] ss:$16 sps:$4 sm:$0xff]   ;;  %v6182_v35 = vld [vmem:[%s8321_s1 + $0xfe0] ss:$16 sps:$4 sm:$0xff]  }
 0x1c2   :  { %3525 = vmatmul.mubr.bf16.vlgmr.msra.gmra.mrb[0].mxu0 %v7817_v48  ;;  %3853 = vmatmul.mubr.bf16.vlgmr.msra.gmra.mrb[0].mxu1 %v7817_v48 }
 0x1c3   :  { %3534 = vmatpush1.bf16.msra.mxu0 %v6092_v50  ;;  %3862 = vmatpush1.bf16.msra.mxu1 %v6095_v51  ;;  %v6185_v50 = vld [vmem:[%s8321_s1 + $0xfe8] ss:$16 sps:$4 sm:$0xff]   ;;  %v6190_v51 = vld [vmem:[%s8323_s3 + $0x4] ss:$8 sps:$4 sm:$0xff]  }
 0x1c4   :  { %3535 = vmatprep.subr.bf16.mxu0 %v6100_v53  ;;  %3863 = vmatprep.subr.bf16.mxu1 %v6103_v49  ;;  %v667_v53 = vcombine.high %v7817_v48, %v7817_v48  ;;  %v6188_v49 = vld [vmem:[%s8323_s3] ss:$8 sps:$4 sm:$0xff]   ;;  %v6196_v48 = vld [vmem:[%s8323_s3 + $0x24] ss:$8 sps:$4 sm:$0xff]  }
 0x1c5   :  { %3565 = vmatprep.mubr.bf16.mxu0 %v669_v38  ;;  %3893 = vmatprep.mubr.bf16.mxu1 %v669_v38  ;;  %v6193_v38 = vld [vmem:[%s8323_s3 + $0x14] ss:$8 sps:$4 sm:$0xff]  }
 0x1c7   :  { %3536 = vmatpush1.bf16.msra.mxu0 %v6098_v54  ;;  %3864 = vmatpush1.bf16.msra.mxu1 %v6101_v55  ;;  %v6191_v54 = vld [vmem:[%s8323_s3 + $0x10] ss:$8 sps:$4 sm:$0xff]   ;;  %v6194_v55 = vld [vmem:[%s8323_s3 + $0x20] ss:$8 sps:$4 sm:$0xff]  }
 0x1c8   :  { %3537 = vmatprep.subr.bf16.mxu0 %v6106_v47  ;;  %3865 = vmatprep.subr.bf16.mxu1 %v6109_v56  ;;  %v6199_v47 = vld [vmem:[%s8323_s3 + $0x34] ss:$8 sps:$4 sm:$0xff]   ;;  %v6197_v56 = vld [vmem:[%s8323_s3 + $0x30] ss:$8 sps:$4 sm:$0xff]  }
 0x1cb   :  { %3538 = vmatpush1.bf16.msra.mxu0 %v6104_v57  ;;  %3866 = vmatpush1.bf16.msra.mxu1 %v6107_v58  ;;  %v6202_v57 = vld [vmem:[%s8323_s3 + $0x44] ss:$8 sps:$4 sm:$0xff]   ;;  %v6200_v58 = vld [vmem:[%s8323_s3 + $0x40] ss:$8 sps:$4 sm:$0xff]  }
 0x1cc   :  { %3539 = vmatprep.subr.bf16.mxu0 %v6112_v59  ;;  %3867 = vmatprep.subr.bf16.mxu1 %v6115_v60  ;;  %v6205_v59 = vld [vmem:[%s8323_s3 + $0x54] ss:$8 sps:$4 sm:$0xff]   ;;  %v6203_v60 = vld [vmem:[%s8323_s3 + $0x50] ss:$8 sps:$4 sm:$0xff]  }
 0x1cf   :  { %3540 = vmatpush1.bf16.msra.mxu0 %v6110_v61  ;;  %3868 = vmatpush1.bf16.msra.mxu1 %v6113_v62  ;;  %v6208_v61 = vld [vmem:[%s8323_s3 + $0x64] ss:$8 sps:$4 sm:$0xff]   ;;  %v6206_v62 = vld [vmem:[%s8323_s3 + $0x60] ss:$8 sps:$4 sm:$0xff]  }
 0x1d0   :  { %3541 = vmatprep.subr.bf16.mxu0 %v6118_v63  ;;  %3869 = vmatprep.subr.bf16.mxu1 %v6121_v0  ;;  %v6211_v63 = vld [vmem:[%s8323_s3 + $0x74] ss:$8 sps:$4 sm:$0xff]   ;;  %v6209_v0 = vld [vmem:[%s8323_s3 + $0x70] ss:$8 sps:$4 sm:$0xff]  }
 0x1d3   :  { %3542 = vmatpush1.bf16.msra.mxu0 %v6116_v1  ;;  %3870 = vmatpush1.bf16.msra.mxu1 %v6119_v2  ;;  %v6214_v1 = vld [vmem:[%s8323_s3 + $0x84] ss:$8 sps:$4 sm:$0xff]   ;;  %v6212_v2 = vld [vmem:[%s8323_s3 + $0x80] ss:$8 sps:$4 sm:$0xff]  }
 0x1d4   :  { %3543 = vmatprep.subr.bf16.mxu0 %v6124_v3  ;;  %3871 = vmatprep.subr.bf16.mxu1 %v6127_v4  ;;  %v6217_v3 = vld [vmem:[%s8323_s3 + $0x94] ss:$8 sps:$4 sm:$0xff]   ;;  %v6215_v4 = vld [vmem:[%s8323_s3 + $0x90] ss:$8 sps:$4 sm:$0xff]  }
 0x1d7   :  { %3544 = vmatpush1.bf16.msra.mxu0 %v6122_v5  ;;  %3872 = vmatpush1.bf16.msra.mxu1 %v6125_v6  ;;  %v6220_v5 = vld [vmem:[%s8323_s3 + $0xa4] ss:$8 sps:$4 sm:$0xff]   ;;  %v6218_v6 = vld [vmem:[%s8323_s3 + $0xa0] ss:$8 sps:$4 sm:$0xff]  }
 0x1d8   :  { %3545 = vmatprep.subr.bf16.mxu0 %v6130_v7  ;;  %3873 = vmatprep.subr.bf16.mxu1 %v6133_v8  ;;  %v6223_v7 = vld [vmem:[%s8323_s3 + $0xb4] ss:$8 sps:$4 sm:$0xff]   ;;  %v6221_v8 = vld [vmem:[%s8323_s3 + $0xb0] ss:$8 sps:$4 sm:$0xff]  }
 0x1db   :  { %3546 = vmatpush1.bf16.msra.mxu0 %v6128_v9  ;;  %3874 = vmatpush1.bf16.msra.mxu1 %v6131_v10  ;;  %v6226_v9 = vld [vmem:[%s8323_s3 + $0xc4] ss:$8 sps:$4 sm:$0xff]   ;;  %v6224_v10 = vld [vmem:[%s8323_s3 + $0xc0] ss:$8 sps:$4 sm:$0xff]  }
 0x1dc   :  { %3547 = vmatprep.subr.bf16.mxu0 %v6136_v11  ;;  %3875 = vmatprep.subr.bf16.mxu1 %v6139_v12  ;;  %v6229_v11 = vld [vmem:[%s8323_s3 + $0xd4] ss:$8 sps:$4 sm:$0xff]   ;;  %v6227_v12 = vld [vmem:[%s8323_s3 + $0xd0] ss:$8 sps:$4 sm:$0xff]  }
 0x1df   :  { %3548 = vmatpush1.bf16.msra.mxu0 %v6134_v52  ;;  %3876 = vmatpush1.bf16.msra.mxu1 %v6137_v15  ;;  %v6232_v52 = vld [vmem:[%s8323_s3 + $0xe4] ss:$8 sps:$4 sm:$0xff]   ;;  %v6230_v15 = vld [vmem:[%s8323_s3 + $0xe0] ss:$8 sps:$4 sm:$0xff]  }
 0x1e0   :  { %3549 = vmatprep.subr.bf16.mxu0 %v6142_v16  ;;  %3877 = vmatprep.subr.bf16.mxu1 %v6145_v17  ;;  %v6235_v16 = vld [vmem:[%s8323_s3 + $0xf4] ss:$8 sps:$4 sm:$0xff]   ;;  %v6233_v17 = vld [vmem:[%s8323_s3 + $0xf0] ss:$8 sps:$4 sm:$0xff]  }
 0x1e3   :  { %3550 = vmatpush1.bf16.msra.mxu0 %v6140_v18  ;;  %3878 = vmatpush1.bf16.msra.mxu1 %v6143_v19  ;;  %v6238_v18 = vld [vmem:[%s8323_s3 + $0x104] ss:$8 sps:$4 sm:$0xff]  }
 0x1e4   :  { %3551 = vmatprep.subr.bf16.mxu0 %v6148_v20  ;;  %3879 = vmatprep.subr.bf16.mxu1 %v6151_v22  ;;  %v6284_v19 = vld [vmem:[%s8325_s5 + $0x40] sm:$0xff]   ;;  %v6286_v22 = vld [vmem:[%s8325_s5 + $0x48] sm:$0xff]  }
 0x1e5   :  { %v6285_v20 = vld [vmem:[%s8325_s5] sm:$0xff]  }
 0x1e7   :  { %3552 = vmatpush1.bf16.msra.mxu0 %v6146_v23  ;;  %3880 = vmatpush1.bf16.msra.mxu1 %v6149_v24  ;;  %v6287_v23 = vld [vmem:[%s8325_s5 + $0x8] sm:$0xff]   ;;  %v6288_v24 = vld [vmem:[%s8325_s5 + $0x50] sm:$0xff]  }
 0x1e8   :  { %3553 = vmatprep.subr.bf16.mxu0 %v6154_v13  ;;  %3881 = vmatprep.subr.bf16.mxu1 %v6157_v27  ;;  %v6289_v13 = vld [vmem:[%s8325_s5 + $0x10] sm:$0xff]   ;;  %v6290_v27 = vld [vmem:[%s8325_s5 + $0x58] sm:$0xff]  }
 0x1eb   :  { %3554 = vmatpush1.bf16.msra.mxu0 %v6152_v28  ;;  %3882 = vmatpush1.bf16.msra.mxu1 %v6155_v29  ;;  %v6291_v28 = vld [vmem:[%s8325_s5 + $0x18] sm:$0xff]   ;;  %v6292_v29 = vld [vmem:[%s8325_s5 + $0x60] sm:$0xff]  }
 0x1ec   :  { %3555 = vmatprep.subr.bf16.mxu0 %v6160_v14  ;;  %3883 = vmatprep.subr.bf16.mxu1 %v6163_v30  ;;  %v6293_v14 = vld [vmem:[%s8325_s5 + $0x20] sm:$0xff]   ;;  %v6294_v30 = vld [vmem:[%s8325_s5 + $0x68] sm:$0xff]  }
 0x1ef   :  { %3556 = vmatpush1.bf16.msra.mxu0 %v6158_v31  ;;  %3884 = vmatpush1.bf16.msra.mxu1 %v6161_v25  ;;  %v6295_v31 = vld [vmem:[%s8325_s5 + $0x28] sm:$0xff]   ;;  %v552_v25 = vsub.s32 0, %v6505_v42 }
 0x1f0   :  { %3557 = vmatprep.subr.bf16.mxu0 %v6166_v32  ;;  %3885 = vmatprep.subr.bf16.mxu1 %v6169_v33  ;;  %v8150_v32 = vld [vmem:[%s8322_s2] sm:$0xf]  ;;  %v556_v33 = vsub.s32 1, %v6505_v42 }
 0x1f3   :  { %3558 = vmatpush1.bf16.msra.mxu0 %v6164_v26  ;;  %3886 = vmatpush1.bf16.msra.mxu1 %v6167_v36  ;;  %v564_v26 = vsub.s32 3, %v6505_v42  ;;  %v553_v36 = vrot.slane %v8150_v32, %v552_v25 }
 0x1f4   :  { %3559 = vmatprep.subr.bf16.mxu0 %v6172_v37  ;;  %3887 = vmatprep.subr.bf16.mxu1 %v6175_v21  ;;  %v557_v37 = vrot.slane %v8150_v32, %v556_v33 }
 0x1f5   :  { %v565_v21 = vrot.slane %v8150_v32, %v564_v26  ;;  %v6335_v26 = vmov 0.0  }
 0x1f7   :  { %3560 = vmatpush1.bf16.msra.mxu0 %v6170_v39  ;;  %3888 = vmatpush1.bf16.msra.mxu1 %v6173_v40 }
 0x1f8   :  { %3561 = vmatprep.subr.bf16.mxu0 %v6178_v41  ;;  %3889 = vmatprep.subr.bf16.mxu1 %v6181_v34 }
 0x1fb   :  { %3562 = vmatpush1.bf16.msra.mxu0 %v6176_v43  ;;  %3890 = vmatpush1.bf16.msra.mxu1 %v6179_v44 }
 0x1fc   :  { %3563 = vmatprep.subr.bf16.mxu0 %v6184_v45  ;;  %3891 = vmatprep.subr.bf16.mxu1 %v6187_v46 }
 0x1ff   :  { %3564 = vmatpush1.bf16.msra.mxu0 %v6182_v35  ;;  %3892 = vmatpush1.bf16.msra.mxu1 %v6185_v50 }
 0x200   :  { %4306 = vmatprep.subr.bf16.mxu0 %v6190_v51  ;;  %5297 = vmatprep.subr.bf16.mxu1 %v6284_v19  ;;  %v6275_v19 = vld [vmem:[%s8323_s3 + $0x1d0] ss:$8 sps:$4 sm:$0xff]  }
 0x202   :  { %3566 = vmatmul.mubr.bf16.vlgmr.msra.gmra.mrb[0].mxu0 %v667_v53  ;;  %3894 = vmatmul.mubr.bf16.vlgmr.msra.gmra.mrb[0].mxu1 %v667_v53 }
 0x203   :  { %4307 = vmatpush1.bf16.msra.mxu0 %v6188_v49  ;;  %5298 = vmatpush3.bf16.msra.mxu1 %v6285_v20 }
 0x204   :  { %4308 = vmatprep.subr.bf16.mxu0 %v6193_v38  ;;  %5299 = vmatprep.subr.bf16.mxu1 %v6286_v22  ;;  %v6280_v22 = vld [vmem:[%s8323_s3 + $0x1e4] ss:$8 sps:$4 sm:$0xff]  }
 0x207   :  { %4309 = vmatpush1.bf16.msra.mxu0 %v6191_v54  ;;  %5300 = vmatpush3.bf16.msra.mxu1 %v6287_v23  ;;  %v6278_v23 = vld [vmem:[%s8323_s3 + $0x1e0] ss:$8 sps:$4 sm:$0xff]  }
 0x208   :  { %4310 = vmatprep.subr.bf16.mxu0 %v6196_v48  ;;  %5301 = vmatprep.subr.bf16.mxu1 %v6288_v24  ;;  %v6236_v48 = vld [vmem:[%s8323_s3 + $0x100] ss:$8 sps:$4 sm:$0xff]  }
 0x20b   :  { %4311 = vmatpush1.bf16.msra.mxu0 %v6194_v55  ;;  %5302 = vmatpush3.bf16.msra.mxu1 %v6289_v13  ;;  %v6283_v13 = vld [vmem:[%s8323_s3 + $0x1f4] ss:$8 sps:$4 sm:$0xff]  }
 0x20c   :  { %4312 = vmatprep.subr.bf16.mxu0 %v6199_v47  ;;  %5303 = vmatprep.subr.bf16.mxu1 %v6290_v27  ;;  %v6241_v47 = vld [vmem:[%s8323_s3 + $0x114] ss:$8 sps:$4 sm:$0xff]   ;;  %v6281_v27 = vld [vmem:[%s8323_s3 + $0x1f0] ss:$8 sps:$4 sm:$0xff]  }
 0x20f   :  { %4313 = vmatpush1.bf16.msra.mxu0 %v6197_v56  ;;  %5304 = vmatpush3.bf16.msra.mxu1 %v6291_v28 }
 0x210   :  { %4314 = vmatprep.subr.bf16.mxu0 %v6202_v57  ;;  %5305 = vmatprep.subr.bf16.mxu1 %v6292_v29  ;;  %v6239_v57 = vld [vmem:[%s8323_s3 + $0x110] ss:$8 sps:$4 sm:$0xff]  }
 0x213   :  { %4315 = vmatpush1.bf16.msra.mxu0 %v6200_v58  ;;  %5306 = vmatpush3.bf16.msra.mxu1 %v6293_v14  ;;  %v6244_v58 = vld [vmem:[%s8323_s3 + $0x124] ss:$8 sps:$4 sm:$0xff]   ;;  %v6296_v14 = vld [vmem:[%s8325_s5 + $0x70] sm:$0xff]  }
 0x214   :  { %4316 = vmatprep.subr.bf16.mxu0 %v6205_v59  ;;  %5307 = vmatprep.subr.bf16.mxu1 %v6294_v30  ;;  %v6242_v59 = vld [vmem:[%s8323_s3 + $0x120] ss:$8 sps:$4 sm:$0xff]   ;;  %v6297_v30 = vld [vmem:[%s8325_s5 + $0x30] sm:$0xff]  }
 0x217   :  { %4317 = vmatpush1.bf16.msra.mxu0 %v6203_v60  ;;  %5308 = vmatpush3.bf16.msra.mxu1 %v6295_v31  ;;  %v6247_v60 = vld [vmem:[%s8323_s3 + $0x134] ss:$8 sps:$4 sm:$0xff]  }
 0x218   :  { %4318 = vmatprep.subr.bf16.mxu0 %v6208_v61  ;;  %v6245_v61 = vld [vmem:[%s8323_s3 + $0x130] ss:$8 sps:$4 sm:$0xff]   ;;  %5309 = vmatprep.subr.bf16.mxu1 %v6296_v14 }
 0x219   :  { %v6298_v31 = vld [vmem:[%s8325_s5 + $0x78] sm:$0xff]  }
 0x21b   :  { %4319 = vmatpush1.bf16.msra.mxu0 %v6206_v62  ;;  %v6250_v62 = vld [vmem:[%s8323_s3 + $0x144] ss:$8 sps:$4 sm:$0xff]   ;;  %5310 = vmatpush3.bf16.msra.mxu1 %v6297_v30 }
 0x21c   :  { %4320 = vmatprep.subr.bf16.mxu0 %v6211_v63  ;;  %v6248_v63 = vld [vmem:[%s8323_s3 + $0x140] ss:$8 sps:$4 sm:$0xff]   ;;  %5311 = vmatprep.subr.bf16.mxu1 %v6298_v31 }
 0x21f   :  { %4321 = vmatpush1.bf16.msra.mxu0 %v6209_v0  ;;  %v6253_v0 = vld [vmem:[%s8323_s3 + $0x154] ss:$8 sps:$4 sm:$0xff]  }
 0x220   :  { %4322 = vmatprep.subr.bf16.mxu0 %v6214_v1  ;;  %v6251_v1 = vld [vmem:[%s8323_s3 + $0x150] ss:$8 sps:$4 sm:$0xff]  }
 0x223   :  { %4323 = vmatpush1.bf16.msra.mxu0 %v6212_v2  ;;  %v6256_v2 = vld [vmem:[%s8323_s3 + $0x164] ss:$8 sps:$4 sm:$0xff]  }
 0x224   :  { %4324 = vmatprep.subr.bf16.mxu0 %v6217_v3  ;;  %v6254_v3 = vld [vmem:[%s8323_s3 + $0x160] ss:$8 sps:$4 sm:$0xff]  }
 0x227   :  { %4325 = vmatpush1.bf16.msra.mxu0 %v6215_v4  ;;  %v6259_v4 = vld [vmem:[%s8323_s3 + $0x174] ss:$8 sps:$4 sm:$0xff]  }
 0x228   :  { %4326 = vmatprep.subr.bf16.mxu0 %v6220_v5  ;;  %v6257_v5 = vld [vmem:[%s8323_s3 + $0x170] ss:$8 sps:$4 sm:$0xff]  }
 0x22b   :  { %4327 = vmatpush1.bf16.msra.mxu0 %v6218_v6  ;;  %v6262_v6 = vld [vmem:[%s8323_s3 + $0x184] ss:$8 sps:$4 sm:$0xff]  }
 0x22c   :  { %4328 = vmatprep.subr.bf16.mxu0 %v6223_v7  ;;  %v6260_v7 = vld [vmem:[%s8323_s3 + $0x180] ss:$8 sps:$4 sm:$0xff]  }
 0x22f   :  { %4329 = vmatpush1.bf16.msra.mxu0 %v6221_v8  ;;  %v6265_v8 = vld [vmem:[%s8323_s3 + $0x194] ss:$8 sps:$4 sm:$0xff]  }
 0x230   :  { %4330 = vmatprep.subr.bf16.mxu0 %v6226_v9  ;;  %v6263_v9 = vld [vmem:[%s8323_s3 + $0x190] ss:$8 sps:$4 sm:$0xff]  }
 0x233   :  { %4331 = vmatpush1.bf16.msra.mxu0 %v6224_v10  ;;  %v6268_v10 = vld [vmem:[%s8323_s3 + $0x1a4] ss:$8 sps:$4 sm:$0xff]  }
 0x234   :  { %4332 = vmatprep.subr.bf16.mxu0 %v6229_v11  ;;  %v6266_v11 = vld [vmem:[%s8323_s3 + $0x1a0] ss:$8 sps:$4 sm:$0xff]  }
 0x237   :  { %4333 = vmatpush1.bf16.msra.mxu0 %v6227_v12  ;;  %v6271_v12 = vld [vmem:[%s8323_s3 + $0x1b4] ss:$8 sps:$4 sm:$0xff]  }
 0x238   :  { %4334 = vmatprep.subr.bf16.mxu0 %v6232_v52  ;;  %v6269_v52 = vld [vmem:[%s8323_s3 + $0x1b0] ss:$8 sps:$4 sm:$0xff]  }
 0x23b   :  { %4335 = vmatpush1.bf16.msra.mxu0 %v6230_v15  ;;  %v6274_v15 = vld [vmem:[%s8323_s3 + $0x1c4] ss:$8 sps:$4 sm:$0xff]  }
 0x23c   :  { %4336 = vmatprep.subr.bf16.mxu0 %v6235_v16  ;;  %v6272_v16 = vld [vmem:[%s8323_s3 + $0x1c0] ss:$8 sps:$4 sm:$0xff]  }
 0x23f   :  { %4337 = vmatpush1.bf16.msra.mxu0 %v6233_v17  ;;  %v560_v17 = vsub.s32 2, %v6505_v42  ;;  %v6301_v42 = vld [vmem:[%s8327_s7 + $0x8] sm:$0xff]  }
 0x240   :  { %4347 = vmatprep.subr.bf16.mxu0 %v6238_v18  ;;  %v6277_v18 = vld [vmem:[%s8323_s3 + $0x1d4] ss:$8 sps:$4 sm:$0xff]  }
 0x241   :  { %v561_v20 = vrot.slane %v8150_v32, %v560_v17  ;;  %v6299_v32 = vld [vmem:[%s8325_s5 + $0x38] sm:$0xff]  }
 0x242   :  { %5312 = vmatpush3.bf16.msra.mxu1 %v6299_v32 }
 0x243   :  { %5328 = vmatprep.subr.bf16.mxu1 %v6335_v26 }
 0x2d5   :  { %v3567_v39 = vpop.f32.mrb[0].mxu0  ;;  %v8161_v40 = vpop.f32.mrb[0].mxu1 }
 0x2d6   :  { %v5348_v41 = vadd.f32 %v3567_v39, %v553_v36  ;;  %v3569_v34 = vpop.f32.mrb[1].mxu0  ;;  %v3897_v43 = vpop.f32.mrb[1].mxu1  ;;  %v5350_v24 = vadd.f32 %v8161_v40, %v561_v20  ;;  %v3974_v36 = vld [vmem:[%s8324_s4] sm:$0x3] }
 0x2d7   :  { %v5349_v44 = vadd.f32 %v3569_v34, %v557_v37  ;;  %v5351_v45 = vadd.f32 %v3897_v43, %v565_v21  ;;  %v3571_v46 = vpop.f32.mrb[2].mxu0  ;;  %v3899_v35 = vpop.f32.mrb[2].mxu1  ;;  %v3979_v37 = vrot.slane %v3974_v36, %v552_v25  ;;  %v3983_v21 = vrot.slane %v3974_v36, %v556_v33  ;;  %v6302_v25 = vld [vmem:[%s8327_s7 + $0x10] sm:$0xff]   ;;  %v6303_v33 = vld [vmem:[%s8327_s7 + $0x18] sm:$0xff]  }
 0x2d8   :  { %v3902_v50 = vmax.f32 %v5348_v41, 0.0  ;;  %v3572_v51 = vpop.f32.mrb[3].mxu0  ;;  %v3900_v53 = vpop.f32.mrb[3].mxu1  ;;  %v3904_v28 = vmax.f32 %v5350_v24, 0.0 }
 0x2d9   :  { %v3903_v49 = vmax.f32 %v5349_v44, 0.0  ;;  %v3905_v38 = vmax.f32 %v5351_v45, 0.0  ;;  %v6304_v53 = vld [vmem:[%s8327_s7 + $0x20] sm:$0xff]  }
 0x2da   :  { %v3906_v55 = vpack.c.bf16 %v3902_v50, %v3902_v50  ;;  %v3908_v29 = vpack.c.bf16 %v3904_v28, %v3904_v28  ;;  %v6300_v50 = vld [vmem:[%s8327_s7] sm:$0xff]  }
 0x2db   :  { %v3907_v54 = vpack.c.bf16 %v3903_v49, %v3903_v49  ;;  %v3909_v56 = vpack.c.bf16 %v3905_v38, %v3905_v38  ;;  %v6305_v49 = vld [vmem:[%s8327_s7 + $0x28] sm:$0xff]   ;;  %v6306_v38 = vld [vmem:[%s8327_s7 + $0x30] sm:$0xff]  }
 0x2dd   :  { %4338 = vmatprep.mubr.bf16.mxu0 %v3907_v54  ;;  %v6307_v54 = vld [vmem:[%s8327_s7 + $0x38] sm:$0xff]   ;;  %s6337_s7 = smov [#allocation2]  }
 0x2de   :  { %4339 = vmatmul.mubr.bf16.vlgmr.msra.gmra.mrb[4].mxu0 %v3906_v55  ;;  %v5271_v55 = vld [vmem:[%s8326_s6] ss:$0 sm:$0xff]  ;;  %s4687_s12 = sshll.u32 %s6337_s7, 4  ;;  %s4688_s12 = int_to_ptr.vmem [resolvable:$true] %s4687_s12 }
 0x2df   :  { %4348 = vmatpush1.bf16.msra.mxu0 %v6236_v48  ;;  %4379 = vmatprep.mubr.bf16.mxu0 %v3909_v56  ;;  %s6310_s6 = scalar_lea.vmem %s4688_s12, 32  ;;  %p6315_p1 = scmp.lt.s32.totalorder %s4688_s12, %s4688_s12 }
 0x2e0   :  { %4349 = vmatprep.subr.bf16.mxu0 %v6241_v47  ;;  %p6311_p0 = scmp.ne.s32.totalorder %s4688_s12, %s6310_s6  ;;  %p6316_p2 = scmp.lt.s32.totalorder %s6310_s6, %s6310_s6 }
 0x2e2   :  { %p6317_p3 = por %p6316_p2, %p6315_p1 }
 0x2e3   :  { %4350 = vmatpush1.bf16.msra.mxu0 %v6239_v57 }
 0x2e4   :  { %4351 = vmatprep.subr.bf16.mxu0 %v6244_v58  ;;  %p6318_p4 = pnand %p6317_p3, %p6311_p0 }
 0x2e7   :  { %4352 = vmatpush1.bf16.msra.mxu0 %v6242_v59 }
 0x2e8   :  { %4353 = vmatprep.subr.bf16.mxu0 %v6247_v60 }
 0x2eb   :  { %4354 = vmatpush1.bf16.msra.mxu0 %v6245_v61 }
 0x2ec   :  { %4355 = vmatprep.subr.bf16.mxu0 %v6250_v62  ;;  %v5288_v62 = vld [vmem:[%s8328_s8] ss:$0 sm:$0xff] }
 0x2ef   :  { %4356 = vmatpush1.bf16.msra.mxu0 %v6248_v63 }
 0x2f0   :  { %4357 = vmatprep.subr.bf16.mxu0 %v6253_v0 }
 0x2f3   :  { %4358 = vmatpush1.bf16.msra.mxu0 %v6251_v1 }
 0x2f4   :  { %4359 = vmatprep.subr.bf16.mxu0 %v6256_v2 }
 0x2f7   :  { %4360 = vmatpush1.bf16.msra.mxu0 %v6254_v3 }
 0x2f8   :  { %4361 = vmatprep.subr.bf16.mxu0 %v6259_v4 }
 0x2fb   :  { %4362 = vmatpush1.bf16.msra.mxu0 %v6257_v5 }
 0x2fc   :  { %4363 = vmatprep.subr.bf16.mxu0 %v6262_v6 }
 0x2ff   :  { %4364 = vmatpush1.bf16.msra.mxu0 %v6260_v7 }
 0x300   :  { %4365 = vmatprep.subr.bf16.mxu0 %v6265_v8 }
 0x303   :  { %4366 = vmatpush1.bf16.msra.mxu0 %v6263_v9 }
 0x304   :  { %4367 = vmatprep.subr.bf16.mxu0 %v6268_v10 }
 0x307   :  { %4368 = vmatpush1.bf16.msra.mxu0 %v6266_v11 }
 0x308   :  { %4369 = vmatprep.subr.bf16.mxu0 %v6271_v12 }
 0x30b   :  { %4370 = vmatpush1.bf16.msra.mxu0 %v6269_v52 }
 0x30c   :  { %4371 = vmatprep.subr.bf16.mxu0 %v6274_v15 }
 0x30f   :  { %4372 = vmatpush1.bf16.msra.mxu0 %v6272_v16 }
 0x310   :  { %4373 = vmatprep.subr.bf16.mxu0 %v6277_v18 }
 0x313   :  { %4374 = vmatpush1.bf16.msra.mxu0 %v6275_v19 }
 0x314   :  { %4375 = vmatprep.subr.bf16.mxu0 %v6280_v22 }
 0x317   :  { %4376 = vmatpush1.bf16.msra.mxu0 %v6278_v23 }
 0x318   :  { %4377 = vmatprep.subr.bf16.mxu0 %v6283_v13 }
 0x31b   :  { %4378 = vmatpush1.bf16.msra.mxu0 %v6281_v27 }
 0x31e   :  { %4380 = vmatmul.mubr.bf16.vlgmr.msra.gmra.mrb[4].mxu0 %v3908_v29 }
 0x3f1   :  { %v4381_v39 = vpop.f32.mrb[4].mxu0 }
 0x3f2   :  { %v5352_v40 = vadd.f32 %v4381_v39, %v3979_v37  ;;  %v4383_v41 = vpop.f32.mrb[5].mxu0 }
 0x3f3   :  { %v5353_v34 = vadd.f32 %v4383_v41, %v3983_v21  ;;  %v4385_v43 = vpop.f32.mrb[6].mxu0 }
 0x3f4   :  { %v4388_v44 = vmax.f32 %v5352_v40, 0.0  ;;  %v4386_v45 = vpop.f32.mrb[7].mxu0 }
 0x3f5   :  { %v4389_v46 = vmax.f32 %v5353_v34, 0.0 }
 0x3f6   :  { %v4390_v51 = vpack.c.bf16 %v4388_v44, %v4388_v44 }
 0x3f7   :  { %v4391_v35 = vpack.c.bf16 %v4389_v46, %v4389_v46 }
 0x3f9   :  { %4559 = vmatprep.mubr.bf16.mxu1 %v4391_v35 }
 0x3fa   :  { %4560 = vmatmul.mubr.bf16.vlgmr.msra.gmra.mrb[4].mxu1 %v4390_v51 }
 0x3fb   :  { %5329 = vmatpush3.bf16.msra.mxu1 %v6300_v50  ;;  %5344 = vmatprep.mubr.msk.bf16.mxu1 %vm6336_vm0, %v6335_v26 }
 0x3fc   :  { %5330 = vmatprep.subr.bf16.mxu1 %v6335_v26 }
 0x3ff   :  { %5331 = vmatpush3.bf16.msra.mxu1 %v6301_v42 }
 0x400   :  { %5332 = vmatprep.subr.bf16.mxu1 %v6335_v26 }
 0x403   :  { %5333 = vmatpush3.bf16.msra.mxu1 %v6302_v25 }
 0x404   :  { %5334 = vmatprep.subr.bf16.mxu1 %v6335_v26 }
 0x407   :  { %5335 = vmatpush3.bf16.msra.mxu1 %v6303_v33 }
 0x408   :  { %5336 = vmatprep.subr.bf16.mxu1 %v6335_v26 }
 0x40b   :  { %5337 = vmatpush3.bf16.msra.mxu1 %v6304_v53 }
 0x40c   :  { %5338 = vmatprep.subr.bf16.mxu1 %v6335_v26 }
 0x40f   :  { %5339 = vmatpush3.bf16.msra.mxu1 %v6305_v49 }
 0x410   :  { %5340 = vmatprep.subr.bf16.mxu1 %v6335_v26 }
 0x413   :  { %5341 = vmatpush3.bf16.msra.mxu1 %v6306_v38 }
 0x414   :  { %5342 = vmatprep.subr.bf16.mxu1 %v6335_v26 }
 0x417   :  { %5343 = vmatpush3.bf16.msra.mxu1 %v6307_v54 }
 0x4cd   :  { %v5313_v48 = vpop.f32.mrb[4].mxu1 }
 0x4ce   :  { %v5314_v47 = vpop.f32.mrb[5].mxu1 }
 0x4cf   :  { %v5315_v56 = vadd.f32 %v5314_v47, %v5313_v48  ;;  %v5316_v57 = vpop.f32.mrb[6].mxu1 }
 0x4d0   :  { %v5317_v58 = vpop.f32.mrb[7].mxu1 }
 0x4d1   :  { %v4562_v59 = vadd.f32 %v5315_v56, %v5271_v55 }
 0x4d3   :  { %v4567_v60 = vmax.f32 %v4562_v59, 0.0 }
 0x4d5   :  { %v4568_v61 = vpack.c.bf16 %v4567_v60, %v4567_v60 }
 0x4d7   :  { %5345 = vmatmul.mubr.bf16.vlgmr.msra.gmra.mrb[8].mxu1 %v4568_v61 }
 0x5aa   :  { %v4674_v63 = vpop.f32.mrb[8].mxu1 }
 0x5ab   :  { %v4675_v0 = vadd.f32 %v5288_v62, %v4674_v63  ;;  %v5346_v1 = vpop.f32.mrb[9].mxu1 }
 0x5ac   :  { %v4677_v2 = vpop.f32.mrb[10].mxu1 }
 0x5ad   :  { %4680 = vst [vmem:[#allocation2] sm:$0x3] %v4675_v0  ;;  %v5347_v3 = vpop.f32.mrb[11].mxu1 }
 0x5ae   :  { %6321 = shalt.err (!%p6318_p4)
}
 0x5af   :  { %s6322_s8 = scalar_lea.hbm %s8329_s9, 32 }
 0x5b0   :  { %p6323_p5 = scmp.ne.s32.totalorder %s8329_s9, %s6322_s8  ;;  %p6326_p6 = scmp.lt.u32.totalorder %s6322_s8, %s8329_s9 }
 0x5b2   :  { %p6328_p7 = pnand %p6326_p6, %p6323_p5 }
 0x5b4   :  { %6331 = shalt.err (!%p6328_p7)
}
 0x5b5   :  { %4690 = dma.vmem_to_hbm [thread:$0]  %s4688_s12, 32, %s8329_s9, [#allocation3]  }
 0x5b6   :  { %6332 = dma.done.wait [#allocation3], 32  }
 0x5b7   :  { %6333 = vsyncadd [#allocation3], 4294967264 }
 0x5b8   :  { %4694 = vsyncpa [#allocation3], 1 }

</bundles_post_ra>
